<compile_context>
chip_gen: v7x
topology: tpu7x:2x2x1
jax: 0.10.0
libtpu: 0.0.40
codegen_flags: <defaults>
</compile_context>

<pallas_src>
import math
import functools

import jax
import jax.numpy as jnp
import numpy as np
from jax.experimental import pallas as pl
from jax.experimental.pallas import tpu as pltpu


# ----------------------------- kernel helpers -------------------------------

def _gelu_tanh(x):
    # tanh-GELU: the tanh lands on the otherwise-idle EUP slot; ~4 VALU ops
    # vs ~12+ for the erf polynomial. Max deviation from exact GELU ~3e-4.
    c = 0.7978845608028654  # sqrt(2/pi)
    return 0.5 * x * (1.0 + jnp.tanh(c * (x + 0.044715 * x * x * x)))


def _layernorm_cf(v, gamma, beta, eps=1e-5):
    # LayerNorm over the channel (sublane) axis of a (C, lanes) slab.
    mu = jnp.mean(v, axis=0, keepdims=True)
    var = jnp.mean((v - mu) * (v - mu), axis=0, keepdims=True)
    return (v - mu) * jax.lax.rsqrt(var + eps) * gamma + beta


# --------------------------------- kernel -----------------------------------

def ssa_kernel(
    x_ref,                    # (B, C, TN)   f32
    p_ref,                    # (Hh, C)      bf16  channel -> head pooling
    e_ref,                    # (C, Hh)      bf16  head -> channel broadcast
    g1_ref, be1_ref,          # (C, 1)       f32   layernorm1
    wqkv_ref, bqkv_ref,       # (3C, C) bf16, (3C, 1) f32  fused QKV (q pre-scaled)
    wo_ref, bo_ref,           # (C, C)  bf16, (C, 1)  f32  out_proj
    w1_ref, b1_ref,           # (4C, C) bf16, (4C, 1) f32  mlp fc1
    w2_ref, b2_ref,           # (C, 4C) bf16, (C, 1)  f32  mlp fc2
    g2_ref, be2_ref,          # (C, 1)       f32   layernorm2
    o_ref,                    # (B, C, TN)   f32
):
    B, C, TN = x_ref.shape
    bf16, f32 = jnp.bfloat16, jnp.float32

    def lane(a, idx):         # lane-axis slab `idx` of width TN (128-aligned)
        return a[:, idx * TN:(idx + 1) * TN]

    g1, be1 = g1_ref[...], be1_ref[...]
    g2, be2 = g2_ref[...], be2_ref[...]

    # ---- norm1 for all b, stacked along lanes, then ONE fused-QKV matmul ----
    y1 = jnp.concatenate(
        [_layernorm_cf(x_ref[b].astype(f32), g1, be1) for b in range(B)],
        axis=1)                                                  # (C, B*TN) f32
    qkv = jnp.dot(wqkv_ref[...], y1.astype(bf16),
                  preferred_element_type=f32) + bqkv_ref[...]    # (3C, B*TN)
    q_bf = qkv[0:C, :].astype(bf16)         # 1/sqrt(D) already folded into wq
    k_bf = qkv[C:2 * C, :].astype(bf16)     # only feeds the bf16 product
    v = qkv[2 * C:3 * C, :]                 # f32, used in the f32 weighted sum

    # ---- attention over the length-B sequence axis --------------------------
    # all B*B elementwise (q_i * k_j) products stacked along lanes:
    # ONE score matmul, per-head scores (not channel-replicated).
    prod = jnp.concatenate(
        [lane(q_bf, i) * lane(k_bf, j) for i in range(B) for j in range(B)],
        axis=1)                                                  # (C, B*B*TN) bf16
    s = jnp.dot(p_ref[...], prod, preferred_element_type=f32)   # (Hh, B*B*TN)

    # softmax over keys j at head granularity (tiny (Hh, TN) slabs)
    w_slabs = []
    for i in range(B):
        sj = [lane(s, i * B + j) for j in range(B)]
        m = sj[0]
        for j in range(1, B):
            m = jnp.maximum(m, sj[j])
        e = [jnp.exp(t - m) for t in sj]
        den = e[0]
        for j in range(1, B):
            den = den + e[j]
        inv = pl.reciprocal(den, approx=True)                   # EUP, ~free
        w_slabs.extend([t * inv for t in e])
    w_all = jnp.concatenate(w_slabs, axis=1).astype(bf16)        # (Hh, B*B*TN)

    # broadcast per-head weights back to channels with ONE tiny MXU pass (K=Hh)
    wb = jnp.dot(e_ref[...], w_all, preferred_element_type=f32)  # (C, B*B*TN)

    # weighted sums over keys j, queries i stacked along lanes
    accs = []
    for i in range(B):
        acc = lane(wb, i * B) * lane(v, 0)
        for j in range(1, B):
            acc = acc + lane(wb, i * B + j) * lane(v, j)
        accs.append(acc)
    acc_all = jnp.concatenate(accs, axis=1)                      # (C, B*TN) f32

    # ---- out-projection + residual (residual is the *normed* input, as in
    #      the PyTorch module where x is overwritten by norm1(x)) -------------
    attn = jnp.dot(wo_ref[...], acc_all.astype(bf16),
                   preferred_element_type=f32) + bo_ref[...]
    x2 = attn + y1                                               # (C, B*TN)

    # ---- MLP (Dropout p=0.1 omitted -> eval/inference identity) -------------
    # TODO(synk): dropout not implemented (inference semantics only).
    h = jnp.dot(w1_ref[...], x2.astype(bf16),
                preferred_element_type=f32) + b1_ref[...]        # (4C, B*TN)
    h = _gelu_tanh(h)
    mlp = jnp.dot(w2_ref[...], h.astype(bf16),
                  preferred_element_type=f32) + b2_ref[...]      # (C, B*TN)

    # x = mlp(x) + norm2(x)
    out = mlp + _layernorm_cf(x2, g2, be2)
    for b in range(B):
        o_ref[b] = lane(out, b).astype(o_ref.dtype)


# -------------------------------- wrapper -----------------------------------

def _default_tile_n(N):
    # Cap the lane tile at 256 (vreg-friendly working set); on v7x split N
    # across the two TensorCores via the ("parallel",) grid.
    if N % 128 != 0:
        return N                                  # single full block
    tn = min(256, N)
    try:
        kind = (jax.devices()[0].device_kind or "").lower()
    except Exception:
        kind = ""
    if "v7" in kind and (N // 2) % 128 == 0 and (N // 2) >= 128:
        tn = min(tn, N // 2)
    while N % tn != 0:
        tn -= 128
    return max(tn, 128)


@functools.partial(jax.jit, static_argnames=("num_heads", "tile_n"))
def _ssa_forward(x, params, num_heads, tile_n):
    B, C, H, W = x.shape
    N = H * W
    D = C // num_heads
    f32, bf16 = jnp.float32, jnp.bfloat16

    # NCHW -> (B, C, N): contiguous view, no transpose / HBM round trip.
    x3d = x.reshape(B, C, N).astype(f32)

    def col(v):  # 1-D param -> (len, 1) f32 column (broadcasts along lanes)
        return v.reshape(-1, 1).astype(f32)

    # channel<->head pooling / broadcast matrices (0/1, exact in bf16)
    ch_head = jnp.arange(C, dtype=jnp.int32) // D
    hh = jnp.arange(num_heads, dtype=jnp.int32)
    p_mat = (hh[:, None] == ch_head[None, :]).astype(bf16)       # (Hh, C)
    e_mat = (ch_head[:, None] == hh[None, :]).astype(bf16)       # (C, Hh)

    # fused QKV with the 1/sqrt(D) attention scale folded into the q rows
    scale = 1.0 / math.sqrt(D)
    wqkv = jnp.concatenate(
        [params["wq"] * scale, params["wk"], params["wv"]], axis=0).astype(bf16)
    bqkv = jnp.concatenate(
        [params["bq"] * scale, params["bk"], params["bv"]],
        axis=0).reshape(-1, 1).astype(f32)

    weights = [
        p_mat, e_mat,
        col(params["g1"]), col(params["be1"]),
        wqkv, bqkv,
        params["wo"].astype(bf16), col(params["bo"]),
        params["w1"].astype(bf16), col(params["bm1"]),
        params["w2"].astype(bf16), col(params["bm2"]),
        col(params["g2"]), col(params["be2"]),
    ]

    def full_spec(arr):
        return pl.BlockSpec(arr.shape, lambda n: (0,) * arr.ndim)

    # advisory cost estimate (helps XLA schedule around the custom call)
    matmul_flops = (2 * B * N * C * C * (3 + 1 + 4 + 4)          # qkv, wo, w1, w2
                    + 2 * B * B * N * num_heads * C * 2)         # scores + bcast
    transcendentals = (num_heads * B * B * N                     # exp
                       + 4 * C * B * N                           # tanh (GELU)
                       + 2 * B * N                               # rsqrt (LN)
                       + num_heads * B * N)                      # reciprocal
    bytes_accessed = 2 * B * C * N * 4 + sum(
        int(np.prod(w.shape)) * w.dtype.itemsize for w in weights)

    grid = (N // tile_n,)
    out3d = pl.pallas_call(
        ssa_kernel,
        out_shape=jax.ShapeDtypeStruct((B, C, N), jnp.float32),
        grid=grid,
        in_specs=[pl.BlockSpec((B, C, tile_n), lambda n: (0, 0, n))]
                 + [full_spec(w) for w in weights],
        out_specs=pl.BlockSpec((B, C, tile_n), lambda n: (0, 0, n)),
        compiler_params=pltpu.CompilerParams(
            dimension_semantics=("parallel",)),
        cost_estimate=pl.CostEstimate(
            flops=int(matmul_flops),
            transcendentals=int(transcendentals),
            bytes_accessed=int(bytes_accessed)),
    )(x3d, *weights)

    # (B, C, N) -> NCHW: contiguous view again, no transpose.
    return out3d.reshape(B, C, H, W)


def spatio_spectral_attention(x, params, num_heads=8, tile_n=None):
    B, C, H, W = x.shape
    N = H * W
    assert C % num_heads == 0
    if tile_n is None:
        tile_n = _default_tile_n(N)
    tile_n = min(tile_n, N)
    assert N % tile_n == 0
    assert tile_n == N or tile_n % 128 == 0
    return _ssa_forward(x, params, num_heads, tile_n)


# ---------------------- pure-JAX reference (for checking) -------------------

def reference_forward(x, p, num_heads=8):
    B, C, H, W = x.shape
    N = H * W
    t = jnp.transpose(x.reshape(B, C, N), (0, 2, 1))  # (L=B, batch=N, C)

    def ln(v, g, b):
        mu = v.mean(-1, keepdims=True)
        var = ((v - mu) ** 2).mean(-1, keepdims=True)
        return (v - mu) / jnp.sqrt(var + 1e-5) * g + b

    y1 = ln(t, p["g1"], p["be1"])
    D = C // num_heads
    q = y1 @ p["wq"].T + p["bq"]
    k = y1 @ p["wk"].T + p["bk"]
    v = y1 @ p["wv"].T + p["bv"]
    qh = q.reshape(B, N, num_heads, D)
    kh = k.reshape(B, N, num_heads, D)
    vh = v.reshape(B, N, num_heads, D)
    scores = jnp.einsum("inhd,jnhd->nhij", qh, kh) / jnp.sqrt(jnp.float32(D))
    w = jax.nn.softmax(scores, axis=-1)
    o = jnp.einsum("nhij,jnhd->inhd", w, vh).reshape(B, N, C)
    attn = o @ p["wo"].T + p["bo"]
    x2 = attn + y1
    h = jax.nn.gelu(x2 @ p["w1"].T + p["bm1"], approximate=False)
    mlp = h @ p["w2"].T + p["bm2"]
    out = mlp + ln(x2, p["g2"], p["be2"])
    return jnp.transpose(out, (0, 2, 1)).reshape(B, C, H, W)


# ---------------------------------- main -------------------------------------

def make_params(key, C):
    ks = jax.random.split(key, 16)
    n = lambda k, shape, s=0.02: s * jax.random.normal(k, shape, jnp.float32)
    return dict(
        g1=1.0 + 0.1 * jax.random.normal(ks[0], (C,), jnp.float32),
        be1=0.1 * jax.random.normal(ks[1], (C,), jnp.float32),
        wq=n(ks[2], (C, C)), wk=n(ks[3], (C, C)), wv=n(ks[4], (C, C)),
        bq=n(ks[5], (C,)), bk=n(ks[6], (C,)), bv=n(ks[7], (C,)),
        wo=n(ks[8], (C, C)), bo=n(ks[9], (C,)),
        w1=n(ks[10], (4 * C, C)), bm1=n(ks[11], (4 * C,)),
        w2=n(ks[12], (C, 4 * C)), bm2=n(ks[13], (C,)),
        g2=1.0 + 0.1 * jax.random.normal(ks[14], (C,), jnp.float32),
        be2=0.1 * jax.random.normal(ks[15], (C,), jnp.float32),
    )


if __name__ == "__main__":
    B, C, H, W = 2, 32, 16, 16
    num_heads = 8

    key = jax.random.PRNGKey(0)
    kx, kp = jax.random.split(key)
    x = jax.random.normal(kx, (B, C, H, W), jnp.float32)
    params = make_params(kp, C)

    out = spatio_spectral_attention(x, params, num_heads=num_heads)
    out = jax.block_until_ready(out)

    ref = jax.block_until_ready(reference_forward(x, params, num_heads=num_heads))
    # bf16 MXU operands + approx reciprocal + tanh-GELU -> 1e-2 tolerance.
    np.testing.assert_allclose(np.asarray(out), np.asarray(ref), rtol=1e-2, atol=1e-2)

    print("KERNEL_OK")
</pallas_src>

<mosaic_0001>
module attributes {stable_mosaic.version = 11 : i64} {
  func.func @ssa_kernel(%arg0: i32, %arg1: memref<2x32x256xf32, #tpu.memory_space<vmem>>, %arg2: memref<8x32xbf16, #tpu.memory_space<vmem>>, %arg3: memref<32x8xbf16, #tpu.memory_space<vmem>>, %arg4: memref<32x1xf32, #tpu.memory_space<vmem>>, %arg5: memref<32x1xf32, #tpu.memory_space<vmem>>, %arg6: memref<96x32xbf16, #tpu.memory_space<vmem>>, %arg7: memref<96x1xf32, #tpu.memory_space<vmem>>, %arg8: memref<32x32xbf16, #tpu.memory_space<vmem>>, %arg9: memref<32x1xf32, #tpu.memory_space<vmem>>, %arg10: memref<128x32xbf16, #tpu.memory_space<vmem>>, %arg11: memref<128x1xf32, #tpu.memory_space<vmem>>, %arg12: memref<32x128xbf16, #tpu.memory_space<vmem>>, %arg13: memref<32x1xf32, #tpu.memory_space<vmem>>, %arg14: memref<32x1xf32, #tpu.memory_space<vmem>>, %arg15: memref<32x1xf32, #tpu.memory_space<vmem>>, %arg16: memref<2x32x256xf32, #tpu.memory_space<vmem>>) attributes {dimension_semantics = [#tpu.dimension_semantics<parallel>], iteration_bounds = array<i64: 1>, scalar_prefetch = 0 : i64, scratch_operands = 0 : i64, tpu.core_type = #tpu.core_type<tc>, window_params = [{transform_indices = @transform_0, window_bounds = array<i64: 2, 32, 256>}, {pipeline_mode = #tpu.pipeline_mode<synchronous>, transform_indices = @transform_1, window_bounds = array<i64: 8, 32>}, {pipeline_mode = #tpu.pipeline_mode<synchronous>, transform_indices = @transform_2, window_bounds = array<i64: 32, 8>}, {pipeline_mode = #tpu.pipeline_mode<synchronous>, transform_indices = @transform_3, window_bounds = array<i64: 32, 1>}, {pipeline_mode = #tpu.pipeline_mode<synchronous>, transform_indices = @transform_4, window_bounds = array<i64: 32, 1>}, {pipeline_mode = #tpu.pipeline_mode<synchronous>, transform_indices = @transform_5, window_bounds = array<i64: 96, 32>}, {pipeline_mode = #tpu.pipeline_mode<synchronous>, transform_indices = @transform_6, window_bounds = array<i64: 96, 1>}, {pipeline_mode = #tpu.pipeline_mode<synchronous>, transform_indices = @transform_7, window_bounds = array<i64: 32, 32>}, {pipeline_mode = #tpu.pipeline_mode<synchronous>, transform_indices = @transform_8, window_bounds = array<i64: 32, 1>}, {pipeline_mode = #tpu.pipeline_mode<synchronous>, transform_indices = @transform_9, window_bounds = array<i64: 128, 32>}, {pipeline_mode = #tpu.pipeline_mode<synchronous>, transform_indices = @transform_10, window_bounds = array<i64: 128, 1>}, {pipeline_mode = #tpu.pipeline_mode<synchronous>, transform_indices = @transform_11, window_bounds = array<i64: 32, 128>}, {pipeline_mode = #tpu.pipeline_mode<synchronous>, transform_indices = @transform_12, window_bounds = array<i64: 32, 1>}, {pipeline_mode = #tpu.pipeline_mode<synchronous>, transform_indices = @transform_13, window_bounds = array<i64: 32, 1>}, {pipeline_mode = #tpu.pipeline_mode<synchronous>, transform_indices = @transform_14, window_bounds = array<i64: 32, 1>}, {transform_indices = @transform_15, window_bounds = array<i64: 2, 32, 256>}]} {
    %c0 = arith.constant 0 : index
    %c0_0 = arith.constant 0 : index
    %0 = vector.load %arg4[%c0, %c0_0] : memref<32x1xf32, #tpu.memory_space<vmem>>, vector<32x1xf32>
    %c0_1 = arith.constant 0 : index
    %c0_2 = arith.constant 0 : index
    %1 = vector.load %arg5[%c0_1, %c0_2] : memref<32x1xf32, #tpu.memory_space<vmem>>, vector<32x1xf32>
    %c0_3 = arith.constant 0 : index
    %c0_4 = arith.constant 0 : index
    %2 = vector.load %arg14[%c0_3, %c0_4] : memref<32x1xf32, #tpu.memory_space<vmem>>, vector<32x1xf32>
    %c0_5 = arith.constant 0 : index
    %c0_6 = arith.constant 0 : index
    %3 = vector.load %arg15[%c0_5, %c0_6] : memref<32x1xf32, #tpu.memory_space<vmem>>, vector<32x1xf32>
    %c0_7 = arith.constant 0 : index
    %c0_8 = arith.constant 0 : index
    %c0_9 = arith.constant 0 : index
    %4 = vector.load %arg1[%c0_7, %c0_8, %c0_9] : memref<2x32x256xf32, #tpu.memory_space<vmem>>, vector<1x32x256xf32>
    %5 = vector.shape_cast %4 : vector<1x32x256xf32> to vector<32x256xf32>
    %cst = arith.constant dense<0.000000e+00> : vector<256xf32>
    %6 = vector.multi_reduction <add>, %5, %cst [0] : vector<32x256xf32> to vector<256xf32>
    %7 = vector.shape_cast %6 : vector<256xf32> to vector<1x256xf32>
    %cst_10 = arith.constant 3.200000e+01 : f32
    %8 = vector.broadcast %cst_10 : f32 to vector<1x256xf32>
    %9 = arith.divf %7, %8 : vector<1x256xf32>
    %10 = vector.broadcast %9 : vector<1x256xf32> to vector<32x256xf32>
    %11 = arith.subf %5, %10 : vector<32x256xf32>
    %12 = vector.broadcast %9 : vector<1x256xf32> to vector<32x256xf32>
    %13 = arith.subf %5, %12 : vector<32x256xf32>
    %14 = arith.mulf %11, %13 : vector<32x256xf32>
    %cst_11 = arith.constant dense<0.000000e+00> : vector<256xf32>
    %15 = vector.multi_reduction <add>, %14, %cst_11 [0] : vector<32x256xf32> to vector<256xf32>
    %16 = vector.shape_cast %15 : vector<256xf32> to vector<1x256xf32>
    %cst_12 = arith.constant 3.200000e+01 : f32
    %17 = vector.broadcast %cst_12 : f32 to vector<1x256xf32>
    %18 = arith.divf %16, %17 : vector<1x256xf32>
    %19 = vector.broadcast %9 : vector<1x256xf32> to vector<32x256xf32>
    %20 = arith.subf %5, %19 : vector<32x256xf32>
    %cst_13 = arith.constant 9.99999974E-6 : f32
    %21 = vector.broadcast %cst_13 : f32 to vector<1x256xf32>
    %22 = arith.addf %18, %21 : vector<1x256xf32>
    %23 = math.rsqrt %22 : vector<1x256xf32>
    %24 = vector.broadcast %23 : vector<1x256xf32> to vector<32x256xf32>
    %25 = arith.mulf %20, %24 : vector<32x256xf32>
    %26 = vector.broadcast %0 : vector<32x1xf32> to vector<32x256xf32>
    %27 = arith.mulf %25, %26 : vector<32x256xf32>
    %28 = vector.broadcast %1 : vector<32x1xf32> to vector<32x256xf32>
    %29 = arith.addf %27, %28 : vector<32x256xf32>
    %c1 = arith.constant 1 : index
    %c0_14 = arith.constant 0 : index
    %c0_15 = arith.constant 0 : index
    %30 = vector.load %arg1[%c1, %c0_14, %c0_15] : memref<2x32x256xf32, #tpu.memory_space<vmem>>, vector<1x32x256xf32>
    %31 = vector.shape_cast %30 : vector<1x32x256xf32> to vector<32x256xf32>
    %cst_16 = arith.constant dense<0.000000e+00> : vector<256xf32>
    %32 = vector.multi_reduction <add>, %31, %cst_16 [0] : vector<32x256xf32> to vector<256xf32>
    %33 = vector.shape_cast %32 : vector<256xf32> to vector<1x256xf32>
    %cst_17 = arith.constant 3.200000e+01 : f32
    %34 = vector.broadcast %cst_17 : f32 to vector<1x256xf32>
    %35 = arith.divf %33, %34 : vector<1x256xf32>
    %36 = vector.broadcast %35 : vector<1x256xf32> to vector<32x256xf32>
    %37 = arith.subf %31, %36 : vector<32x256xf32>
    %38 = vector.broadcast %35 : vector<1x256xf32> to vector<32x256xf32>
    %39 = arith.subf %31, %38 : vector<32x256xf32>
    %40 = arith.mulf %37, %39 : vector<32x256xf32>
    %cst_18 = arith.constant dense<0.000000e+00> : vector<256xf32>
    %41 = vector.multi_reduction <add>, %40, %cst_18 [0] : vector<32x256xf32> to vector<256xf32>
    %42 = vector.shape_cast %41 : vector<256xf32> to vector<1x256xf32>
    %cst_19 = arith.constant 3.200000e+01 : f32
    %43 = vector.broadcast %cst_19 : f32 to vector<1x256xf32>
    %44 = arith.divf %42, %43 : vector<1x256xf32>
    %45 = vector.broadcast %35 : vector<1x256xf32> to vector<32x256xf32>
    %46 = arith.subf %31, %45 : vector<32x256xf32>
    %cst_20 = arith.constant 9.99999974E-6 : f32
    %47 = vector.broadcast %cst_20 : f32 to vector<1x256xf32>
    %48 = arith.addf %44, %47 : vector<1x256xf32>
    %49 = math.rsqrt %48 : vector<1x256xf32>
    %50 = vector.broadcast %49 : vector<1x256xf32> to vector<32x256xf32>
    %51 = arith.mulf %46, %50 : vector<32x256xf32>
    %52 = vector.broadcast %0 : vector<32x1xf32> to vector<32x256xf32>
    %53 = arith.mulf %51, %52 : vector<32x256xf32>
    %54 = vector.broadcast %1 : vector<32x1xf32> to vector<32x256xf32>
    %55 = arith.addf %53, %54 : vector<32x256xf32>
    %56 = tpu.concatenate %29, %55 in 1 : vector<32x256xf32>, vector<32x256xf32> -> vector<32x512xf32>
    %c0_21 = arith.constant 0 : index
    %c0_22 = arith.constant 0 : index
    %57 = vector.load %arg6[%c0_21, %c0_22] : memref<96x32xbf16, #tpu.memory_space<vmem>>, vector<96x32xbf16>
    %58 = arith.truncf %56 : vector<32x512xf32> to vector<32x512xbf16>
    %cst_23 = arith.constant dense<0.000000e+00> : vector<96x512xf32>
    %59 = tpu.matmul %57, %58, %cst_23 {dimension_numbers = #tpu.dot_dimension_numbers<[1], [0], [0], [1], [0, 0, 1, 1], [], []>} : vector<96x32xbf16>, vector<32x512xbf16>, vector<96x512xf32> -> vector<96x512xf32>
    %c0_24 = arith.constant 0 : index
    %c0_25 = arith.constant 0 : index
    %60 = vector.load %arg7[%c0_24, %c0_25] : memref<96x1xf32, #tpu.memory_space<vmem>>, vector<96x1xf32>
    %61 = vector.broadcast %60 : vector<96x1xf32> to vector<96x512xf32>
    %62 = arith.addf %59, %61 : vector<96x512xf32>
    %63 = vector.extract_strided_slice %62 {offsets = [0, 0], sizes = [32, 512], strides = [1, 1]} : vector<96x512xf32> to vector<32x512xf32>
    %64 = arith.truncf %63 : vector<32x512xf32> to vector<32x512xbf16>
    %65 = vector.extract_strided_slice %62 {offsets = [32, 0], sizes = [32, 512], strides = [1, 1]} : vector<96x512xf32> to vector<32x512xf32>
    %66 = arith.truncf %65 : vector<32x512xf32> to vector<32x512xbf16>
    %67 = vector.extract_strided_slice %62 {offsets = [64, 0], sizes = [32, 512], strides = [1, 1]} : vector<96x512xf32> to vector<32x512xf32>
    %68 = vector.extract_strided_slice %64 {offsets = [0, 0], sizes = [32, 256], strides = [1, 1]} : vector<32x512xbf16> to vector<32x256xbf16>
    %69 = vector.extract_strided_slice %66 {offsets = [0, 0], sizes = [32, 256], strides = [1, 1]} : vector<32x512xbf16> to vector<32x256xbf16>
    %70 = arith.mulf %68, %69 : vector<32x256xbf16>
    %71 = vector.extract_strided_slice %64 {offsets = [0, 0], sizes = [32, 256], strides = [1, 1]} : vector<32x512xbf16> to vector<32x256xbf16>
    %72 = vector.extract_strided_slice %66 {offsets = [0, 256], sizes = [32, 256], strides = [1, 1]} : vector<32x512xbf16> to vector<32x256xbf16>
    %73 = arith.mulf %71, %72 : vector<32x256xbf16>
    %74 = vector.extract_strided_slice %64 {offsets = [0, 256], sizes = [32, 256], strides = [1, 1]} : vector<32x512xbf16> to vector<32x256xbf16>
    %75 = vector.extract_strided_slice %66 {offsets = [0, 0], sizes = [32, 256], strides = [1, 1]} : vector<32x512xbf16> to vector<32x256xbf16>
    %76 = arith.mulf %74, %75 : vector<32x256xbf16>
    %77 = vector.extract_strided_slice %64 {offsets = [0, 256], sizes = [32, 256], strides = [1, 1]} : vector<32x512xbf16> to vector<32x256xbf16>
    %78 = vector.extract_strided_slice %66 {offsets = [0, 256], sizes = [32, 256], strides = [1, 1]} : vector<32x512xbf16> to vector<32x256xbf16>
    %79 = arith.mulf %77, %78 : vector<32x256xbf16>
    %80 = tpu.concatenate %70, %73, %76, %79 in 1 : vector<32x256xbf16>, vector<32x256xbf16>, vector<32x256xbf16>, vector<32x256xbf16> -> vector<32x1024xbf16>
    %c0_26 = arith.constant 0 : index
    %c0_27 = arith.constant 0 : index
    %81 = vector.load %arg2[%c0_26, %c0_27] : memref<8x32xbf16, #tpu.memory_space<vmem>>, vector<8x32xbf16>
    %cst_28 = arith.constant dense<0.000000e+00> : vector<8x1024xf32>
    %82 = tpu.matmul %81, %80, %cst_28 {dimension_numbers = #tpu.dot_dimension_numbers<[1], [0], [0], [1], [0, 0, 1, 1], [], []>} : vector<8x32xbf16>, vector<32x1024xbf16>, vector<8x1024xf32> -> vector<8x1024xf32>
    %83 = vector.extract_strided_slice %82 {offsets = [0, 0], sizes = [8, 256], strides = [1, 1]} : vector<8x1024xf32> to vector<8x256xf32>
    %84 = vector.extract_strided_slice %82 {offsets = [0, 256], sizes = [8, 256], strides = [1, 1]} : vector<8x1024xf32> to vector<8x256xf32>
    %85 = arith.maximumf %83, %84 : vector<8x256xf32>
    %86 = arith.subf %83, %85 : vector<8x256xf32>
    %87 = math.exp %86 : vector<8x256xf32>
    %88 = arith.subf %84, %85 : vector<8x256xf32>
    %89 = math.exp %88 : vector<8x256xf32>
    %90 = arith.addf %87, %89 : vector<8x256xf32>
    %91 = tpu.reciprocal %90 {approx = true} : vector<8x256xf32> -> vector<8x256xf32>
    %92 = arith.mulf %87, %91 : vector<8x256xf32>
    %93 = arith.mulf %89, %91 : vector<8x256xf32>
    %94 = vector.extract_strided_slice %82 {offsets = [0, 512], sizes = [8, 256], strides = [1, 1]} : vector<8x1024xf32> to vector<8x256xf32>
    %95 = vector.extract_strided_slice %82 {offsets = [0, 768], sizes = [8, 256], strides = [1, 1]} : vector<8x1024xf32> to vector<8x256xf32>
    %96 = arith.maximumf %94, %95 : vector<8x256xf32>
    %97 = arith.subf %94, %96 : vector<8x256xf32>
    %98 = math.exp %97 : vector<8x256xf32>
    %99 = arith.subf %95, %96 : vector<8x256xf32>
    %100 = math.exp %99 : vector<8x256xf32>
    %101 = arith.addf %98, %100 : vector<8x256xf32>
    %102 = tpu.reciprocal %101 {approx = true} : vector<8x256xf32> -> vector<8x256xf32>
    %103 = arith.mulf %98, %102 : vector<8x256xf32>
    %104 = arith.mulf %100, %102 : vector<8x256xf32>
    %105 = tpu.concatenate %92, %93, %103, %104 in 1 : vector<8x256xf32>, vector<8x256xf32>, vector<8x256xf32>, vector<8x256xf32> -> vector<8x1024xf32>
    %106 = arith.truncf %105 : vector<8x1024xf32> to vector<8x1024xbf16>
    %c0_29 = arith.constant 0 : index
    %c0_30 = arith.constant 0 : index
    %107 = vector.load %arg3[%c0_29, %c0_30] : memref<32x8xbf16, #tpu.memory_space<vmem>>, vector<32x8xbf16>
    %cst_31 = arith.constant dense<0.000000e+00> : vector<32x1024xf32>
    %108 = tpu.matmul %107, %106, %cst_31 {dimension_numbers = #tpu.dot_dimension_numbers<[1], [0], [0], [1], [0, 0, 1, 1], [], []>} : vector<32x8xbf16>, vector<8x1024xbf16>, vector<32x1024xf32> -> vector<32x1024xf32>
    %109 = vector.extract_strided_slice %108 {offsets = [0, 0], sizes = [32, 256], strides = [1, 1]} : vector<32x1024xf32> to vector<32x256xf32>
    %110 = vector.extract_strided_slice %67 {offsets = [0, 0], sizes = [32, 256], strides = [1, 1]} : vector<32x512xf32> to vector<32x256xf32>
    %111 = arith.mulf %109, %110 : vector<32x256xf32>
    %112 = vector.extract_strided_slice %108 {offsets = [0, 256], sizes = [32, 256], strides = [1, 1]} : vector<32x1024xf32> to vector<32x256xf32>
    %113 = vector.extract_strided_slice %67 {offsets = [0, 256], sizes = [32, 256], strides = [1, 1]} : vector<32x512xf32> to vector<32x256xf32>
    %114 = arith.mulf %112, %113 : vector<32x256xf32>
    %115 = arith.addf %111, %114 : vector<32x256xf32>
    %116 = vector.extract_strided_slice %108 {offsets = [0, 512], sizes = [32, 256], strides = [1, 1]} : vector<32x1024xf32> to vector<32x256xf32>
    %117 = vector.extract_strided_slice %67 {offsets = [0, 0], sizes = [32, 256], strides = [1, 1]} : vector<32x512xf32> to vector<32x256xf32>
    %118 = arith.mulf %116, %117 : vector<32x256xf32>
    %119 = vector.extract_strided_slice %108 {offsets = [0, 768], sizes = [32, 256], strides = [1, 1]} : vector<32x1024xf32> to vector<32x256xf32>
    %120 = vector.extract_strided_slice %67 {offsets = [0, 256], sizes = [32, 256], strides = [1, 1]} : vector<32x512xf32> to vector<32x256xf32>
    %121 = arith.mulf %119, %120 : vector<32x256xf32>
    %122 = arith.addf %118, %121 : vector<32x256xf32>
    %123 = tpu.concatenate %115, %122 in 1 : vector<32x256xf32>, vector<32x256xf32> -> vector<32x512xf32>
    %c0_32 = arith.constant 0 : index
    %c0_33 = arith.constant 0 : index
    %124 = vector.load %arg8[%c0_32, %c0_33] : memref<32x32xbf16, #tpu.memory_space<vmem>>, vector<32x32xbf16>
    %125 = arith.truncf %123 : vector<32x512xf32> to vector<32x512xbf16>
    %cst_34 = arith.constant dense<0.000000e+00> : vector<32x512xf32>
    %126 = tpu.matmul %124, %125, %cst_34 {dimension_numbers = #tpu.dot_dimension_numbers<[1], [0], [0], [1], [0, 0, 1, 1], [], []>} : vector<32x32xbf16>, vector<32x512xbf16>, vector<32x512xf32> -> vector<32x512xf32>
    %c0_35 = arith.constant 0 : index
    %c0_36 = arith.constant 0 : index
    %127 = vector.load %arg9[%c0_35, %c0_36] : memref<32x1xf32, #tpu.memory_space<vmem>>, vector<32x1xf32>
    %128 = vector.broadcast %127 : vector<32x1xf32> to vector<32x512xf32>
    %129 = arith.addf %126, %128 : vector<32x512xf32>
    %130 = arith.addf %129, %56 : vector<32x512xf32>
    %c0_37 = arith.constant 0 : index
    %c0_38 = arith.constant 0 : index
    %131 = vector.load %arg10[%c0_37, %c0_38] : memref<128x32xbf16, #tpu.memory_space<vmem>>, vector<128x32xbf16>
    %132 = arith.truncf %130 : vector<32x512xf32> to vector<32x512xbf16>
    %cst_39 = arith.constant dense<0.000000e+00> : vector<128x512xf32>
    %133 = tpu.matmul %131, %132, %cst_39 {dimension_numbers = #tpu.dot_dimension_numbers<[1], [0], [0], [1], [0, 0, 1, 1], [], []>} : vector<128x32xbf16>, vector<32x512xbf16>, vector<128x512xf32> -> vector<128x512xf32>
    %c0_40 = arith.constant 0 : index
    %c0_41 = arith.constant 0 : index
    %134 = vector.load %arg11[%c0_40, %c0_41] : memref<128x1xf32, #tpu.memory_space<vmem>>, vector<128x1xf32>
    %135 = vector.broadcast %134 : vector<128x1xf32> to vector<128x512xf32>
    %136 = arith.addf %133, %135 : vector<128x512xf32>
    %cst_42 = arith.constant 5.000000e-01 : f32
    %137 = vector.broadcast %cst_42 : f32 to vector<128x512xf32>
    %138 = arith.mulf %137, %136 : vector<128x512xf32>
    %cst_43 = arith.constant 4.471500e-02 : f32
    %139 = vector.broadcast %cst_43 : f32 to vector<128x512xf32>
    %140 = arith.mulf %139, %136 : vector<128x512xf32>
    %141 = arith.mulf %140, %136 : vector<128x512xf32>
    %142 = arith.mulf %141, %136 : vector<128x512xf32>
    %143 = arith.addf %136, %142 : vector<128x512xf32>
    %cst_44 = arith.constant 0.797884583 : f32
    %144 = vector.broadcast %cst_44 : f32 to vector<128x512xf32>
    %145 = arith.mulf %144, %143 : vector<128x512xf32>
    %146 = math.tanh %145 : vector<128x512xf32>
    %cst_45 = arith.constant 1.000000e+00 : f32
    %147 = vector.broadcast %cst_45 : f32 to vector<128x512xf32>
    %148 = arith.addf %147, %146 : vector<128x512xf32>
    %149 = arith.mulf %138, %148 : vector<128x512xf32>
    %c0_46 = arith.constant 0 : index
    %c0_47 = arith.constant 0 : index
    %150 = vector.load %arg12[%c0_46, %c0_47] : memref<32x128xbf16, #tpu.memory_space<vmem>>, vector<32x128xbf16>
    %151 = arith.truncf %149 : vector<128x512xf32> to vector<128x512xbf16>
    %cst_48 = arith.constant dense<0.000000e+00> : vector<32x512xf32>
    %152 = tpu.matmul %150, %151, %cst_48 {dimension_numbers = #tpu.dot_dimension_numbers<[1], [0], [0], [1], [0, 0, 1, 1], [], []>} : vector<32x128xbf16>, vector<128x512xbf16>, vector<32x512xf32> -> vector<32x512xf32>
    %c0_49 = arith.constant 0 : index
    %c0_50 = arith.constant 0 : index
    %153 = vector.load %arg13[%c0_49, %c0_50] : memref<32x1xf32, #tpu.memory_space<vmem>>, vector<32x1xf32>
    %154 = vector.broadcast %153 : vector<32x1xf32> to vector<32x512xf32>
    %155 = arith.addf %152, %154 : vector<32x512xf32>
    %cst_51 = arith.constant dense<0.000000e+00> : vector<512xf32>
    %156 = vector.multi_reduction <add>, %130, %cst_51 [0] : vector<32x512xf32> to vector<512xf32>
    %157 = vector.shape_cast %156 : vector<512xf32> to vector<1x512xf32>
    %cst_52 = arith.constant 3.200000e+01 : f32
    %158 = vector.broadcast %cst_52 : f32 to vector<1x512xf32>
    %159 = arith.divf %157, %158 : vector<1x512xf32>
    %160 = vector.broadcast %159 : vector<1x512xf32> to vector<32x512xf32>
    %161 = arith.subf %130, %160 : vector<32x512xf32>
    %162 = vector.broadcast %159 : vector<1x512xf32> to vector<32x512xf32>
    %163 = arith.subf %130, %162 : vector<32x512xf32>
    %164 = arith.mulf %161, %163 : vector<32x512xf32>
    %cst_53 = arith.constant dense<0.000000e+00> : vector<512xf32>
    %165 = vector.multi_reduction <add>, %164, %cst_53 [0] : vector<32x512xf32> to vector<512xf32>
    %166 = vector.shape_cast %165 : vector<512xf32> to vector<1x512xf32>
    %cst_54 = arith.constant 3.200000e+01 : f32
    %167 = vector.broadcast %cst_54 : f32 to vector<1x512xf32>
    %168 = arith.divf %166, %167 : vector<1x512xf32>
    %169 = vector.broadcast %159 : vector<1x512xf32> to vector<32x512xf32>
    %170 = arith.subf %130, %169 : vector<32x512xf32>
    %cst_55 = arith.constant 9.99999974E-6 : f32
    %171 = vector.broadcast %cst_55 : f32 to vector<1x512xf32>
    %172 = arith.addf %168, %171 : vector<1x512xf32>
    %173 = math.rsqrt %172 : vector<1x512xf32>
    %174 = vector.broadcast %173 : vector<1x512xf32> to vector<32x512xf32>
    %175 = arith.mulf %170, %174 : vector<32x512xf32>
    %176 = vector.broadcast %2 : vector<32x1xf32> to vector<32x512xf32>
    %177 = arith.mulf %175, %176 : vector<32x512xf32>
    %178 = vector.broadcast %3 : vector<32x1xf32> to vector<32x512xf32>
    %179 = arith.addf %177, %178 : vector<32x512xf32>
    %180 = arith.addf %155, %179 : vector<32x512xf32>
    %181 = vector.extract_strided_slice %180 {offsets = [0, 0], sizes = [32, 256], strides = [1, 1]} : vector<32x512xf32> to vector<32x256xf32>
    %c0_56 = arith.constant 0 : index
    %c0_57 = arith.constant 0 : index
    %c0_58 = arith.constant 0 : index
    %182 = vector.load %arg16[%c0_56, %c0_57, %c0_58] : memref<2x32x256xf32, #tpu.memory_space<vmem>>, vector<1x32x256xf32>
    %183 = vector.shape_cast %182 : vector<1x32x256xf32> to vector<32x256xf32>
    %184 = vector.shape_cast %181 : vector<32x256xf32> to vector<1x32x256xf32>
    tpu.vector_store %arg16[%c0_56, %c0_57, %c0_58], %184 {strides = array<i32>} : memref<2x32x256xf32, #tpu.memory_space<vmem>>, vector<1x32x256xf32>,
    %185 = vector.extract_strided_slice %180 {offsets = [0, 256], sizes = [32, 256], strides = [1, 1]} : vector<32x512xf32> to vector<32x256xf32>
    %c1_59 = arith.constant 1 : index
    %c0_60 = arith.constant 0 : index
    %c0_61 = arith.constant 0 : index
    %186 = vector.load %arg16[%c1_59, %c0_60, %c0_61] : memref<2x32x256xf32, #tpu.memory_space<vmem>>, vector<1x32x256xf32>
    %187 = vector.shape_cast %186 : vector<1x32x256xf32> to vector<32x256xf32>
    %188 = vector.shape_cast %185 : vector<32x256xf32> to vector<1x32x256xf32>
    tpu.vector_store %arg16[%c1_59, %c0_60, %c0_61], %188 {strides = array<i32>} : memref<2x32x256xf32, #tpu.memory_space<vmem>>, vector<1x32x256xf32>,
    return
  }
  func.func @transform_0(%arg0: i32) -> (i32, i32, i32) {
    %c0_i32 = arith.constant 0 : i32
    %c0_i32_0 = arith.constant 0 : i32
    %c0_i32_1 = arith.constant 0 : i32
    return %c0_i32, %c0_i32_0, %arg0 : i32, i32, i32
  }
  func.func @transform_1(%arg0: i32) -> (i32, i32) {
    %c0_i32 = arith.constant 0 : i32
    %c0_i32_0 = arith.constant 0 : i32
    %c0_i32_1 = arith.constant 0 : i32
    return %c0_i32, %c0_i32_0 : i32, i32
  }
  func.func @transform_2(%arg0: i32) -> (i32, i32) {
    %c0_i32 = arith.constant 0 : i32
    %c0_i32_0 = arith.constant 0 : i32
    %c0_i32_1 = arith.constant 0 : i32
    return %c0_i32, %c0_i32_0 : i32, i32
  }
  func.func @transform_3(%arg0: i32) -> (i32, i32) {
    %c0_i32 = arith.constant 0 : i32
    %c0_i32_0 = arith.constant 0 : i32
    %c0_i32_1 = arith.constant 0 : i32
    return %c0_i32, %c0_i32_0 : i32, i32
  }
  func.func @transform_4(%arg0: i32) -> (i32, i32) {
    %c0_i32 = arith.constant 0 : i32
    %c0_i32_0 = arith.constant 0 : i32
    %c0_i32_1 = arith.constant 0 : i32
    return %c0_i32, %c0_i32_0 : i32, i32
  }
  func.func @transform_5(%arg0: i32) -> (i32, i32) {
    %c0_i32 = arith.constant 0 : i32
    %c0_i32_0 = arith.constant 0 : i32
    %c0_i32_1 = arith.constant 0 : i32
    return %c0_i32, %c0_i32_0 : i32, i32
  }
  func.func @transform_6(%arg0: i32) -> (i32, i32) {
    %c0_i32 = arith.constant 0 : i32
    %c0_i32_0 = arith.constant 0 : i32
    %c0_i32_1 = arith.constant 0 : i32
    return %c0_i32, %c0_i32_0 : i32, i32
  }
  func.func @transform_7(%arg0: i32) -> (i32, i32) {
    %c0_i32 = arith.constant 0 : i32
    %c0_i32_0 = arith.constant 0 : i32
    %c0_i32_1 = arith.constant 0 : i32
    return %c0_i32, %c0_i32_0 : i32, i32
  }
  func.func @transform_8(%arg0: i32) -> (i32, i32) {
    %c0_i32 = arith.constant 0 : i32
    %c0_i32_0 = arith.constant 0 : i32
    %c0_i32_1 = arith.constant 0 : i32
    return %c0_i32, %c0_i32_0 : i32, i32
  }
  func.func @transform_9(%arg0: i32) -> (i32, i32) {
    %c0_i32 = arith.constant 0 : i32
    %c0_i32_0 = arith.constant 0 : i32
    %c0_i32_1 = arith.constant 0 : i32
    return %c0_i32, %c0_i32_0 : i32, i32
  }
  func.func @transform_10(%arg0: i32) -> (i32, i32) {
    %c0_i32 = arith.constant 0 : i32
    %c0_i32_0 = arith.constant 0 : i32
    %c0_i32_1 = arith.constant 0 : i32
    return %c0_i32, %c0_i32_0 : i32, i32
  }
  func.func @transform_11(%arg0: i32) -> (i32, i32) {
    %c0_i32 = arith.constant 0 : i32
    %c0_i32_0 = arith.constant 0 : i32
    %c0_i32_1 = arith.constant 0 : i32
    return %c0_i32, %c0_i32_0 : i32, i32
  }
  func.func @transform_12(%arg0: i32) -> (i32, i32) {
    %c0_i32 = arith.constant 0 : i32
    %c0_i32_0 = arith.constant 0 : i32
    %c0_i32_1 = arith.constant 0 : i32
    return %c0_i32, %c0_i32_0 : i32, i32
  }
  func.func @transform_13(%arg0: i32) -> (i32, i32) {
    %c0_i32 = arith.constant 0 : i32
    %c0_i32_0 = arith.constant 0 : i32
    %c0_i32_1 = arith.constant 0 : i32
    return %c0_i32, %c0_i32_0 : i32, i32
  }
  func.func @transform_14(%arg0: i32) -> (i32, i32) {
    %c0_i32 = arith.constant 0 : i32
    %c0_i32_0 = arith.constant 0 : i32
    %c0_i32_1 = arith.constant 0 : i32
    return %c0_i32, %c0_i32_0 : i32, i32
  }
  func.func @transform_15(%arg0: i32) -> (i32, i32, i32) {
    %c0_i32 = arith.constant 0 : i32
    %c0_i32_0 = arith.constant 0 : i32
    %c0_i32_1 = arith.constant 0 : i32
    return %c0_i32, %c0_i32_0, %arg0 : i32, i32, i32
  }
}

</mosaic_0001>

<bundles_post_ra>
// kernel: _ssa_forward.1
= control target key start
LH: loop header
LB: loop body
LE: loop exit
PB: predicated region body
PF: predicated region fallthrough
CT: control target
= control target key end

     0   :  { %v5084_v0 = vmov 0   ;;  %vm415_vm0 = vcmask 261120   ;;  %vm893_vm1 = vcmask 1043456   ;;  %vm886_vm2 = vcmask 64512   ;;  %s5068_s4 = inlined_call_operand.vmem [shape: f32[32,1], index: 4, kind: input, shape index: {}]   ;;  %s5069_s3 = inlined_call_operand.vmem [shape: f32[32,1], index: 3, kind: input, shape index: {}]   ;;  %s5070_s6 = inlined_call_operand.vmem [shape: f32[96,1], index: 6, kind: input, shape index: {}]   ;;  %s5071_s0 = inlined_call_operand.vmem [shape: f32[2,32,256], index: 0, kind: input, shape index: {}]   ;;  %s5072_s5 = inlined_call_operand.vmem [shape: bf16[96,32], index: 5, kind: input, shape index: {}]   ;;  %s5073_s8 = inlined_call_operand.vmem [shape: f32[32,1], index: 8, kind: input, shape index: {}]   ;;  %s5074_s10 = inlined_call_operand.vmem [shape: f32[128,1], index: 10, kind: input, shape index: {}]   ;;  %s5075_s13 = inlined_call_operand.vmem [shape: f32[32,1], index: 13, kind: input, shape index: {}]   ;;  %s5076_s12 = inlined_call_operand.vmem [shape: f32[32,1], index: 12, kind: input, shape index: {}]   ;;  %s5077_s14 = inlined_call_operand.vmem [shape: f32[32,1], index: 14, kind: input, shape index: {}]   ;;  %s5078_s1 = inlined_call_operand.vmem [shape: bf16[8,32], index: 1, kind: input, shape index: {}]   ;;  %s5079_s2 = inlined_call_operand.vmem [shape: bf16[32,8], index: 2, kind: input, shape index: {}]   ;;  %s5080_s7 = inlined_call_operand.vmem [shape: bf16[32,32], index: 7, kind: input, shape index: {}]   ;;  %s5081_s9 = inlined_call_operand.vmem [shape: bf16[128,32], index: 9, kind: input, shape index: {}]   ;;  %s5082_s11 = inlined_call_operand.vmem [shape: bf16[32,128], index: 11, kind: input, shape index: {}]   ;;  %s5083_s15 = inlined_call_operand.vmem [shape: f32[2,32,256], index: 15, kind: output, shape index: {}]  }
   0x1   :  { %2847 = vset.pattern.permute.xlu1 %v5084_v0  ;;  %2846 = vset.pattern.permute.xlu0 %v5084_v0  ;;  %v55_v1 = vld [vmem:[%s5068_s4] sm:$0xff]  ;;  %v56_v3 = vld [vmem:[%s5068_s4 + $0x8] sm:$0xff]  ;;  %v54_v5 = vld [vmem:[%s5069_s3 + $0x18] sm:$0xff] }
   0x2   :  { %v51_v2 = vld [vmem:[%s5069_s3] sm:$0xff]  ;;  %174 = vperm.xlu1 %2847, %v55_v1   ;;  %v52_v4 = vld [vmem:[%s5069_s3 + $0x8] sm:$0xff]  ;;  %466 = vmatprep.mubr.bf16.mxu0 %v5084_v0  ;;  %v53_v6 = vld [vmem:[%s5069_s3 + $0x10] sm:$0xff] }
   0x3   :  { %146 = vperm.xlu0 %2846, %v51_v2   ;;  %559 = vmatprep.mubr.bf16.mxu1 %v5084_v0  ;;  %v58_v7 = vld [vmem:[%s5068_s4 + $0x18] sm:$0xff]  ;;  %v57_v8 = vld [vmem:[%s5068_s4 + $0x10] sm:$0xff]  ;;  %v314_v9 = vld [vmem:[%s5070_s6 + $0x8] sm:$0xff] }
   0x4   :  { %v313_v10 = vld [vmem:[%s5070_s6] sm:$0xff]  ;;  %v318_v11 = vld [vmem:[%s5070_s6 + $0x28] sm:$0xff]  ;;  %v3170_v15 = vld [vmem:[%s5071_s0 + $0x10] sm:$0xff] }
   0x5   :  { %v317_v12 = vld [vmem:[%s5070_s6 + $0x20] sm:$0xff]  ;;  %v3165_v14 = vld [vmem:[%s5071_s0 + $0x8] sm:$0xff]  ;;  %v3175_v16 = vld [vmem:[%s5071_s0 + $0x18] sm:$0xff] }
   0x6   :  { %179 = vperm.xlu1 %2847, %v56_v3   ;;  %v3160_v13 = vld [vmem:[%s5071_s0] sm:$0xff]  ;;  %v316_v17 = vld [vmem:[%s5070_s6 + $0x18] sm:$0xff]  ;;  %v3190_v20 = vld [vmem:[%s5071_s0 + $0x48] sm:$0xff]  ;;  %v84_v24 = vadd.f32 %v3175_v16, %v3165_v14 }
   0x7   :  { %151 = vperm.xlu0 %2846, %v52_v4   ;;  %v75_v18 = vadd.f32 %v3170_v15, %v3160_v13  ;;  %v3185_v19 = vld [vmem:[%s5071_s0 + $0x40] sm:$0xff]  ;;  %v3195_v21 = vld [vmem:[%s5071_s0 + $0x50] sm:$0xff]  ;;  %v3210_v25 = vld [vmem:[%s5071_s0 + $0x58] sm:$0xff] }
   0x8   :  { %v315_v22 = vld [vmem:[%s5070_s6 + $0x10] sm:$0xff]  ;;  %v3203_v23 = vld [vmem:[%s5071_s0 + $0x20] sm:$0xff]  ;;  %v3215_v26 = vld [vmem:[%s5071_s0 + $0x28] sm:$0xff]  ;;  %v209_v28 = vadd.f32 %v3195_v21, %v3185_v19  ;;  %v218_v31 = vadd.f32 %v3210_v25, %v3190_v20 }
   0x9   :  { %v3220_v27 = vld [vmem:[%s5071_s0 + $0x60] sm:$0xff]  ;;  %v3227_v29 = vld [vmem:[%s5071_s0 + $0x30] sm:$0xff]  ;;  %v3232_v30 = vld [vmem:[%s5071_s0 + $0x68] sm:$0xff]  ;;  %v76_v34 = vadd.f32 %v75_v18, %v3203_v23  ;;  %v85_v36 = vadd.f32 %v84_v24, %v3215_v26 }
   0xa   :  { %161 = vperm.xlu1 %2847, %v54_v5   ;;  %v320_v32 = vld [vmem:[%s5070_s6 + $0x38] sm:$0xff]  ;;  %v319_v33 = vld [vmem:[%s5070_s6 + $0x30] sm:$0xff]  ;;  %v210_v37 = vadd.f32 %v3220_v27, %v209_v28  ;;  %v219_v39 = vadd.f32 %v3232_v30, %v218_v31  ;;  %v322_v43 = vld [vmem:[%s5070_s6 + $0x48] sm:$0xff] }
   0xb   :  { %156 = vperm.xlu0 %2846, %v53_v6   ;;  %v3246_v35 = vld [vmem:[%s5071_s0 + $0x38] sm:$0xff]  ;;  %v3253_v38 = vld [vmem:[%s5071_s0 + $0x70] sm:$0xff]  ;;  %v77_v40 = vadd.f32 %v76_v34, %v3227_v29  ;;  %v321_v44 = vld [vmem:[%s5070_s6 + $0x40] sm:$0xff] }
   0xc   :  { %v3260_v41 = vld [vmem:[%s5071_s0 + $0x78] sm:$0xff]  ;;  %v86_v42 = vadd.f32 %v85_v36, %v3246_v35  ;;  %v211_v45 = vadd.f32 %v3253_v38, %v210_v37  ;;  %v323_v50 = vld [vmem:[%s5070_s6 + $0x50] sm:$0xff]  ;;  %v1191_v55 = vld [vmem:[%s5073_s8 + $0x8] sm:$0xff] }
   0xd   :  { %v220_v46 = vadd.f32 %v3260_v41, %v219_v39  ;;  %v78_v47 = vrot.slane %v77_v40, 4  ;;  %v324_v49 = vld [vmem:[%s5070_s6 + $0x58] sm:$0xff]  ;;  %v1190_v56 = vld [vmem:[%s5073_s8] sm:$0xff]  ;;  %v1192_v62 = vld [vmem:[%s5073_s8 + $0x10] sm:$0xff] }
   0xe   :  { %189 = vperm.xlu1 %2847, %v58_v7   ;;  %v87_v48 = vrot.slane %v86_v42, 4  ;;  %v212_v51 = vrot.slane %v211_v45, 4  ;;  %v1193_v61 = vld [vmem:[%s5073_s8 + $0x18] sm:$0xff]  ;;  %v1377_v4 = vld [vmem:[%s5074_s10 + $0x8] sm:$0xff]  ;;  %v1376_v5 = vld [vmem:[%s5074_s10] sm:$0xff] }
   0xf   :  { %184 = vperm.xlu0 %2846, %v57_v8   ;;  %v221_v52 = vrot.slane %v220_v46, 4  ;;  %v79_v53 = vadd.f32 %v78_v47, %v77_v40  ;;  %v1381_v24 = vld [vmem:[%s5074_s10 + $0x28] sm:$0xff]  ;;  %v1380_v28 = vld [vmem:[%s5074_s10 + $0x20] sm:$0xff]  ;;  %v1383_v36 = vld [vmem:[%s5074_s10 + $0x38] sm:$0xff] }
  0x10   :  { %v88_v54 = vadd.f32 %v87_v48, %v86_v42  ;;  %v213_v57 = vadd.f32 %v212_v51, %v211_v45  ;;  %v1382_v37 = vld [vmem:[%s5074_s10 + $0x30] sm:$0xff] }
  0x11   :  { %v222_v58 = vadd.f32 %v221_v52, %v220_v46  ;;  %v80_v59 = vrot.slane %v79_v53, 2  ;;  %v1385_v46 = vld [vmem:[%s5074_s10 + $0x48] sm:$0xff] }
  0x12   :  { %332 = vperm.xlu1 %2847, %v314_v9   ;;  %v89_v60 = vrot.slane %v88_v54, 2  ;;  %v214_v63 = vrot.slane %v213_v57, 2 }
  0x13   :  { %327 = vperm.xlu0 %2846, %v313_v10   ;;  %v223_v1 = vrot.slane %v222_v58, 2  ;;  %v81_v2 = vadd.f32 %v80_v59, %v79_v53  ;;  %v1379_v10 = vld [vmem:[%s5074_s10 + $0x18] sm:$0xff] }
  0x14   :  { %v90_v3 = vadd.f32 %v89_v60, %v88_v54  ;;  %v215_v6 = vadd.f32 %v214_v63, %v213_v57  ;;  %v1389_v60 = vld [vmem:[%s5074_s10 + $0x68] sm:$0xff] }
  0x15   :  { %v224_v7 = vadd.f32 %v223_v1, %v222_v58  ;;  %v82_v8 = vrot.slane %v81_v2, 1 }
  0x16   :  { %352 = vperm.xlu1 %2847, %v318_v11   ;;  %v91_v9 = vrot.slane %v90_v3, 1  ;;  %v1378_v11 = vld [vmem:[%s5074_s10 + $0x10] sm:$0xff] }
  0x17   :  { %347 = vperm.xlu0 %2846, %v317_v12   ;;  %v216_v12 = vrot.slane %v215_v6, 1  ;;  %v83_v18 = vadd.f32 %v82_v8, %v81_v2 }
  0x19   :  { %v217_v31 = vadd.f32 %v216_v12, %v215_v6  ;;  %v1391_v6 = vld [vmem:[%s5074_s10 + $0x78] sm:$0xff] }
  0x1a   :  { %342 = vperm.xlu1 %2847, %v316_v17   ;;  %v225_v17 = vrot.slane %v224_v7, 1 }
  0x1b   :  { %337 = vperm.xlu0 %2846, %v315_v22   ;;  %v92_v22 = vadd.f32 %v91_v9, %v90_v3  ;;  %v227_v39 = vmul.f32 0.03125, %v217_v31 }
  0x1d   :  { %v95_v34 = vmul.f32 0.03125, %v92_v22  ;;  %v3332_v47 = vsub.f32 %v3185_v19, %v227_v39  ;;  %v3364_v51 = vsub.f32 %v3220_v27, %v227_v39 }
  0x1e   :  { %362 = vperm.xlu1 %2847, %v320_v32   ;;  %v226_v32 = vadd.f32 %v225_v17, %v224_v7  ;;  %v60_v17 = vld [vmem:[%s5075_s13 + $0x8] sm:$0xff] }
  0x1f   :  { %357 = vperm.xlu0 %2846, %v319_v33   ;;  %v94_v33 = vmul.f32 0.03125, %v83_v18  ;;  %v3323_v45 = vsub.f32 %v3175_v16, %v95_v34  ;;  %v3351_v19 = vsub.f32 %v3215_v26, %v95_v34  ;;  %v237_v26 = vmul.f32 %v3332_v47, %v3332_v47  ;;  %v59_v18 = vld [vmem:[%s5075_s13] sm:$0xff] }
  0x20   :  { %v228_v40 = vmul.f32 0.03125, %v226_v32  ;;  %v3383_v58 = vsub.f32 %v3246_v35, %v95_v34  ;;  %v62_v32 = vld [vmem:[%s5075_s13 + $0x18] sm:$0xff] }
  0x21   :  { %v3314_v42 = vsub.f32 %v3160_v13, %v94_v33  ;;  %v1384_v13 = vld [vmem:[%s5074_s10 + $0x40] sm:$0xff]  ;;  %v3344_v48 = vsub.f32 %v3203_v23, %v94_v33  ;;  %v1387_v23 = vld [vmem:[%s5074_s10 + $0x58] sm:$0xff] }
  0x22   :  { %372 = vperm.xlu1 %2847, %v322_v43   ;;  %v3317_v43 = vsub.f32 %v3170_v15, %v94_v33  ;;  %v3335_v15 = vsub.f32 %v3195_v21, %v227_v39  ;;  %v3341_v16 = vsub.f32 %v3210_v25, %v228_v40  ;;  %v107_v21 = vmul.f32 %v3323_v45, %v3323_v45  ;;  %v1386_v25 = vld [vmem:[%s5074_s10 + $0x50] sm:$0xff] }
  0x23   :  { %367 = vperm.xlu0 %2846, %v321_v44   ;;  %v3320_v44 = vsub.f32 %v3165_v14, %v95_v34  ;;  %v3338_v14 = vsub.f32 %v3190_v20, %v228_v40  ;;  %v3371_v53 = vsub.f32 %v3232_v30, %v228_v40  ;;  %v108_v27 = vmul.f32 %v3344_v48, %v3344_v48 }
  0x24   :  { %v239_v52 = vmul.f32 %v3335_v15, %v3335_v15  ;;  %v109_v30 = vmul.f32 %v3351_v19, %v3351_v19  ;;  %v3399_v63 = vsub.f32 %v3260_v41, %v228_v40  ;;  %v1390_v41 = vld [vmem:[%s5074_s10 + $0x70] sm:$0xff]  ;;  %v2375_v40 = vld [vmem:[%s5076_s12 + $0x8] sm:$0xff] }
  0x25   :  { %v105_v20 = vmul.f32 %v3320_v44, %v3320_v44  ;;  %v238_v54 = vmul.f32 %v3338_v14, %v3338_v14  ;;  %v242_v1 = vmul.f32 %v3371_v53, %v3371_v53 }
  0x26   :  { %382 = vperm.xlu1 %2847, %v324_v49   ;;  %v104_v49 = vmul.f32 %v3314_v42, %v3314_v42  ;;  %v245_v35 = vadd.f32 %v239_v52, %v237_v26  ;;  %v244_v9 = vmul.f32 %v3399_v63, %v3399_v63 }
  0x27   :  { %377 = vperm.xlu0 %2846, %v323_v50   ;;  %v106_v50 = vmul.f32 %v3317_v43, %v3317_v43  ;;  %v121_v59 = vadd.f32 %v107_v21, %v105_v20  ;;  %v2377_v21 = vld [vmem:[%s5076_s12 + $0x18] sm:$0xff] }
  0x29   :  { %v112_v57 = vadd.f32 %v106_v50, %v104_v49 }
  0x2a   :  { %1201 = vperm.xlu1 %2847, %v1191_v55   ;;  %v240_v55 = vmul.f32 %v3341_v16, %v3341_v16 }
  0x2b   :  { %1196 = vperm.xlu0 %2846, %v1190_v56   ;;  %v3378_v56 = vsub.f32 %v3227_v29, %v94_v33  ;;  %v1388_v29 = vld [vmem:[%s5074_s10 + $0x60] sm:$0xff]  ;;  %v61_v33 = vld [vmem:[%s5075_s13 + $0x10] sm:$0xff] }
  0x2c   :  { %v254_v2 = vadd.f32 %v240_v55, %v238_v54  ;;  %v64_v55 = vld [vmem:[%s5077_s14 + $0x8] sm:$0xff] }
  0x2d   :  { %v110_v3 = vmul.f32 %v3378_v56, %v3378_v56 }
  0x2e   :  { %1211 = vperm.xlu1 %2847, %v1193_v61   ;;  %v3394_v61 = vsub.f32 %v3253_v38, %v227_v39  ;;  %v111_v38 = vmul.f32 %v3383_v58, %v3383_v58 }
  0x2f   :  { %1206 = vperm.xlu0 %2846, %v1192_v62   ;;  %v241_v62 = vmul.f32 %v3364_v51, %v3364_v51 }
  0x30   :  { %v243_v7 = vmul.f32 %v3394_v61, %v3394_v61 }
  0x31   :  { %v246_v8 = vadd.f32 %v245_v35, %v241_v62  ;;  %v65_v62 = vld [vmem:[%s5077_s14 + $0x10] sm:$0xff] }
  0x32   :  { %1399 = vperm.xlu1 %2847, %v1377_v4   ;;  %v113_v4 = vadd.f32 %v112_v57, %v108_v27  ;;  %v63_v27 = vld [vmem:[%s5077_s14] sm:$0xff] }
  0x33   :  { %1394 = vperm.xlu0 %2846, %v1376_v5   ;;  %v122_v5 = vadd.f32 %v121_v59, %v109_v30  ;;  %v247_v22 = vadd.f32 %v246_v8, %v243_v7 }
  0x35   :  { %v123_v12 = vadd.f32 %v122_v5, %v111_v38  ;;  %v248_v34 = vrot.slane %v247_v22, 4 }
  0x36   :  { %1409 = vperm.xlu1 %2847, %v1379_v10   ;;  %v255_v10 = vadd.f32 %v254_v2, %v242_v1 }
  0x37   :  { %1404 = vperm.xlu0 %2846, %v1378_v11   ;;  %v114_v11 = vadd.f32 %v113_v4, %v110_v3  ;;  %v124_v31 = vrot.slane %v123_v12, 4 }
  0x39   :  { %v125_v39 = vadd.f32 %v124_v31, %v123_v12 }
  0x3a   :  { %1419 = vperm.xlu1 %2847, %v1381_v24   ;;  %v256_v24 = vadd.f32 %v255_v10, %v244_v9 }
  0x3b   :  { %1414 = vperm.xlu0 %2846, %v1380_v28   ;;  %v115_v28 = vrot.slane %v114_v11, 4  ;;  %v126_v20 = vrot.slane %v125_v39, 2 }
  0x3d   :  { %v127_v54 = vadd.f32 %v126_v20, %v125_v39 }
  0x3e   :  { %1429 = vperm.xlu1 %2847, %v1383_v36   ;;  %v257_v36 = vrot.slane %v256_v24, 4 }
  0x3f   :  { %1424 = vperm.xlu0 %2846, %v1382_v37   ;;  %v116_v37 = vadd.f32 %v115_v28, %v114_v11 }
  0x40   :  { %v258_v49 = vadd.f32 %v257_v36, %v256_v24 }
  0x41   :  { %v117_v50 = vrot.slane %v116_v37, 2 }
  0x42   :  { %1439 = vperm.xlu1 %2847, %v1385_v46   ;;  %v2374_v46 = vld [vmem:[%s5076_s12] sm:$0xff]  ;;  %v259_v26 = vrot.slane %v258_v49, 2 }
  0x43   :  { %1434 = vperm.xlu0 %2846, %v1384_v13   ;;  %v249_v13 = vadd.f32 %v248_v34, %v247_v22  ;;  %v118_v52 = vadd.f32 %v117_v50, %v116_v37 }
  0x44   :  { %v260_v30 = vadd.f32 %v259_v26, %v258_v49 }
  0x45   :  { %v119_v59 = vrot.slane %v118_v52, 1 }
  0x46   :  { %1449 = vperm.xlu1 %2847, %v1387_v23   ;;  %v2376_v23 = vld [vmem:[%s5076_s12 + $0x10] sm:$0xff]  ;;  %v261_v1 = vrot.slane %v260_v30, 1 }
  0x47   :  { %1444 = vperm.xlu0 %2846, %v1386_v25   ;;  %v250_v25 = vrot.slane %v249_v13, 2  ;;  %v120_v2 = vadd.f32 %v119_v59, %v118_v52 }
  0x48   :  { %v262_v38 = vadd.f32 %v261_v1, %v260_v30 }
  0x49   :  { %v251_v57 = vadd.f32 %v250_v25, %v249_v13  ;;  %v130_v5 = vmul.f32 0.03125, %v120_v2 }
  0x4a   :  { %1459 = vperm.xlu1 %2847, %v1389_v60   ;;  %v128_v60 = vrot.slane %v127_v54, 1  ;;  %v264_v7 = vmul.f32 0.03125, %v262_v38 }
  0x4b   :  { %1454 = vperm.xlu0 %2846, %v1388_v29   ;;  %v66_v29 = vld [vmem:[%s5077_s14 + $0x18] sm:$0xff]  ;;  %v252_v35 = vrot.slane %v251_v57, 1  ;;  %v132_v8 = vadd.f32 1e-05, %v130_v5 }
  0x4c   :  { %v129_v3 = vadd.f32 %v128_v60, %v127_v54  ;;  %v266_v11 = vadd.f32 1e-05, %v264_v7 }
  0x4d   :  { %v253_v4 = vadd.f32 %v252_v35, %v251_v57  ;;  %2868 = vrsqrt.f32 %v132_v8 }
  0x4e   :  { %1469 = vperm.xlu1 %2847, %v1391_v6   ;;  %v131_v6 = vmul.f32 0.03125, %v129_v3 }
  0x4f   :  { %1464 = vperm.xlu0 %2846, %v1390_v41   ;;  %v263_v41 = vmul.f32 0.03125, %v253_v4 }
  0x50   :  { %v133_v9 = vadd.f32 1e-05, %v131_v6 }
  0x51   :  { %v265_v10 = vadd.f32 1e-05, %v263_v41 }
  0x52   :  { %2659 = vperm.xlu1 %2847, %v60_v17   ;;  %2870 = vrsqrt.f32 %v133_v9 }
  0x53   :  { %2654 = vperm.xlu0 %2846, %v59_v18   ;;  %2872 = vrsqrt.f32 %v265_v10 }
  0x54   :  { %2874 = vrsqrt.f32 %v266_v11 }
  0x56   :  { %2669 = vperm.xlu1 %2847, %v62_v32  }
  0x57   :  { %2664 = vperm.xlu0 %2846, %v61_v33   ;;  %v2869_v12 = vpop.eup %2868 }
  0x58   :  { %v136_v33 = vmul.f32 %v2869_v12, %v3314_v42  ;;  %v138_v39 = vmul.f32 %v2869_v12, %v3317_v43 }
  0x5a   :  { %2385 = vperm.xlu1 %2847, %v2375_v40  }
  0x5b   :  { %2380 = vperm.xlu0 %2846, %v2374_v46  }
  0x5c   :  { %v2871_v17 = vpop.eup %2870 }
  0x5d   :  { %v2873_v18 = vpop.eup %2872  ;;  %v137_v31 = vmul.f32 %v2871_v17, %v3320_v44  ;;  %v139_v36 = vmul.f32 %v2871_v17, %v3323_v45  ;;  %v143_v45 = vmul.f32 %v2871_v17, %v3383_v58 }
  0x5e   :  { %2395 = vperm.xlu1 %2847, %v2377_v21   ;;  %v2875_v22 = vpop.eup %2874  ;;  %v269_v34 = vmul.f32 %v2873_v18, %v3332_v47  ;;  %v271_v40 = vmul.f32 %v2873_v18, %v3335_v15  ;;  %v142_v47 = vmul.f32 %v2869_v12, %v3378_v56  ;;  %v141_v56 = vmul.f32 %v2871_v17, %v3351_v19 }
  0x5f   :  { %2390 = vperm.xlu0 %2846, %v2376_v23   ;;  %v270_v32 = vmul.f32 %v2875_v22, %v3338_v14  ;;  %v272_v37 = vmul.f32 %v2875_v22, %v3341_v16  ;;  %v275_v16 = vmul.f32 %v2873_v18, %v3394_v61  ;;  %v276_v43 = vmul.f32 %v2875_v22, %v3399_v63 }
  0x60   :  { %v273_v58 = vmul.f32 %v2873_v18, %v3364_v51  ;;  %v274_v61 = vmul.f32 %v2875_v22, %v3371_v53 }
  0x62   :  { %2695 = vperm.xlu1 %2847, %v64_v55  }
  0x63   :  { %2690 = vperm.xlu0 %2846, %v63_v27   ;;  %v140_v27 = vmul.f32 %v2869_v12, %v3344_v48 }
  0x66   :  { %2705 = vperm.xlu1 %2847, %v66_v29  }
  0x67   :  { %2700 = vperm.xlu0 %2846, %v65_v62  }
  0x81   :  { %v175_v24 = vpop.permute.xlu1 %174 }
  0x82   :  { %v147_v28 = vpop.permute.xlu0 %146 }
  0x83   :  { %v165_v49 = vmul.f32 %v147_v28, %v137_v31  ;;  %v278_v50 = vmul.f32 %v270_v32, %v147_v28  ;;  %v164_v20 = vmul.f32 %v147_v28, %v136_v33  ;;  %v277_v44 = vmul.f32 %v269_v34, %v147_v28  ;;  %v2848_v28 = vld [vmem:[%s5072_s5] sm:$0xff]   ;;  %v2849_v31 = vld [vmem:[%s5072_s5 + $0x8] sm:$0xff]   ;;  %v2850_v32 = vld [vmem:[%s5072_s5 + $0x10] sm:$0xff]  }
  0x84   :  { %v2851_v33 = vld [vmem:[%s5072_s5 + $0x18] sm:$0xff]   ;;  %v2852_v34 = vld [vmem:[%s5072_s5 + $0x20] sm:$0xff]  }
  0x85   :  { %v180_v46 = vpop.permute.xlu1 %179  ;;  %v3477_v57 = vadd.f32 %v175_v24, %v165_v49  ;;  %v3479_v63 = vadd.f32 %v278_v50, %v175_v24  ;;  %v3481_v30 = vadd.f32 %v175_v24, %v164_v20  ;;  %v3483_v59 = vadd.f32 %v277_v44, %v175_v24 }
  0x86   :  { %v152_v13 = vpop.permute.xlu0 %151 }
  0x87   :  { %v167_v21 = vmul.f32 %v152_v13, %v139_v36  ;;  %v280_v14 = vmul.f32 %v272_v37, %v152_v13  ;;  %v166_v23 = vmul.f32 %v152_v13, %v138_v39  ;;  %v279_v42 = vmul.f32 %v271_v40, %v152_v13  ;;  %v2853_v36 = vld [vmem:[%s5072_s5 + $0x28] sm:$0xff]  }
  0x89   :  { %v3465_v25 = vadd.f32 %v180_v46, %v167_v21  ;;  %v3467_v15 = vadd.f32 %v280_v14, %v180_v46  ;;  %v3469_v26 = vadd.f32 %v180_v46, %v166_v23  ;;  %v3471_v52 = vadd.f32 %v279_v42, %v180_v46  ;;  %v162_v54 = vpop.permute.xlu1 %161 }
  0x8a   :  { %v157_v55 = vpop.permute.xlu0 %156  ;;  %v170_v60 = vmul.f32 %v162_v54, %v142_v47  ;;  %v171_v29 = vmul.f32 %v162_v54, %v143_v45  ;;  %v283_v62 = vmul.f32 %v275_v16, %v162_v54  ;;  %v284_v35 = vmul.f32 %v276_v43, %v162_v54 }
  0x8b   :  { %v306_v48 = vpack.c.bf16 %v3465_v25, %v3477_v57  ;;  %v308_v19 = vpack.c.bf16 %v3467_v15, %v3479_v63  ;;  %v305_v51 = vpack.c.bf16 %v3469_v26, %v3481_v30  ;;  %v307_v53 = vpack.c.bf16 %v3471_v52, %v3483_v59 }
  0x8c   :  { %v168_v1 = vmul.f32 %v157_v55, %v140_v27  ;;  %v169_v2 = vmul.f32 %v157_v55, %v141_v56  ;;  %v281_v3 = vmul.f32 %v273_v58, %v157_v55  ;;  %v282_v4 = vmul.f32 %v274_v61, %v157_v55 }
  0x8d   :  { %v190_v38 = vpop.permute.xlu1 %189  ;;  %434 = vmatprep.subr.bf16.mxu0 %v306_v48  ;;  %527 = vmatprep.subr.bf16.mxu1 %v308_v19 }
  0x8e   :  { %v185_v5 = vpop.permute.xlu0 %184  ;;  %v3493_v6 = vadd.f32 %v190_v38, %v170_v60  ;;  %v3495_v41 = vadd.f32 %v190_v38, %v171_v29  ;;  %v3497_v7 = vadd.f32 %v283_v62, %v190_v38  ;;  %v3499_v8 = vadd.f32 %v284_v35, %v190_v38  ;;  %435 = vmatpush1.bf16.msra.mxu0 %v305_v51 }
  0x8f   :  { %v3501_v9 = vadd.f32 %v185_v5, %v168_v1  ;;  %v3503_v10 = vadd.f32 %v185_v5, %v169_v2  ;;  %v3505_v11 = vadd.f32 %v281_v3, %v185_v5  ;;  %v3507_v12 = vadd.f32 %v282_v4, %v185_v5  ;;  %528 = vmatpush1.bf16.msra.mxu1 %v307_v53 }
  0x91   :  { %v310_v17 = vpack.c.bf16 %v3495_v41, %v3503_v10  ;;  %v309_v18 = vpack.c.bf16 %v3493_v6, %v3501_v9  ;;  %v311_v22 = vpack.c.bf16 %v3497_v7, %v3505_v11  ;;  %v312_v24 = vpack.c.bf16 %v3499_v8, %v3507_v12  ;;  %v333_v37 = vpop.permute.xlu1 %332 }
  0x92   :  { %v328_v39 = vpop.permute.xlu0 %327 }
  0x93   :  { %436 = vmatprep.subr.bf16.mxu0 %v310_v17  ;;  %529 = vmatprep.subr.bf16.mxu1 %v312_v24 }
  0x94   :  { %437 = vmatpush1.bf16.msra.mxu0 %v309_v18  ;;  %530 = vmatpush1.bf16.msra.mxu1 %v311_v22 }
  0x95   :  { %v353_v40 = vpop.permute.xlu1 %352 }
  0x96   :  { %v348_v46 = vpop.permute.xlu0 %347 }
  0x97   :  { %2775 = vmatmul.mubr.msk.bf16.vlgmr.msra.gmra.mrb[0].mxu0 %vm415_vm0, %v2848_v28  ;;  %2781 = vmatmul.mubr.msk.bf16.vlgmr.msra.gmra.mrb[0].mxu1 %vm415_vm0, %v2848_v28 }
  0x98   :  { %476 = vmatprep.mubr.bf16.mxu0 %v5084_v0  ;;  %569 = vmatprep.mubr.bf16.mxu1 %v5084_v0 }
  0x99   :  { %v343_v60 = vpop.permute.xlu1 %342 }
  0x9a   :  { %v338_v62 = vpop.permute.xlu0 %337 }
  0x9f   :  { %2776 = vmatmul.mubr.msk.bf16.gmra.mrb[4].mxu0 %vm415_vm0, %v2849_v31  ;;  %2782 = vmatmul.mubr.msk.bf16.gmra.mrb[4].mxu1 %vm415_vm0, %v2849_v31 }
  0xa0   :  { %486 = vmatprep.mubr.bf16.mxu0 %v5084_v0  ;;  %579 = vmatprep.mubr.bf16.mxu1 %v5084_v0 }
  0xa7   :  { %2777 = vmatmul.mubr.msk.bf16.gmra.mrb[8].mxu0 %vm415_vm0, %v2850_v32  ;;  %2783 = vmatmul.mubr.msk.bf16.gmra.mrb[8].mxu1 %vm415_vm0, %v2850_v32 }
  0xa8   :  { %496 = vmatprep.mubr.bf16.mxu0 %v5084_v0  ;;  %589 = vmatprep.mubr.bf16.mxu1 %v5084_v0 }
  0xaf   :  { %2778 = vmatmul.mubr.msk.bf16.gmra.mrb[12].mxu0 %vm415_vm0, %v2851_v33  ;;  %2784 = vmatmul.mubr.msk.bf16.gmra.mrb[12].mxu1 %vm415_vm0, %v2851_v33 }
  0xb0   :  { %506 = vmatprep.mubr.bf16.mxu0 %v5084_v0  ;;  %599 = vmatprep.mubr.bf16.mxu1 %v5084_v0 }
  0xb7   :  { %2779 = vmatmul.mubr.msk.bf16.gmra.mrb[16].mxu0 %vm415_vm0, %v2852_v34  ;;  %2785 = vmatmul.mubr.msk.bf16.gmra.mrb[16].mxu1 %vm415_vm0, %v2852_v34 }
  0xb8   :  { %516 = vmatprep.mubr.bf16.mxu0 %v5084_v0  ;;  %609 = vmatprep.mubr.bf16.mxu1 %v5084_v0 }
  0xbf   :  { %2780 = vmatmul.mubr.msk.bf16.gmra.mrb[20].mxu0 %vm415_vm0, %v2853_v36  ;;  %2786 = vmatmul.mubr.msk.bf16.gmra.mrb[20].mxu1 %vm415_vm0, %v2853_v36 }
  0xc0   :  { %688 = vmatprep.mubr.bf16.mxu0 %v5084_v0  ;;  %729 = vmatprep.mubr.bf16.mxu1 %v5084_v0 }
 0x16a   :  { %v468_v13 = vpop.f32.mrb[0].mxu0  ;;  %v561_v49 = vpop.f32.mrb[0].mxu1 }
 0x16b   :  { %v470_v50 = vpop.f32.mrb[1].mxu0  ;;  %v563_v20 = vpop.f32.mrb[1].mxu1  ;;  %v469_v21 = vadd.f32 %v468_v13, %v328_v39  ;;  %v562_v47 = vadd.f32 %v561_v49, %v328_v39 }
 0x16c   :  { %v472_v44 = vpop.f32.mrb[2].mxu0  ;;  %v565_v23 = vpop.f32.mrb[2].mxu1  ;;  %v471_v45 = vadd.f32 %v470_v50, %v328_v39  ;;  %v564_v55 = vadd.f32 %v563_v20, %v328_v39 }
 0x16d   :  { %v473_v14 = vadd.f32 %v472_v44, %v333_v37  ;;  %v474_v42 = vpop.f32.mrb[3].mxu0  ;;  %v566_v16 = vadd.f32 %v565_v23, %v333_v37  ;;  %v567_v54 = vpop.f32.mrb[3].mxu1 }
 0x16e   :  { %v475_v43 = vadd.f32 %v474_v42, %v333_v37  ;;  %v568_v56 = vadd.f32 %v567_v54, %v333_v37 }
 0x16f   :  { %v3559_v27 = vpack.c.bf16 %v473_v14, %v469_v21  ;;  %v3561_v58 = vpack.c.bf16 %v566_v16, %v562_v47 }
 0x170   :  { %v3563_v61 = vpack.c.bf16 %v475_v43, %v471_v45  ;;  %v3565_v29 = vpack.c.bf16 %v568_v56, %v564_v55 }
 0x172   :  { %v478_v35 = vpop.f32.mrb[4].mxu0  ;;  %v571_v48 = vpop.f32.mrb[4].mxu1 }
 0x173   :  { %v480_v19 = vpop.f32.mrb[5].mxu0  ;;  %v573_v51 = vpop.f32.mrb[5].mxu1  ;;  %v479_v1 = vadd.f32 %v478_v35, %v338_v62  ;;  %v572_v38 = vadd.f32 %v571_v48, %v338_v62 }
 0x174   :  { %v482_v53 = vpop.f32.mrb[6].mxu0  ;;  %v575_v3 = vpop.f32.mrb[6].mxu1  ;;  %v481_v5 = vadd.f32 %v480_v19, %v338_v62  ;;  %v574_v24 = vadd.f32 %v573_v51, %v338_v62 }
 0x175   :  { %v483_v2 = vadd.f32 %v482_v53, %v343_v60  ;;  %v484_v4 = vpop.f32.mrb[7].mxu0  ;;  %v576_v17 = vadd.f32 %v575_v3, %v343_v60  ;;  %v577_v22 = vpop.f32.mrb[7].mxu1 }
 0x176   :  { %v485_v18 = vadd.f32 %v484_v4, %v343_v60  ;;  %v578_v31 = vadd.f32 %v577_v22, %v343_v60  ;;  %v363_v60 = vpop.permute.xlu1 %362  ;;  %v358_v19 = vpop.permute.xlu0 %357 }
 0x177   :  { %v3567_v28 = vpack.c.bf16 %v483_v2, %v479_v1  ;;  %v3569_v32 = vpack.c.bf16 %v576_v17, %v572_v38 }
 0x178   :  { %v3571_v33 = vpack.c.bf16 %v485_v18, %v481_v5  ;;  %v3573_v34 = vpack.c.bf16 %v578_v31, %v574_v24 }
 0x17a   :  { %v488_v36 = vpop.f32.mrb[8].mxu0  ;;  %v581_v37 = vpop.f32.mrb[8].mxu1 }
 0x17b   :  { %v490_v39 = vpop.f32.mrb[9].mxu0  ;;  %v583_v13 = vpop.f32.mrb[9].mxu1  ;;  %v489_v50 = vadd.f32 %v488_v36, %v348_v46  ;;  %v582_v14 = vadd.f32 %v581_v37, %v348_v46 }
 0x17c   :  { %v492_v49 = vpop.f32.mrb[10].mxu0  ;;  %v585_v44 = vpop.f32.mrb[10].mxu1  ;;  %v491_v23 = vadd.f32 %v490_v39, %v348_v46  ;;  %v584_v16 = vadd.f32 %v583_v13, %v348_v46 }
 0x17d   :  { %v493_v20 = vadd.f32 %v492_v49, %v353_v40  ;;  %v494_v21 = vpop.f32.mrb[11].mxu0  ;;  %v586_v42 = vadd.f32 %v585_v44, %v353_v40  ;;  %v587_v45 = vpop.f32.mrb[11].mxu1 }
 0x17e   :  { %v495_v47 = vadd.f32 %v494_v21, %v353_v40  ;;  %v588_v54 = vadd.f32 %v587_v45, %v353_v40 }
 0x17f   :  { %v3575_v43 = vpack.c.bf16 %v493_v20, %v489_v50  ;;  %v3577_v55 = vpack.c.bf16 %v586_v42, %v582_v14 }
 0x180   :  { %v629_v56 = vpack.c.bf16 %v495_v47, %v491_v23  ;;  %v631_v48 = vpack.c.bf16 %v588_v54, %v584_v16 }
 0x181   :  { %v636_v62 = vmul.bf16 %v3575_v43, %v3559_v27  ;;  %v644_v35 = vmul.bf16 %v3575_v43, %v3561_v58  ;;  %v640_v51 = vmul.bf16 %v3577_v55, %v3559_v27  ;;  %v648_v46 = vmul.bf16 %v3577_v55, %v3561_v58 }
 0x182   :  { %v498_v53 = vpop.f32.mrb[12].mxu0  ;;  %v637_v40 = vmul.bf16 %v629_v56, %v3563_v61  ;;  %v645_v1 = vmul.bf16 %v629_v56, %v3565_v29  ;;  %v591_v2 = vpop.f32.mrb[12].mxu1  ;;  %v641_v4 = vmul.bf16 %v631_v48, %v3563_v61  ;;  %v649_v38 = vmul.bf16 %v631_v48, %v3565_v29 }
 0x183   :  { %v500_v3 = vpop.f32.mrb[13].mxu0  ;;  %v593_v5 = vpop.f32.mrb[13].mxu1  ;;  %v499_v18 = vadd.f32 %v498_v53, %v358_v19  ;;  %v592_v58 = vadd.f32 %v591_v2, %v358_v19 }
 0x184   :  { %v502_v17 = vpop.f32.mrb[14].mxu0  ;;  %656 = vmatprep.subr.bf16.mxu0 %v637_v40  ;;  %v595_v27 = vpop.f32.mrb[14].mxu1  ;;  %697 = vmatprep.subr.bf16.mxu1 %v641_v4  ;;  %v501_v31 = vadd.f32 %v500_v3, %v358_v19  ;;  %v594_v13 = vadd.f32 %v593_v5, %v358_v19 }
 0x185   :  { %v503_v22 = vadd.f32 %v502_v17, %v363_v60  ;;  %v504_v24 = vpop.f32.mrb[15].mxu0  ;;  %657 = vmatpush1.bf16.msra.mxu0 %v636_v62  ;;  %v596_v36 = vadd.f32 %v595_v27, %v363_v60  ;;  %v597_v39 = vpop.f32.mrb[15].mxu1  ;;  %698 = vmatpush1.bf16.msra.mxu1 %v640_v51  ;;  %v652_v62 = vld [vmem:[%s5078_s1] sm:$0xf] }
 0x186   :  { %v505_v37 = vadd.f32 %v504_v24, %v363_v60  ;;  %v598_v61 = vadd.f32 %v597_v39, %v363_v60 }
 0x187   :  { %v632_v49 = vpack.c.bf16 %v503_v22, %v499_v18  ;;  %v634_v50 = vpack.c.bf16 %v596_v36, %v592_v58 }
 0x188   :  { %v633_v29 = vpack.c.bf16 %v505_v37, %v501_v31  ;;  %v635_v21 = vpack.c.bf16 %v598_v61, %v594_v13 }
 0x189   :  { %v638_v20 = vmul.bf16 %v632_v49, %v3567_v28  ;;  %v646_v44 = vmul.bf16 %v632_v49, %v3569_v32  ;;  %v642_v14 = vmul.bf16 %v634_v50, %v3567_v28  ;;  %v650_v23 = vmul.bf16 %v634_v50, %v3569_v32 }
 0x18a   :  { %v3595_v42 = vpop.f32.mrb[16].mxu0  ;;  %v639_v47 = vmul.bf16 %v633_v29, %v3571_v33  ;;  %v647_v45 = vmul.bf16 %v633_v29, %v3573_v34  ;;  %v3599_v16 = vpop.f32.mrb[16].mxu1  ;;  %v643_v54 = vmul.bf16 %v635_v21, %v3571_v33  ;;  %v651_v55 = vmul.bf16 %v635_v21, %v3573_v34 }
 0x18b   :  { %v3601_v43 = vpop.f32.mrb[17].mxu0  ;;  %v3605_v56 = vpop.f32.mrb[17].mxu1 }
 0x18c   :  { %v3607_v60 = vpop.f32.mrb[18].mxu0  ;;  %658 = vmatprep.subr.bf16.mxu0 %v639_v47  ;;  %v3609_v28 = vpop.f32.mrb[18].mxu1  ;;  %699 = vmatprep.subr.bf16.mxu1 %v643_v54 }
 0x18d   :  { %v3611_v32 = vpop.f32.mrb[19].mxu0  ;;  %659 = vmatpush1.bf16.msra.mxu0 %v638_v20  ;;  %v3616_v48 = vpop.f32.mrb[19].mxu1  ;;  %700 = vmatpush1.bf16.msra.mxu1 %v642_v14 }
 0x18e   :  { %738 = vmatprep.subr.bf16.mxu0 %v645_v1  ;;  %779 = vmatprep.subr.bf16.mxu1 %v649_v38 }
 0x190   :  { %2787 = vmatmul.mubr.msk.bf16.vlgmr.msra.gmra.mrb[24].mxu0 %vm415_vm0, %v652_v62  ;;  %2788 = vmatmul.mubr.msk.bf16.vlgmr.msra.gmra.mrb[24].mxu1 %vm415_vm0, %v652_v62 }
 0x191   :  { %739 = vmatpush1.bf16.msra.mxu0 %v644_v35  ;;  %780 = vmatpush1.bf16.msra.mxu1 %v648_v46 }
 0x192   :  { %v3620_v33 = vpop.f32.mrb[20].mxu0  ;;  %740 = vmatprep.subr.bf16.mxu0 %v647_v45  ;;  %v3622_v34 = vpop.f32.mrb[20].mxu1  ;;  %781 = vmatprep.subr.bf16.mxu1 %v651_v55 }
 0x193   :  { %v3624_v19 = vpop.f32.mrb[21].mxu0  ;;  %770 = vmatprep.mubr.bf16.mxu0 %v5084_v0  ;;  %v3627_v51 = vpop.f32.mrb[21].mxu1  ;;  %811 = vmatprep.mubr.bf16.mxu1 %v5084_v0 }
 0x194   :  { %v3629_v53 = vpop.f32.mrb[22].mxu0  ;;  %v3632_v40 = vpop.f32.mrb[22].mxu1 }
 0x195   :  { %v3634_v35 = vpop.f32.mrb[23].mxu0  ;;  %741 = vmatpush1.bf16.msra.mxu0 %v646_v44  ;;  %v3636_v46 = vpop.f32.mrb[23].mxu1  ;;  %782 = vmatpush1.bf16.msra.mxu1 %v650_v23 }
 0x198   :  { %2789 = vmatmul.mubr.msk.bf16.vlgmr.msra.gmra.mrb[28].mxu0 %vm415_vm0, %v652_v62  ;;  %2790 = vmatmul.mubr.msk.bf16.vlgmr.msra.gmra.mrb[28].mxu1 %vm415_vm0, %v652_v62 }
 0x199   :  { %950 = vmatprep.mubr.bf16.mxu0 %v5084_v0  ;;  %1003 = vmatprep.mubr.bf16.mxu1 %v5084_v0 }
 0x263   :  { %v690_v1 = vpop.f32.mrb[24].mxu0  ;;  %v731_v2 = vpop.f32.mrb[24].mxu1 }
 0x264   :  { %v692_v3 = vpop.f32.mrb[25].mxu0  ;;  %v820_v4 = vmax.f32 %v690_v1, %v731_v2  ;;  %v733_v38 = vpop.f32.mrb[25].mxu1 }
 0x265   :  { %v694_v5 = vpop.f32.mrb[26].mxu0  ;;  %v821_v17 = vmax.f32 %v692_v3, %v733_v38  ;;  %v735_v18 = vpop.f32.mrb[26].mxu1 }
 0x266   :  { %v695_v22 = vpop.f32.mrb[27].mxu0  ;;  %v822_v27 = vsub.f32 %v690_v1, %v820_v4  ;;  %v828_v24 = vsub.f32 %v731_v2, %v820_v4  ;;  %v736_v58 = vpop.f32.mrb[27].mxu1 }
 0x267   :  { %v823_v31 = vsub.f32 %v692_v3, %v821_v17  ;;  %v829_v36 = vsub.f32 %v733_v38, %v821_v17 }
 0x268   :  { %v824_v37 = vmul.f32 1.442695, %v822_v27  ;;  %v830_v39 = vmul.f32 1.442695, %v828_v24 }
 0x269   :  { %v826_v13 = vmul.f32 1.442695, %v823_v31  ;;  %v832_v49 = vmul.f32 1.442695, %v829_v36 }
 0x26a   :  { %2876 = vpow2.f32 %v824_v37 }
 0x26b   :  { %v772_v61 = vpop.f32.mrb[28].mxu0  ;;  %2878 = vpow2.f32 %v830_v39  ;;  %v813_v50 = vpop.f32.mrb[28].mxu1 }
 0x26c   :  { %v774_v29 = vpop.f32.mrb[29].mxu0  ;;  %2880 = vpow2.f32 %v826_v13  ;;  %v842_v20 = vmax.f32 %v772_v61, %v813_v50  ;;  %v815_v44 = vpop.f32.mrb[29].mxu1 }
 0x26d   :  { %v776_v21 = vpop.f32.mrb[30].mxu0  ;;  %2882 = vpow2.f32 %v832_v49  ;;  %v843_v14 = vmax.f32 %v774_v29, %v815_v44  ;;  %v817_v23 = vpop.f32.mrb[30].mxu1 }
 0x26e   :  { %v777_v47 = vpop.f32.mrb[31].mxu0  ;;  %v844_v45 = vsub.f32 %v772_v61, %v842_v20  ;;  %v850_v54 = vsub.f32 %v813_v50, %v842_v20  ;;  %v818_v55 = vpop.f32.mrb[31].mxu1 }
 0x26f   :  { %v845_v62 = vsub.f32 %v774_v29, %v843_v14  ;;  %v851_v1 = vsub.f32 %v815_v44, %v843_v14  ;;  %v2854_v55 = vld [vmem:[%s5079_s2] sm:$0xff]  }
 0x270   :  { %v846_v2 = vmul.f32 1.442695, %v844_v45  ;;  %v852_v3 = vmul.f32 1.442695, %v850_v54 }
 0x271   :  { %v848_v4 = vmul.f32 1.442695, %v845_v62  ;;  %v854_v38 = vmul.f32 1.442695, %v851_v1 }
 0x272   :  { %2884 = vpow2.f32 %v846_v2 }
 0x273   :  { %2886 = vpow2.f32 %v852_v3 }
 0x274   :  { %v2877_v5 = vpop.eup %2876  ;;  %2888 = vpow2.f32 %v848_v4 }
 0x275   :  { %v2879_v17 = vpop.eup %2878  ;;  %2890 = vpow2.f32 %v854_v38 }
 0x276   :  { %v2881_v18 = vpop.eup %2880  ;;  %v834_v22 = vadd.f32 %v2879_v17, %v2877_v5 }
 0x277   :  { %v2883_v27 = vpop.eup %2882 }
 0x278   :  { %2892 = vrcp.f32 %v834_v22  ;;  %v835_v24 = vadd.f32 %v2883_v27, %v2881_v18 }
 0x27a   :  { %2894 = vrcp.f32 %v835_v24 }
 0x27c   :  { %v2885_v58 = vpop.eup %2884 }
 0x27d   :  { %v2887_v31 = vpop.eup %2886 }
 0x27e   :  { %v2889_v36 = vpop.eup %2888  ;;  %v856_v37 = vadd.f32 %v2887_v31, %v2885_v58 }
 0x27f   :  { %v2891_v39 = vpop.eup %2890 }
 0x280   :  { %2896 = vrcp.f32 %v856_v37  ;;  %v857_v13 = vadd.f32 %v2891_v39, %v2889_v36 }
 0x282   :  { %v2893_v49 = vpop.eup %2892  ;;  %2898 = vrcp.f32 %v857_v13 }
 0x283   :  { %v838_v61 = vmul.f32 %v2893_v49, %v2877_v5  ;;  %v840_v50 = vmul.f32 %v2893_v49, %v2879_v17 }
 0x284   :  { %v2895_v29 = vpop.eup %2894 }
 0x285   :  { %v839_v20 = vmul.f32 %v2895_v29, %v2881_v18  ;;  %v841_v44 = vmul.f32 %v2895_v29, %v2883_v27  ;;  %v864_v21 = vpack.c.bf16 %v838_v61, %v838_v61  ;;  %v866_v14 = vpack.c.bf16 %v840_v50, %v840_v50 }
 0x287   :  { %v865_v23 = vpack.c.bf16 %v839_v20, %v839_v20  ;;  %v867_v47 = vpack.c.bf16 %v841_v44, %v841_v44  ;;  %v895_v45 = vsel %vm893_vm1, %v864_v21, 0  ;;  %v901_v54 = vsel %vm893_vm1, %v866_v14, 0 }
 0x289   :  { %2793 = vmatprep.subr.msk.bf16.mxu0 %vm893_vm1, %v865_v23  ;;  %2796 = vmatprep.subr.msk.bf16.mxu1 %vm893_vm1, %v867_v47 }
 0x28a   :  { %v2897_v62 = vpop.eup %2896  ;;  %919 = vmatpush1.bf16.msra.mxu0 %v895_v45  ;;  %972 = vmatpush1.bf16.msra.mxu1 %v901_v54 }
 0x28b   :  { %v860_v1 = vmul.f32 %v2897_v62, %v2885_v58  ;;  %v862_v2 = vmul.f32 %v2897_v62, %v2887_v31  ;;  %v2855_v58 = vld [vmem:[%s5079_s2 + $0x8] sm:$0xff]   ;;  %v368_v31 = vpop.permute.xlu0 %367 }
 0x28c   :  { %v2899_v3 = vpop.eup %2898  ;;  %v3673_v37 = vadd.f32 %v3595_v42, %v368_v31  ;;  %v3679_v13 = vadd.f32 %v3601_v43, %v368_v31  ;;  %v3682_v49 = vadd.f32 %v3605_v56, %v368_v31 }
 0x28d   :  { %2794 = vmatmul.mubr.msk.bf16.vlgmr.msra.gmra.mrb[32].mxu0 %vm886_vm2, %v2854_v55  ;;  %2797 = vmatmul.mubr.msk.bf16.vlgmr.msra.gmra.mrb[32].mxu1 %vm886_vm2, %v2854_v55  ;;  %v861_v4 = vmul.f32 %v2899_v3, %v2889_v36  ;;  %v863_v38 = vmul.f32 %v2899_v3, %v2891_v39  ;;  %v868_v5 = vpack.c.bf16 %v860_v1, %v860_v1  ;;  %v373_v36 = vpop.permute.xlu1 %372 }
 0x28e   :  { %960 = vmatprep.mubr.bf16.mxu0 %v5084_v0  ;;  %1013 = vmatprep.mubr.bf16.mxu1 %v5084_v0  ;;  %v870_v17 = vpack.c.bf16 %v862_v2, %v862_v2  ;;  %v3676_v39 = vadd.f32 %v3599_v16, %v368_v31  ;;  %v3685_v29 = vadd.f32 %v3607_v60, %v373_v36 }
 0x28f   :  { %v869_v18 = vpack.c.bf16 %v861_v4, %v861_v4  ;;  %v871_v22 = vpack.c.bf16 %v863_v38, %v863_v38  ;;  %v907_v27 = vsel %vm893_vm1, %v868_v5, 0  ;;  %v3688_v20 = vadd.f32 %v3609_v28, %v373_v36  ;;  %v378_v3 = vpop.permute.xlu0 %377 }
 0x290   :  { %v913_v24 = vsel %vm893_vm1, %v870_v17, 0  ;;  %v3693_v43 = vadd.f32 %v3611_v32, %v373_v36  ;;  %v3696_v56 = vadd.f32 %v3616_v48, %v373_v36  ;;  %v3705_v5 = vadd.f32 %v3620_v33, %v378_v3 }
 0x291   :  { %2799 = vmatprep.subr.msk.bf16.mxu0 %vm893_vm1, %v869_v18  ;;  %2802 = vmatprep.subr.msk.bf16.mxu1 %vm893_vm1, %v871_v22  ;;  %v383_v38 = vpop.permute.xlu1 %382  ;;  %v3708_v17 = vadd.f32 %v3622_v34, %v378_v3  ;;  %v3711_v22 = vadd.f32 %v3624_v19, %v378_v3 }
 0x292   :  { %1025 = vmatpush1.bf16.msra.mxu0 %v907_v27  ;;  %1078 = vmatpush1.bf16.msra.mxu1 %v913_v24  ;;  %v3714_v27 = vadd.f32 %v3627_v51, %v378_v3  ;;  %v3717_v36 = vadd.f32 %v3629_v53, %v383_v38  ;;  %v3725_v19 = vadd.f32 %v3634_v35, %v383_v38 }
 0x293   :  { %v3728_v51 = vadd.f32 %v3636_v46, %v383_v38 }
 0x295   :  { %2795 = vmatmul.mubr.msk.bf16.gmra.mrb[36].mxu0 %vm886_vm2, %v2855_v58  ;;  %2798 = vmatmul.mubr.msk.bf16.gmra.mrb[36].mxu1 %vm886_vm2, %v2855_v58 }
 0x296   :  { %1056 = vmatprep.mubr.bf16.mxu0 %v5084_v0  ;;  %1109 = vmatprep.mubr.bf16.mxu1 %v5084_v0 }
 0x29d   :  { %2800 = vmatmul.mubr.msk.bf16.vlgmr.msra.gmra.mrb[40].mxu0 %vm886_vm2, %v2854_v55  ;;  %2803 = vmatmul.mubr.msk.bf16.vlgmr.msra.gmra.mrb[40].mxu1 %vm886_vm2, %v2854_v55 }
 0x29e   :  { %1066 = vmatprep.mubr.bf16.mxu0 %v5084_v0  ;;  %1119 = vmatprep.mubr.bf16.mxu1 %v5084_v0 }
 0x2a5   :  { %2801 = vmatmul.mubr.msk.bf16.gmra.mrb[44].mxu0 %vm886_vm2, %v2855_v58  ;;  %2804 = vmatmul.mubr.msk.bf16.gmra.mrb[44].mxu1 %vm886_vm2, %v2855_v58 }
 0x2a6   :  { %1262 = vmatprep.mubr.bf16.mxu0 %v5084_v0  ;;  %1315 = vmatprep.mubr.bf16.mxu1 %v5084_v0 }
 0x360   :  { %v952_v61 = vpop.f32.mrb[32].mxu0  ;;  %v1005_v50 = vpop.f32.mrb[32].mxu1 }
 0x361   :  { %v1130_v42 = vmul.f32 %v952_v61, %v3673_v37  ;;  %v1138_v44 = vmul.f32 %v1005_v50, %v3676_v39  ;;  %v954_v16 = vpop.f32.mrb[33].mxu0  ;;  %v1007_v21 = vpop.f32.mrb[33].mxu1  ;;  %v3720_v61 = vadd.f32 %v3632_v40, %v383_v38 }
 0x362   :  { %v1131_v14 = vmul.f32 %v954_v16, %v3679_v13  ;;  %v1139_v60 = vmul.f32 %v1007_v21, %v3682_v49  ;;  %v956_v23 = vpop.f32.mrb[34].mxu0  ;;  %v1009_v47 = vpop.f32.mrb[34].mxu1 }
 0x363   :  { %v1146_v28 = vadd.f32 %v1138_v44, %v1130_v42  ;;  %v1132_v45 = vmul.f32 %v956_v23, %v3685_v29  ;;  %v1140_v54 = vmul.f32 %v1009_v47, %v3688_v20  ;;  %v958_v55 = vpop.f32.mrb[35].mxu0  ;;  %v1011_v62 = vpop.f32.mrb[35].mxu1 }
 0x364   :  { %v1147_v1 = vadd.f32 %v1139_v60, %v1131_v14  ;;  %v1133_v32 = vmul.f32 %v958_v55, %v3693_v43  ;;  %v1141_v2 = vmul.f32 %v1011_v62, %v3696_v56 }
 0x365   :  { %v1148_v48 = vadd.f32 %v1140_v54, %v1132_v45 }
 0x366   :  { %v1149_v4 = vadd.f32 %v1141_v2, %v1133_v32 }
 0x367   :  { %v1182_v18 = vpack.c.bf16 %v1148_v48, %v1146_v28 }
 0x368   :  { %v962_v24 = vpop.f32.mrb[36].mxu0  ;;  %v1015_v58 = vpop.f32.mrb[36].mxu1  ;;  %v1183_v31 = vpack.c.bf16 %v1149_v4, %v1147_v1 }
 0x369   :  { %v1134_v33 = vmul.f32 %v962_v24, %v3705_v5  ;;  %v1142_v34 = vmul.f32 %v1015_v58, %v3708_v17  ;;  %v964_v50 = vpop.f32.mrb[37].mxu0  ;;  %v1017_v42 = vpop.f32.mrb[37].mxu1 }
 0x36a   :  { %v1135_v44 = vmul.f32 %v964_v50, %v3711_v22  ;;  %v1143_v53 = vmul.f32 %v1017_v42, %v3714_v27  ;;  %v966_v16 = vpop.f32.mrb[38].mxu0  ;;  %v1019_v21 = vpop.f32.mrb[38].mxu1  ;;  %1230 = vmatprep.subr.bf16.mxu0 %v1183_v31  ;;  %v2856_v31 = vld [vmem:[%s5080_s7] sm:$0xff]  }
 0x36b   :  { %v1150_v40 = vadd.f32 %v1142_v34, %v1134_v33  ;;  %v1136_v14 = vmul.f32 %v966_v16, %v3717_v36  ;;  %v1144_v60 = vmul.f32 %v1019_v21, %v3720_v61  ;;  %v968_v23 = vpop.f32.mrb[39].mxu0  ;;  %v1021_v47 = vpop.f32.mrb[39].mxu1  ;;  %1231 = vmatpush1.bf16.msra.mxu0 %v1182_v18 }
 0x36c   :  { %v1151_v35 = vadd.f32 %v1143_v53, %v1135_v44  ;;  %v1137_v28 = vmul.f32 %v968_v23, %v3725_v19  ;;  %v1145_v46 = vmul.f32 %v1021_v47, %v3728_v51 }
 0x36d   :  { %v1152_v45 = vadd.f32 %v1144_v60, %v1136_v14 }
 0x36e   :  { %v1153_v54 = vadd.f32 %v1145_v46, %v1137_v28  ;;  %v2857_v28 = vld [vmem:[%s5080_s7 + $0x8] sm:$0xff]  }
 0x36f   :  { %v1186_v55 = vpack.c.bf16 %v1152_v45, %v1150_v40 }
 0x370   :  { %v1058_v62 = vpop.f32.mrb[40].mxu0  ;;  %v1111_v1 = vpop.f32.mrb[40].mxu1  ;;  %v1187_v32 = vpack.c.bf16 %v1153_v54, %v1151_v35 }
 0x371   :  { %v1154_v2 = vmul.f32 %v1058_v62, %v3673_v37  ;;  %v1162_v48 = vmul.f32 %v1111_v1, %v3676_v39  ;;  %v1060_v3 = vpop.f32.mrb[41].mxu0  ;;  %v1113_v4 = vpop.f32.mrb[41].mxu1 }
 0x372   :  { %v1155_v38 = vmul.f32 %v1060_v3, %v3679_v13  ;;  %v1163_v18 = vmul.f32 %v1113_v4, %v3682_v49  ;;  %v1062_v24 = vpop.f32.mrb[42].mxu0  ;;  %v1115_v58 = vpop.f32.mrb[42].mxu1  ;;  %1232 = vmatprep.subr.bf16.mxu0 %v1187_v32 }
 0x373   :  { %v1170_v33 = vadd.f32 %v1162_v48, %v1154_v2  ;;  %v1156_v34 = vmul.f32 %v1062_v24, %v3685_v29  ;;  %v1164_v37 = vmul.f32 %v1115_v58, %v3688_v20  ;;  %v1064_v50 = vpop.f32.mrb[43].mxu0  ;;  %v1117_v39 = vpop.f32.mrb[43].mxu1  ;;  %1233 = vmatpush1.bf16.msra.mxu0 %v1186_v55 }
 0x374   :  { %v1171_v42 = vadd.f32 %v1163_v18, %v1155_v38  ;;  %v1157_v13 = vmul.f32 %v1064_v50, %v3693_v43  ;;  %v1165_v49 = vmul.f32 %v1117_v39, %v3696_v56  ;;  %v1202_v48 = vpop.permute.xlu1 %1201 }
 0x375   :  { %v1172_v44 = vadd.f32 %v1164_v37, %v1156_v34 }
 0x376   :  { %v1173_v53 = vadd.f32 %v1165_v49, %v1157_v13  ;;  %2807 = vmatmul.mubr.msk.bf16.vlgmr.msra.gmra.mrb[48].mxu0 %vm415_vm0, %v2856_v31 }
 0x377   :  { %v1184_v16 = vpack.c.bf16 %v1172_v44, %v1170_v33  ;;  %1272 = vmatprep.mubr.bf16.mxu0 %v5084_v0 }
 0x378   :  { %v1068_v21 = vpop.f32.mrb[44].mxu0  ;;  %v1121_v40 = vpop.f32.mrb[44].mxu1  ;;  %v1185_v29 = vpack.c.bf16 %v1173_v53, %v1171_v42 }
 0x379   :  { %v1158_v20 = vmul.f32 %v1068_v21, %v3705_v5  ;;  %v1166_v14 = vmul.f32 %v1121_v40, %v3708_v17  ;;  %v1070_v60 = vpop.f32.mrb[45].mxu0  ;;  %v1123_v23 = vpop.f32.mrb[45].mxu1 }
 0x37a   :  { %v1159_v43 = vmul.f32 %v1070_v60, %v3711_v22  ;;  %v1167_v56 = vmul.f32 %v1123_v23, %v3714_v27  ;;  %v1072_v47 = vpop.f32.mrb[46].mxu0  ;;  %v1125_v35 = vpop.f32.mrb[46].mxu1  ;;  %1283 = vmatprep.subr.bf16.mxu1 %v1185_v29 }
 0x37b   :  { %v1174_v46 = vadd.f32 %v1166_v14, %v1158_v20  ;;  %v1160_v45 = vmul.f32 %v1072_v47, %v3717_v36  ;;  %v1168_v5 = vmul.f32 %v1125_v35, %v3720_v61  ;;  %v1074_v54 = vpop.f32.mrb[47].mxu0  ;;  %v1127_v17 = vpop.f32.mrb[47].mxu1  ;;  %1284 = vmatpush1.bf16.msra.mxu1 %v1184_v16 }
 0x37c   :  { %v1175_v55 = vadd.f32 %v1167_v56, %v1159_v43  ;;  %v1161_v22 = vmul.f32 %v1074_v54, %v3725_v19  ;;  %v1169_v27 = vmul.f32 %v1127_v17, %v3728_v51  ;;  %v1197_v36 = vpop.permute.xlu0 %1196  ;;  %v3786_v49 = vpop.permute.xlu1 %1211 }
 0x37d   :  { %v1176_v62 = vadd.f32 %v1168_v5, %v1160_v45 }
 0x37e   :  { %v1177_v1 = vadd.f32 %v1169_v27, %v1161_v22  ;;  %2808 = vmatmul.mubr.msk.bf16.gmra.mrb[52].mxu0 %vm415_vm0, %v2857_v28 }
 0x37f   :  { %v1188_v32 = vpack.c.bf16 %v1176_v62, %v1174_v46  ;;  %1568 = vmatprep.mubr.bf16.mxu0 %v5084_v0 }
 0x380   :  { %v1189_v2 = vpack.c.bf16 %v1177_v1, %v1175_v55  ;;  %v1207_v39 = vpop.permute.xlu0 %1206 }
 0x382   :  { %1285 = vmatprep.subr.bf16.mxu1 %v1189_v2 }
 0x383   :  { %1286 = vmatpush1.bf16.msra.mxu1 %v1188_v32 }
 0x386   :  { %2809 = vmatmul.mubr.msk.bf16.vlgmr.msra.gmra.mrb[48].mxu1 %vm415_vm0, %v2856_v31 }
 0x387   :  { %1325 = vmatprep.mubr.bf16.mxu1 %v5084_v0 }
 0x38e   :  { %2810 = vmatmul.mubr.msk.bf16.gmra.mrb[52].mxu1 %vm415_vm0, %v2857_v28 }
 0x38f   :  { %1681 = vmatprep.mubr.bf16.mxu1 %v5084_v0 }
 0x449   :  { %v1264_v61 = vpop.f32.mrb[48].mxu0 }
 0x44a   :  { %v1265_v19 = vadd.f32 %v1264_v61, %v1197_v36  ;;  %v1266_v51 = vpop.f32.mrb[49].mxu0 }
 0x44b   :  { %v1267_v3 = vadd.f32 %v1266_v51, %v1197_v36  ;;  %v1268_v4 = vpop.f32.mrb[50].mxu0 }
 0x44c   :  { %v1269_v38 = vadd.f32 %v1268_v4, %v1202_v48  ;;  %v1270_v18 = vpop.f32.mrb[51].mxu0  ;;  %v3767_v58 = vadd.f32 %v1265_v19, %v3481_v30 }
 0x44d   :  { %v1271_v24 = vadd.f32 %v1270_v18, %v1202_v48  ;;  %v3773_v33 = vadd.f32 %v1267_v3, %v3477_v57 }
 0x44e   :  { %v3770_v31 = vadd.f32 %v1269_v38, %v3469_v26 }
 0x44f   :  { %v3776_v34 = vadd.f32 %v1271_v24, %v3465_v25 }
 0x450   :  { %v1368_v37 = vpack.c.bf16 %v3770_v31, %v3767_v58  ;;  %v2516_v50 = vadd.f32 %v3770_v31, %v3767_v58 }
 0x451   :  { %v2525_v30 = vadd.f32 %v3776_v34, %v3773_v33  ;;  %v1274_v42 = vpop.f32.mrb[52].mxu0  ;;  %v1369_v26 = vpack.c.bf16 %v3776_v34, %v3773_v33 }
 0x452   :  { %v1275_v13 = vadd.f32 %v1274_v42, %v1207_v39  ;;  %v1276_v57 = vpop.f32.mrb[53].mxu0 }
 0x453   :  { %v1277_v25 = vadd.f32 %v1276_v57, %v1207_v39  ;;  %v1278_v44 = vpop.f32.mrb[54].mxu0  ;;  %1536 = vmatprep.subr.bf16.mxu0 %v1369_v26 }
 0x454   :  { %v3789_v53 = vadd.f32 %v1275_v13, %v3501_v9  ;;  %v1279_v16 = vadd.f32 %v1278_v44, %v3786_v49  ;;  %v1280_v21 = vpop.f32.mrb[55].mxu0  ;;  %1537 = vmatpush1.bf16.msra.mxu0 %v1368_v37 }
 0x455   :  { %v3793_v40 = vadd.f32 %v1277_v25, %v3503_v10  ;;  %v1281_v29 = vadd.f32 %v1280_v21, %v3786_v49 }
 0x456   :  { %v2517_v20 = vadd.f32 %v2516_v50, %v3789_v53  ;;  %v1348_v14 = vadd.f32 %v1279_v16, %v3493_v6  ;;  %v3837_v50 = vld [vmem:[%s5081_s9 + $0x8] sm:$0xff]  }
 0x457   :  { %v2526_v60 = vadd.f32 %v2525_v30, %v3793_v40  ;;  %v3800_v23 = vadd.f32 %v1281_v29, %v3495_v41  ;;  %v3809_v41 = vld [vmem:[%s5081_s9] sm:$0xff]  }
 0x458   :  { %v1372_v9 = vpack.c.bf16 %v1348_v14, %v3789_v53  ;;  %v2518_v43 = vadd.f32 %v2517_v20, %v1348_v14 }
 0x459   :  { %v2527_v56 = vadd.f32 %v2526_v60, %v3800_v23  ;;  %v1317_v47 = vpop.f32.mrb[48].mxu1  ;;  %v1373_v10 = vpack.c.bf16 %v3800_v23, %v3793_v40 }
 0x45a   :  { %v2519_v35 = vrot.slane %v2518_v43, 4  ;;  %v1318_v28 = vadd.f32 %v1317_v47, %v1197_v36  ;;  %v1319_v46 = vpop.f32.mrb[49].mxu1 }
 0x45b   :  { %v2528_v45 = vrot.slane %v2527_v56, 4  ;;  %v1320_v5 = vadd.f32 %v1319_v46, %v1197_v36  ;;  %v1321_v6 = vpop.f32.mrb[50].mxu1  ;;  %1538 = vmatprep.subr.bf16.mxu0 %v1373_v10 }
 0x45c   :  { %v2520_v54 = vadd.f32 %v2519_v35, %v2518_v43  ;;  %v1322_v17 = vadd.f32 %v1321_v6, %v1202_v48  ;;  %v1323_v55 = vpop.f32.mrb[51].mxu1  ;;  %1539 = vmatpush1.bf16.msra.mxu0 %v1372_v9  ;;  %v3812_v1 = vadd.f32 %v1318_v28, %v3483_v59 }
 0x45d   :  { %v2529_v22 = vadd.f32 %v2528_v45, %v2527_v56  ;;  %v1324_v27 = vadd.f32 %v1323_v55, %v1202_v48  ;;  %v3818_v36 = vadd.f32 %v1320_v5, %v3479_v63 }
 0x45e   :  { %v2521_v62 = vrot.slane %v2520_v54, 2  ;;  %v3815_v32 = vadd.f32 %v1322_v17, %v3471_v52 }
 0x45f   :  { %v2530_v2 = vrot.slane %v2529_v22, 2  ;;  %v3821_v61 = vadd.f32 %v1324_v27, %v3467_v15  ;;  %2819 = vmatmul.mubr.msk.bf16.vlgmr.msra.gmra.mrb[56].mxu0 %vm415_vm0, %v3809_v41 }
 0x460   :  { %v2522_v19 = vadd.f32 %v2521_v62, %v2520_v54  ;;  %v1370_v51 = vpack.c.bf16 %v3815_v32, %v3812_v1  ;;  %v2534_v59 = vadd.f32 %v3815_v32, %v3812_v1  ;;  %1578 = vmatprep.mubr.bf16.mxu0 %v5084_v0 }
 0x461   :  { %v2531_v52 = vadd.f32 %v2530_v2, %v2529_v22  ;;  %v2543_v63 = vadd.f32 %v3821_v61, %v3818_v36  ;;  %v1327_v48 = vpop.f32.mrb[52].mxu1  ;;  %v1371_v15 = vpack.c.bf16 %v3821_v61, %v3818_v36 }
 0x462   :  { %v2523_v3 = vrot.slane %v2522_v19, 1  ;;  %v1328_v4 = vadd.f32 %v1327_v48, %v1207_v39  ;;  %v1329_v38 = vpop.f32.mrb[53].mxu1 }
 0x463   :  { %v2532_v18 = vrot.slane %v2531_v52, 1  ;;  %v1330_v24 = vadd.f32 %v1329_v38, %v1207_v39  ;;  %v1331_v37 = vpop.f32.mrb[54].mxu1  ;;  %1649 = vmatprep.subr.bf16.mxu1 %v1371_v15 }
 0x464   :  { %v2524_v30 = vadd.f32 %v2523_v3, %v2522_v19  ;;  %v3840_v42 = vadd.f32 %v1328_v4, %v3505_v11  ;;  %v1332_v26 = vadd.f32 %v1331_v37, %v3786_v49  ;;  %v1333_v13 = vpop.f32.mrb[55].mxu1  ;;  %1650 = vmatpush1.bf16.msra.mxu1 %v1370_v51 }
 0x465   :  { %v2533_v57 = vadd.f32 %v2532_v18, %v2531_v52  ;;  %v3844_v25 = vadd.f32 %v1330_v24, %v3507_v12  ;;  %v1334_v39 = vadd.f32 %v1333_v13, %v3786_v49 }
 0x466   :  { %v2552_v44 = vmul.f32 0.03125, %v2524_v30  ;;  %v2535_v16 = vadd.f32 %v2534_v59, %v3840_v42  ;;  %v3849_v21 = vadd.f32 %v1332_v26, %v3497_v7 }
 0x467   :  { %v2553_v29 = vmul.f32 0.03125, %v2533_v57  ;;  %v2544_v11 = vadd.f32 %v2543_v63, %v3844_v25  ;;  %v3853_v20 = vadd.f32 %v1334_v39, %v3499_v8  ;;  %2820 = vmatmul.mubr.msk.bf16.gmra.mrb[60].mxu0 %vm415_vm0, %v3837_v50 }
 0x468   :  { %v3858_v12 = vsub.f32 %v3770_v31, %v2552_v44  ;;  %v3861_v49 = vsub.f32 %v3789_v53, %v2552_v44  ;;  %v3863_v60 = vsub.f32 %v1348_v14, %v2552_v44  ;;  %v1374_v7 = vpack.c.bf16 %v3849_v21, %v3840_v42  ;;  %1588 = vmatprep.mubr.bf16.mxu0 %v5084_v0 }
 0x469   :  { %v3869_v9 = vsub.f32 %v3776_v34, %v2553_v29  ;;  %v3872_v8 = vsub.f32 %v3793_v40, %v2553_v29  ;;  %v3875_v43 = vsub.f32 %v3800_v23, %v2553_v29  ;;  %v2536_v31 = vadd.f32 %v2535_v16, %v3849_v21  ;;  %v3887_v34 = vld [vmem:[%s5081_s9 + $0x10] sm:$0xff]  }
 0x46a   :  { %v2545_v53 = vadd.f32 %v2544_v11, %v3853_v20  ;;  %v1375_v14 = vpack.c.bf16 %v3853_v20, %v3844_v25  ;;  %v3882_v56 = vsub.f32 %v3767_v58, %v2552_v44  ;;  %v2576_v40 = vmul.f32 %v3858_v12, %v3858_v12 }
 0x46b   :  { %v2537_v47 = vrot.slane %v2536_v31, 4  ;;  %v3894_v35 = vsub.f32 %v3773_v33, %v2553_v29  ;;  %v2577_v58 = vmul.f32 %v3869_v9, %v3869_v9  ;;  %v2580_v45 = vmul.f32 %v3861_v49, %v3861_v49 }
 0x46c   :  { %v2546_v23 = vrot.slane %v2545_v53, 4  ;;  %1651 = vmatprep.subr.bf16.mxu1 %v1375_v14  ;;  %v2572_v10 = vmul.f32 %v3882_v56, %v3882_v56  ;;  %v2584_v54 = vmul.f32 %v3863_v60, %v3863_v60  ;;  %v2581_v22 = vmul.f32 %v3872_v8, %v3872_v8 }
 0x46d   :  { %v2538_v28 = vadd.f32 %v2537_v47, %v2536_v31  ;;  %1652 = vmatpush1.bf16.msra.mxu1 %v1374_v7  ;;  %v2573_v6 = vmul.f32 %v3894_v35, %v3894_v35  ;;  %v2585_v2 = vmul.f32 %v3875_v43, %v3875_v43 }
 0x46e   :  { %v2547_v46 = vadd.f32 %v2546_v23, %v2545_v53  ;;  %v2588_v5 = vadd.f32 %v2576_v40, %v2572_v10 }
 0x46f   :  { %v2539_v17 = vrot.slane %v2538_v28, 2  ;;  %2821 = vmatmul.mubr.msk.bf16.gmra.mrb[64].mxu0 %vm415_vm0, %v3887_v34  ;;  %v2597_v27 = vadd.f32 %v2577_v58, %v2573_v6 }
 0x470   :  { %v2548_v33 = vrot.slane %v2547_v46, 2  ;;  %2827 = vmatmul.mubr.msk.bf16.vlgmr.msra.gmra.mrb[56].mxu1 %vm415_vm0, %v3809_v41  ;;  %1598 = vmatprep.mubr.bf16.mxu0 %v5084_v0  ;;  %v2589_v55 = vadd.f32 %v2588_v5, %v2580_v45  ;;  %v2861_v41 = vld [vmem:[%s5081_s9 + $0x18] sm:$0xff]  }
 0x471   :  { %v2540_v62 = vadd.f32 %v2539_v17, %v2538_v28  ;;  %1691 = vmatprep.mubr.bf16.mxu1 %v5084_v0  ;;  %v2598_v59 = vadd.f32 %v2597_v27, %v2581_v22 }
 0x472   :  { %v2549_v19 = vadd.f32 %v2548_v33, %v2547_v46  ;;  %v2590_v51 = vadd.f32 %v2589_v55, %v2584_v54 }
 0x473   :  { %v2541_v52 = vrot.slane %v2540_v62, 1  ;;  %v2599_v15 = vadd.f32 %v2598_v59, %v2585_v2 }
 0x474   :  { %v2550_v63 = vrot.slane %v2549_v19, 1  ;;  %v2591_v48 = vrot.slane %v2590_v51, 4 }
 0x475   :  { %v2542_v3 = vadd.f32 %v2541_v52, %v2540_v62  ;;  %v2600_v18 = vrot.slane %v2599_v15, 4  ;;  %v2864_v52 = vld [vmem:[%s5081_s9 + $0x30] sm:$0xff]  }
 0x476   :  { %v2551_v4 = vadd.f32 %v2550_v63, %v2549_v19  ;;  %v2592_v38 = vadd.f32 %v2591_v48, %v2590_v51 }
 0x477   :  { %v2554_v24 = vmul.f32 0.03125, %v2542_v3  ;;  %2822 = vmatmul.mubr.msk.bf16.gmra.mrb[68].mxu0 %vm415_vm0, %v2861_v41  ;;  %v2601_v26 = vadd.f32 %v2600_v18, %v2599_v15 }
 0x478   :  { %v2555_v37 = vmul.f32 0.03125, %v2551_v4  ;;  %2828 = vmatmul.mubr.msk.bf16.gmra.mrb[60].mxu1 %vm415_vm0, %v3837_v50  ;;  %1608 = vmatprep.mubr.bf16.mxu0 %v5084_v0  ;;  %v2593_v30 = vrot.slane %v2592_v38, 2 }
 0x479   :  { %v3922_v13 = vsub.f32 %v3815_v32, %v2554_v24  ;;  %v3925_v57 = vsub.f32 %v3840_v42, %v2554_v24  ;;  %v3928_v39 = vsub.f32 %v3849_v21, %v2554_v24  ;;  %1701 = vmatprep.mubr.bf16.mxu1 %v5084_v0  ;;  %v3932_v44 = vsub.f32 %v3812_v1, %v2554_v24  ;;  %v2862_v42 = vld [vmem:[%s5081_s9 + $0x20] sm:$0xff]  }
 0x47a   :  { %v3935_v50 = vsub.f32 %v3821_v61, %v2555_v37  ;;  %v3938_v16 = vsub.f32 %v3844_v25, %v2555_v37  ;;  %v3941_v32 = vsub.f32 %v3853_v20, %v2555_v37  ;;  %v2594_v29 = vadd.f32 %v2593_v30, %v2592_v38 }
 0x47b   :  { %v2602_v21 = vrot.slane %v2601_v26, 2  ;;  %v2574_v11 = vmul.f32 %v3932_v44, %v3932_v44  ;;  %v2578_v1 = vmul.f32 %v3922_v13, %v3922_v13  ;;  %v3951_v7 = vsub.f32 %v3818_v36, %v2555_v37 }
 0x47c   :  { %v2595_v61 = vrot.slane %v2594_v29, 1  ;;  %v2582_v20 = vmul.f32 %v3925_v57, %v3925_v57  ;;  %v2579_v53 = vmul.f32 %v3935_v50, %v3935_v50  ;;  %v2586_v40 = vmul.f32 %v3928_v39, %v3928_v39 }
 0x47d   :  { %v2603_v25 = vadd.f32 %v2602_v21, %v2601_v26  ;;  %v2606_v31 = vadd.f32 %v2578_v1, %v2574_v11  ;;  %v2575_v47 = vmul.f32 %v3951_v7, %v3951_v7  ;;  %v2583_v58 = vmul.f32 %v3938_v16, %v3938_v16 }
 0x47e   :  { %v2596_v14 = vadd.f32 %v2595_v61, %v2594_v29  ;;  %v2587_v5 = vmul.f32 %v3941_v32, %v3941_v32  ;;  %v2865_v29 = vld [vmem:[%s5081_s9 + $0x38] sm:$0xff]  }
 0x47f   :  { %2823 = vmatmul.mubr.msk.bf16.gmra.mrb[72].mxu0 %vm415_vm0, %v2862_v42  ;;  %v2604_v23 = vrot.slane %v2603_v25, 1  ;;  %v2607_v36 = vadd.f32 %v2606_v31, %v2582_v20  ;;  %v2615_v28 = vadd.f32 %v2579_v53, %v2575_v47  ;;  %v4046_v53 = vpop.permute.xlu1 %1399 }
 0x480   :  { %2829 = vmatmul.mubr.msk.bf16.gmra.mrb[64].mxu1 %vm415_vm0, %v3887_v34  ;;  %1618 = vmatprep.mubr.bf16.mxu0 %v5084_v0  ;;  %v2624_v10 = vmul.f32 0.03125, %v2596_v14  ;;  %v2863_v34 = vld [vmem:[%s5081_s9 + $0x28] sm:$0xff]  }
 0x481   :  { %1711 = vmatprep.mubr.bf16.mxu1 %v5084_v0  ;;  %v2605_v46 = vadd.f32 %v2604_v23, %v2603_v25  ;;  %v2608_v45 = vadd.f32 %v2607_v36, %v2586_v40  ;;  %v2616_v54 = vadd.f32 %v2615_v28, %v2583_v58 }
 0x482   :  { %v2628_v6 = vadd.f32 1e-05, %v2624_v10 }
 0x483   :  { %v2625_v17 = vmul.f32 0.03125, %v2605_v46  ;;  %v2609_v33 = vrot.slane %v2608_v45, 4  ;;  %v2617_v55 = vadd.f32 %v2616_v54, %v2587_v5 }
 0x484   :  { %2900 = vrsqrt.f32 %v2628_v6 }
 0x485   :  { %v2629_v22 = vadd.f32 1e-05, %v2625_v17  ;;  %v2610_v27 = vadd.f32 %v2609_v33, %v2608_v45  ;;  %v2618_v62 = vrot.slane %v2617_v55, 4  ;;  %v4053_v17 = vpop.permute.xlu1 %1409 }
 0x487   :  { %2824 = vmatmul.mubr.msk.bf16.gmra.mrb[76].mxu0 %vm415_vm0, %v2863_v34  ;;  %2902 = vrsqrt.f32 %v2629_v22  ;;  %v2611_v2 = vrot.slane %v2610_v27, 2  ;;  %v2619_v19 = vadd.f32 %v2618_v62, %v2617_v55 }
 0x488   :  { %2830 = vmatmul.mubr.msk.bf16.gmra.mrb[68].mxu1 %vm415_vm0, %v2861_v41  ;;  %1628 = vmatprep.mubr.bf16.mxu0 %v5084_v0 }
 0x489   :  { %1721 = vmatprep.mubr.bf16.mxu1 %v5084_v0  ;;  %v2612_v51 = vadd.f32 %v2611_v2, %v2610_v27  ;;  %v2620_v59 = vrot.slane %v2619_v19, 2 }
 0x48b   :  { %v2613_v63 = vrot.slane %v2612_v51, 1  ;;  %v2621_v48 = vadd.f32 %v2620_v59, %v2619_v19 }
 0x48d   :  { %v2614_v15 = vadd.f32 %v2613_v63, %v2612_v51  ;;  %v2622_v4 = vrot.slane %v2621_v48, 1 }
 0x48e   :  { %v2901_v3 = vpop.eup %2900 }
 0x48f   :  { %2825 = vmatmul.mubr.msk.bf16.gmra.mrb[80].mxu0 %vm415_vm0, %v2864_v52  ;;  %v3982_v41 = vmul.f32 %v2901_v3, %v3882_v56  ;;  %v3985_v38 = vmul.f32 %v2901_v3, %v3858_v12  ;;  %v3988_v18 = vmul.f32 %v2901_v3, %v3861_v49  ;;  %v3991_v24 = vmul.f32 %v2901_v3, %v3863_v60 }
 0x490   :  { %2831 = vmatmul.mubr.msk.bf16.gmra.mrb[72].mxu1 %vm415_vm0, %v2862_v42  ;;  %1638 = vmatprep.mubr.bf16.mxu0 %v5084_v0  ;;  %v2626_v30 = vmul.f32 0.03125, %v2614_v15  ;;  %v2623_v26 = vadd.f32 %v2622_v4, %v2621_v48 }
 0x491   :  { %5126 = vst [vmem:[#allocation2_spill] sm:$0xff] %v3982_v41  ;;  %5127 = vst [vmem:[#allocation3_spill] sm:$0xff] %v3985_v38  ;;  %v2903_v37 = vpop.eup %2902  ;;  %1731 = vmatprep.mubr.bf16.mxu1 %v5084_v0 }
 0x492   :  { %5128 = vst [vmem:[#allocation4_spill] sm:$0xff] %v3988_v18  ;;  %5129 = vst [vmem:[#allocation5_spill] sm:$0xff] %v3991_v24  ;;  %v3997_v56 = vmul.f32 %v2903_v37, %v3894_v35  ;;  %v4000_v12 = vmul.f32 %v2903_v37, %v3869_v9  ;;  %v4003_v49 = vmul.f32 %v2903_v37, %v3872_v8  ;;  %v2630_v42 = vadd.f32 1e-05, %v2626_v30 }
 0x493   :  { %v4006_v60 = vmul.f32 %v2903_v37, %v3875_v43  ;;  %v2627_v21 = vmul.f32 0.03125, %v2623_v26 }
 0x494   :  { %5130 = vst [vmem:[#allocation6_spill] sm:$0xff] %v3997_v56  ;;  %5131 = vst [vmem:[#allocation7_spill] sm:$0xff] %v4000_v12  ;;  %2904 = vrsqrt.f32 %v2630_v42 }
 0x495   :  { %5132 = vst [vmem:[#allocation8_spill] sm:$0xff] %v4003_v49  ;;  %5133 = vst [vmem:[#allocation9_spill] sm:$0xff] %v4006_v60  ;;  %v2631_v35 = vadd.f32 1e-05, %v2627_v21 }
 0x497   :  { %2826 = vmatmul.mubr.msk.bf16.gmra.mrb[84].mxu0 %vm415_vm0, %v2865_v29  ;;  %2906 = vrsqrt.f32 %v2631_v35 }
 0x498   :  { %2832 = vmatmul.mubr.msk.bf16.gmra.mrb[76].mxu1 %vm415_vm0, %v2863_v34  ;;  %2442 = vmatprep.mubr.bf16.mxu0 %v5084_v0 }
 0x499   :  { %1741 = vmatprep.mubr.bf16.mxu1 %v5084_v0 }
 0x49e   :  { %v2905_v9 = vpop.eup %2904 }
 0x49f   :  { %v4018_v8 = vmul.f32 %v2905_v9, %v3932_v44  ;;  %v4021_v43 = vmul.f32 %v2905_v9, %v3922_v13  ;;  %v4024_v11 = vmul.f32 %v2905_v9, %v3925_v57  ;;  %v4027_v1 = vmul.f32 %v2905_v9, %v3928_v39  ;;  %v4043_v13 = vpop.permute.xlu0 %1394 }
 0x4a0   :  { %2833 = vmatmul.mubr.msk.bf16.gmra.mrb[80].mxu1 %vm415_vm0, %v2864_v52 }
 0x4a1   :  { %1751 = vmatprep.mubr.bf16.mxu1 %v5084_v0  ;;  %5134 = vst [vmem:[#allocation10_spill] sm:$0xff] %v4018_v8  ;;  %5135 = vst [vmem:[#allocation11_spill] sm:$0xff] %v4021_v43  ;;  %v2907_v61 = vpop.eup %2906 }
 0x4a2   :  { %5136 = vst [vmem:[#allocation12_spill] sm:$0xff] %v4024_v11  ;;  %5137 = vst [vmem:[#allocation13_spill] sm:$0xff] %v4027_v1  ;;  %v4030_v25 = vmul.f32 %v2907_v61, %v3951_v7  ;;  %v4033_v20 = vmul.f32 %v2907_v61, %v3935_v50  ;;  %v4036_v31 = vmul.f32 %v2907_v61, %v3938_v16 }
 0x4a3   :  { %v4039_v44 = vmul.f32 %v2907_v61, %v3941_v32  ;;  %v4051_v5 = vpop.permute.xlu0 %1404  ;;  %v4071_v61 = vpop.permute.xlu1 %1419 }
 0x4a4   :  { %5138 = vst [vmem:[#allocation14_spill] sm:$0xff] %v4030_v25  ;;  %5139 = vst [vmem:[#allocation15_spill] sm:$0xff] %v4033_v20 }
 0x4a5   :  { %5140 = vst [vmem:[#allocation16_spill] sm:$0xff] %v4036_v31  ;;  %5141 = vst [vmem:[#allocation17_spill] sm:$0xff] %v4039_v44 }
 0x4a7   :  { %v4169_v25 = vpop.permute.xlu1 %1429 }
 0x4a8   :  { %2834 = vmatmul.mubr.msk.bf16.gmra.mrb[84].mxu1 %vm415_vm0, %v2865_v29 }
 0x4a9   :  { %2495 = vmatprep.mubr.bf16.mxu1 %v5084_v0 }
 0x532   :  { %v1570_v57 = vpop.f32.mrb[56].mxu0 }
 0x533   :  { %v1571_v39 = vadd.f32 %v1570_v57, %v4043_v13  ;;  %v1572_v7 = vpop.f32.mrb[57].mxu0 }
 0x534   :  { %v1573_v50 = vadd.f32 %v1572_v7, %v4043_v13  ;;  %v1574_v14 = vpop.f32.mrb[58].mxu0 }
 0x535   :  { %v1826_v16 = vmul.f32 0.044715, %v1571_v39  ;;  %v1575_v47 = vadd.f32 %v1574_v14, %v4046_v53  ;;  %v1576_v32 = vpop.f32.mrb[59].mxu0  ;;  %v4069_v9 = vmul.f32 0.5, %v1571_v39 }
 0x536   :  { %v1827_v40 = vmul.f32 0.044715, %v1573_v50  ;;  %v1577_v23 = vadd.f32 %v1576_v32, %v4046_v53 }
 0x537   :  { %v1890_v36 = vmul.f32 %v1826_v16, %v1571_v39  ;;  %v1830_v10 = vmul.f32 0.044715, %v1575_v47  ;;  %v4074_v16 = vpop.permute.xlu0 %1414 }
 0x538   :  { %v1891_v58 = vmul.f32 %v1827_v40, %v1573_v50  ;;  %v1831_v28 = vmul.f32 0.044715, %v1577_v23  ;;  %v4076_v40 = vmul.f32 0.5, %v1573_v50 }
 0x539   :  { %v1954_v46 = vmul.f32 %v1890_v36, %v1571_v39  ;;  %v1894_v45 = vmul.f32 %v1830_v10, %v1575_v47  ;;  %v4078_v36 = vmul.f32 0.5, %v1577_v23  ;;  %v4080_v10 = vmul.f32 0.5, %v1575_v47 }
 0x53a   :  { %v1955_v6 = vmul.f32 %v1891_v58, %v1573_v50  ;;  %v1895_v54 = vmul.f32 %v1831_v28, %v1577_v23  ;;  %v1580_v34 = vpop.f32.mrb[60].mxu0 }
 0x53b   :  { %v2018_v33 = vadd.f32 %v1954_v46, %v1571_v39  ;;  %v1958_v55 = vmul.f32 %v1894_v45, %v1575_v47  ;;  %v1581_v22 = vadd.f32 %v1580_v34, %v4051_v5  ;;  %v1582_v27 = vpop.f32.mrb[61].mxu0 }
 0x53c   :  { %v1959_v62 = vmul.f32 %v1895_v54, %v1577_v23  ;;  %v4057_v2 = vadd.f32 %v1582_v27, %v4051_v5  ;;  %v1584_v19 = vpop.f32.mrb[62].mxu0  ;;  %v2019_v51 = vadd.f32 %v1955_v6, %v1573_v50 }
 0x53d   :  { %v2082_v59 = vmul.f32 0.7978846, %v2018_v33  ;;  %v2022_v52 = vadd.f32 %v1958_v55, %v1575_v47  ;;  %v1834_v63 = vmul.f32 0.044715, %v1581_v22  ;;  %v4060_v48 = vadd.f32 %v1584_v19, %v4053_v17  ;;  %v1586_v15 = vpop.f32.mrb[63].mxu0 }
 0x53e   :  { %v1835_v3 = vmul.f32 0.044715, %v4057_v2  ;;  %v4064_v4 = vadd.f32 %v1586_v15, %v4053_v17  ;;  %v2023_v37 = vadd.f32 %v1959_v62, %v1577_v23  ;;  %v2083_v30 = vmul.f32 0.7978846, %v2019_v51 }
 0x53f   :  { %v2086_v26 = vmul.f32 0.7978846, %v2022_v52  ;;  %v1898_v29 = vmul.f32 %v1834_v63, %v1581_v22  ;;  %v1838_v42 = vmul.f32 0.044715, %v4060_v48  ;;  %2908 = vtanh.f32 %v2082_v59 }
 0x540   :  { %v1899_v21 = vmul.f32 %v1835_v3, %v4057_v2  ;;  %v1839_v35 = vmul.f32 0.044715, %v4064_v4  ;;  %v2087_v14 = vmul.f32 0.7978846, %v2023_v37  ;;  %2910 = vtanh.f32 %v2083_v30 }
 0x541   :  { %v1962_v57 = vmul.f32 %v1898_v29, %v1581_v22  ;;  %v1902_v7 = vmul.f32 %v1838_v42, %v4060_v48  ;;  %2912 = vtanh.f32 %v2086_v26  ;;  %v4087_v45 = vmul.f32 0.5, %v4057_v2 }
 0x542   :  { %v1590_v32 = vpop.f32.mrb[64].mxu0  ;;  %v1963_v6 = vmul.f32 %v1899_v21, %v4057_v2  ;;  %v1903_v50 = vmul.f32 %v1839_v35, %v4064_v4  ;;  %2914 = vtanh.f32 %v2087_v14  ;;  %v4112_v30 = vmul.f32 0.5, %v4064_v4 }
 0x543   :  { %v1966_v39 = vmul.f32 %v1902_v7, %v4060_v48  ;;  %v4084_v58 = vadd.f32 %v1590_v32, %v4074_v16  ;;  %v1683_v28 = vpop.f32.mrb[56].mxu1  ;;  %v1592_v46 = vpop.f32.mrb[65].mxu0  ;;  %v2026_v33 = vadd.f32 %v1962_v57, %v1581_v22  ;;  %v4114_v26 = vmul.f32 0.5, %v1581_v22 }
 0x544   :  { %v4092_v23 = vadd.f32 %v1683_v28, %v4043_v13  ;;  %v4095_v47 = vadd.f32 %v1592_v46, %v4074_v16  ;;  %v1685_v54 = vpop.f32.mrb[57].mxu1  ;;  %v1594_v34 = vpop.f32.mrb[66].mxu0  ;;  %v4117_v29 = vmul.f32 %v1903_v50, %v4064_v4  ;;  %v4157_v31 = vadd.f32 %v1963_v6, %v4057_v2 }
 0x545   :  { %5142 = vst [vmem:[#allocation18_spill] sm:$0xff] %v4084_v58  ;;  %v2030_v55 = vadd.f32 %v1966_v39, %v4060_v48  ;;  %v1842_v27 = vmul.f32 0.044715, %v4084_v58  ;;  %v1687_v62 = vpop.f32.mrb[58].mxu1  ;;  %v1596_v19 = vpop.f32.mrb[67].mxu0  ;;  %v4101_v59 = vadd.f32 %v1685_v54, %v4043_v13  ;;  %v4104_v52 = vadd.f32 %v1594_v34, %v4071_v61 }
 0x546   :  { %5143 = vst [vmem:[#allocation19_spill] sm:$0xff] %v4092_v23  ;;  %v1828_v51 = vmul.f32 0.044715, %v4092_v23  ;;  %v4107_v63 = vadd.f32 %v1687_v62, %v4046_v53  ;;  %v1689_v15 = vpop.f32.mrb[59].mxu1  ;;  %v1843_v37 = vmul.f32 0.044715, %v4095_v47  ;;  %v4124_v14 = vadd.f32 %v1596_v19, %v4071_v61  ;;  %v4126_v32 = vpop.permute.xlu0 %1424 }
 0x547   :  { %5144 = vst [vmem:[#allocation20_spill] sm:$0xff] %v4104_v52  ;;  %v1906_v3 = vmul.f32 %v1842_v27, %v4084_v58  ;;  %v1846_v42 = vmul.f32 0.044715, %v4104_v52  ;;  %v2090_v35 = vmul.f32 0.7978846, %v2026_v33  ;;  %v4138_v27 = vadd.f32 %v1689_v15, %v4046_v53 }
 0x548   :  { %5145 = vst [vmem:[#allocation21_spill] sm:$0xff] %v4107_v63  ;;  %v1892_v13 = vmul.f32 %v1828_v51, %v4092_v23  ;;  %v1832_v21 = vmul.f32 0.044715, %v4107_v63  ;;  %v2094_v57 = vmul.f32 0.7978846, %v2030_v55  ;;  %v1907_v33 = vmul.f32 %v1843_v37, %v4095_v47 }
 0x549   :  { %v1970_v7 = vmul.f32 %v1906_v3, %v4084_v58  ;;  %v1829_v39 = vmul.f32 0.044715, %v4101_v59  ;;  %v1910_v28 = vmul.f32 %v1846_v42, %v4104_v52  ;;  %v4132_v54 = vpop.eup %2908  ;;  %v1847_v55 = vmul.f32 0.044715, %v4124_v14 }
 0x54a   :  { %v1956_v22 = vmul.f32 %v1892_v13, %v4092_v23  ;;  %v1896_v46 = vmul.f32 %v1832_v21, %v4107_v63  ;;  %v1600_v50 = vpop.f32.mrb[68].mxu0  ;;  %v4140_v51 = vpop.eup %2910  ;;  %2916 = vtanh.f32 %v2090_v35  ;;  %v1833_v15 = vmul.f32 0.044715, %v4138_v27 }
 0x54b   :  { %v2034_v34 = vadd.f32 %v1970_v7, %v4084_v58  ;;  %v1693_v62 = vpop.f32.mrb[60].mxu1  ;;  %v1602_v19 = vpop.f32.mrb[69].mxu0  ;;  %v1974_v13 = vmul.f32 %v1910_v28, %v4104_v52  ;;  %v4146_v21 = vadd.f32 %v1600_v50, %v4126_v32  ;;  %2918 = vtanh.f32 %v2094_v57 }
 0x54c   :  { %v2020_v3 = vadd.f32 %v1956_v22, %v4092_v23  ;;  %v1960_v42 = vmul.f32 %v1896_v46, %v4107_v63  ;;  %v1695_v7 = vpop.f32.mrb[61].mxu1  ;;  %v1604_v37 = vpop.f32.mrb[70].mxu0  ;;  %v4152_v44 = vadd.f32 %v1693_v62, %v4051_v5  ;;  %v1893_v62 = vmul.f32 %v1829_v39, %v4101_v59 }
 0x54d   :  { %5146 = vst [vmem:[#allocation22_spill] sm:$0xff] %v4146_v21  ;;  %v4148_v0 = vpop.eup %2912  ;;  %v2098_v53 = vmul.f32 0.7978846, %v2034_v34  ;;  %v1697_v1 = vpop.f32.mrb[62].mxu1  ;;  %v2038_v28 = vadd.f32 %v1974_v13, %v4104_v52  ;;  %v1850_v46 = vmul.f32 0.044715, %v4146_v21  ;;  %v4162_v34 = vmul.f32 %v1907_v33, %v4095_v47 }
 0x54e   :  { %5147 = vst [vmem:[#allocation23_spill] sm:$0xff] %v4152_v44  ;;  %v1606_v22 = vpop.f32.mrb[71].mxu0  ;;  %v1699_v50 = vpop.f32.mrb[63].mxu1  ;;  %v2084_v35 = vmul.f32 0.7978846, %v2020_v3  ;;  %v2024_v57 = vadd.f32 %v1960_v42, %v4107_v63  ;;  %v1911_v13 = vmul.f32 %v1847_v55, %v4124_v14  ;;  %v1897_v2 = vmul.f32 %v1833_v15, %v4138_v27 }
 0x54f   :  { %v4159_v11 = vpop.eup %2914  ;;  %v1836_v20 = vmul.f32 0.044715, %v4152_v44  ;;  %2920 = vtanh.f32 %v2098_v53  ;;  %v1914_v43 = vmul.f32 %v1850_v46, %v4146_v21  ;;  %v4174_v33 = vadd.f32 %v1602_v19, %v4126_v32  ;;  %v4238_v63 = vpop.permute.xlu1 %1439 }
 0x550   :  { %v4177_v39 = vadd.f32 %v1695_v7, %v4051_v5  ;;  %v2102_v3 = vmul.f32 0.7978846, %v2038_v28  ;;  %v4181_v42 = vadd.f32 %v1604_v37, %v4169_v25  ;;  %v4184_v55 = vadd.f32 %v1697_v1, %v4053_v17 }
 0x551   :  { %v1900_v6 = vmul.f32 %v1836_v20, %v4152_v44  ;;  %5148 = vst [vmem:[#allocation24_spill] sm:$0xff] %v4174_v33  ;;  %v1978_v53 = vmul.f32 %v1914_v43, %v4146_v21  ;;  %2922 = vtanh.f32 %v2084_v35  ;;  %v1851_v20 = vmul.f32 0.044715, %v4174_v33 }
 0x552   :  { %5149 = vst [vmem:[#allocation25_spill] sm:$0xff] %v4177_v39  ;;  %5150 = vst [vmem:[#allocation26_spill] sm:$0xff] %v4181_v42  ;;  %v1610_v46 = vpop.f32.mrb[72].mxu0  ;;  %v1837_v19 = vmul.f32 0.044715, %v4177_v39  ;;  %v4193_v28 = vadd.f32 %v1606_v22, %v4169_v25  ;;  %v4198_v49 = vadd.f32 %v1699_v50, %v4053_v17  ;;  %2924 = vtanh.f32 %v2102_v3 }
 0x553   :  { %5151 = vst [vmem:[#allocation27_spill] sm:$0xff] %v4184_v55  ;;  %v1964_v15 = vmul.f32 %v1900_v6, %v4152_v44  ;;  %v1703_v8 = vpop.f32.mrb[64].mxu1  ;;  %v1612_v5 = vpop.f32.mrb[73].mxu0  ;;  %v2042_v7 = vadd.f32 %v1978_v53, %v4146_v21  ;;  %v1854_v43 = vmul.f32 0.044715, %v4181_v42  ;;  %v1915_v24 = vmul.f32 %v1851_v20, %v4174_v33 }
 0x554   :  { %v1840_v37 = vmul.f32 0.044715, %v4184_v55  ;;  %5152 = vst [vmem:[#allocation28_spill] sm:$0xff] %v4193_v28  ;;  %v1705_v1 = vpop.f32.mrb[65].mxu1  ;;  %v1614_v60 = vpop.f32.mrb[74].mxu0  ;;  %v4215_v17 = vmul.f32 %v1911_v13, %v4124_v14  ;;  %v4218_v50 = vmul.f32 %v1897_v2, %v4138_v27  ;;  %v4234_v2 = vadd.f32 %v1703_v8, %v4074_v16 }
 0x555   :  { %v2088_v35 = vmul.f32 0.7978846, %v2024_v57  ;;  %v2028_v6 = vadd.f32 %v1964_v15, %v4152_v44  ;;  %v4200_v18 = vpop.f32.mrb[66].mxu1  ;;  %v4202_v53 = vpop.f32.mrb[75].mxu0  ;;  %v2106_v12 = vmul.f32 0.7978846, %v2042_v7  ;;  %v1918_v38 = vmul.f32 %v1854_v43, %v4181_v42 }
 0x556   :  { %v1904_v22 = vmul.f32 %v1840_v37, %v4184_v55  ;;  %v1855_v56 = vmul.f32 0.044715, %v4193_v28  ;;  %v4207_v41 = vpop.f32.mrb[67].mxu1  ;;  %v4209_v57 = vpop.eup %2916  ;;  %v4212_v15 = vmul.f32 %v1893_v62, %v4101_v59  ;;  %5153 = vst [vmem:[#allocation29_spill] sm:$0xff] %v4218_v50  ;;  %v1901_v37 = vmul.f32 %v1837_v19, %v4177_v39  ;;  %5156 = vst [vmem:[#allocation32_spill] sm:$0xff] %v4234_v2 }
 0x557   :  { %v4220_v20 = vpop.eup %2918  ;;  %v4222_v7 = vpop.permute.xlu0 %1434  ;;  %v2092_v43 = vmul.f32 0.7978846, %v2028_v6  ;;  %v1982_v44 = vmul.f32 %v1918_v38, %v4181_v42  ;;  %2926 = vtanh.f32 %v2088_v35  ;;  %v4228_v62 = vmul.f32 %v1915_v24, %v4174_v33 }
 0x558   :  { %v1968_v21 = vmul.f32 %v1904_v22, %v4184_v55  ;;  %v4231_v13 = vadd.f32 %v1610_v46, %v4222_v7  ;;  %2928 = vtanh.f32 %v2106_v12  ;;  %v1919_v19 = vmul.f32 %v1855_v56, %v4193_v28 }
 0x559   :  { %5154 = vst [vmem:[#allocation30_spill] sm:$0xff] %v4228_v62  ;;  %v4236_v3 = vpop.eup %2920  ;;  %v1841_v38 = vmul.f32 0.044715, %v4198_v49  ;;  %v4243_v35 = vadd.f32 %v1612_v5, %v4222_v7  ;;  %v2046_v6 = vadd.f32 %v1982_v44, %v4181_v42  ;;  %v1844_v8 = vmul.f32 0.044715, %v4234_v2 }
 0x55a   :  { %5155 = vst [vmem:[#allocation31_spill] sm:$0xff] %v4231_v13  ;;  %5157 = vst [vmem:[#allocation33_spill] sm:$0xff] %v4236_v3  ;;  %v1620_v24 = vpop.f32.mrb[76].mxu0  ;;  %v1858_v46 = vmul.f32 0.044715, %v4231_v13  ;;  %v4249_v22 = vadd.f32 %v1705_v1, %v4074_v16  ;;  %2930 = vtanh.f32 %v2092_v43  ;;  %v4256_v56 = vmul.f32 %v1901_v37, %v4177_v39 }
 0x55b   :  { %5158 = vst [vmem:[#allocation34_spill] sm:$0xff] %v4243_v35  ;;  %v4251_v62 = vpop.f32.mrb[68].mxu1  ;;  %v4253_v12 = vpop.f32.mrb[77].mxu0  ;;  %v2032_v5 = vadd.f32 %v1968_v21, %v4184_v55  ;;  %v4260_v33 = vadd.f32 %v1614_v60, %v4238_v63  ;;  %v1908_v16 = vmul.f32 %v1844_v8, %v4234_v2  ;;  %v1859_v1 = vmul.f32 0.044715, %v4243_v35 }
 0x55c   :  { %5159 = vst [vmem:[#allocation35_spill] sm:$0xff] %v4249_v22  ;;  %5160 = vst [vmem:[#allocation36_spill] sm:$0xff] %v4256_v56  ;;  %v4262_v44 = vpop.eup %2922  ;;  %v1922_v42 = vmul.f32 %v1858_v46, %v4231_v13  ;;  %v2211_v23 = vadd.f32 1.0, %v4140_v51  ;;  %v4268_v3 = vpop.f32.mrb[69].mxu1  ;;  %v4273_v37 = vmul.f32 %v1919_v19, %v4193_v28  ;;  %v1905_v60 = vmul.f32 %v1841_v38, %v4198_v49 }
 0x55d   :  { %5161 = vst [vmem:[#allocation37_spill] sm:$0xff] %v4260_v33  ;;  %5162 = vst [vmem:[#allocation38_spill] sm:$0xff] %v4262_v44  ;;  %v4270_v43 = vpop.f32.mrb[78].mxu0  ;;  %v2215_v21 = vadd.f32 1.0, %v4159_v11  ;;  %v1862_v55 = vmul.f32 0.044715, %v4260_v33  ;;  %v1972_v39 = vmul.f32 %v1908_v16, %v4234_v2  ;;  %v4290_v28 = vpop.eup %2924  ;;  %v4297_v16 = vadd.f32 %v4200_v18, %v4071_v61 }
 0x55e   :  { %5163 = vst [vmem:[#allocation39_spill] sm:$0xff] %v4273_v37  ;;  %v4278_v46 = vpop.f32.mrb[70].mxu1  ;;  %v4280_v8 = vpop.f32.mrb[79].mxu0  ;;  %v2110_v56 = vmul.f32 0.7978846, %v2046_v6  ;;  %v1986_v51 = vmul.f32 %v1922_v42, %v4231_v13  ;;  %v2275_v38 = vmul.f32 %v2211_v23, %v4076_v40  ;;  %v1923_v42 = vmul.f32 %v1859_v1, %v4243_v35 }
 0x55f   :  { %v1845_v44 = vmul.f32 0.044715, %v4249_v22  ;;  %v4285_v52 = vpop.f32.mrb[71].mxu1  ;;  %v2096_v19 = vmul.f32 0.7978846, %v2032_v5  ;;  %v2279_v11 = vmul.f32 %v2215_v21, %v4078_v36  ;;  %v1926_v37 = vmul.f32 %v1862_v55, %v4260_v33  ;;  %5164 = vst [vmem:[#allocation40_spill] sm:$0xff] %v4297_v16  ;;  %v4306_v21 = vpop.permute.xlu0 %1444 }
 0x560   :  { %v2050_v58 = vadd.f32 %v1986_v51, %v4231_v13  ;;  %v2036_v6 = vadd.f32 %v1972_v39, %v4234_v2  ;;  %v2210_v40 = vadd.f32 1.0, %v4132_v54  ;;  %v2214_v36 = vadd.f32 1.0, %v4148_v0  ;;  %v4370_v13 = vpop.permute.xlu1 %1449 }
 0x561   :  { %v2343_v50 = vpack.c.bf16 %v2279_v11, %v2275_v38  ;;  %v1990_v5 = vmul.f32 %v1926_v37, %v4260_v33  ;;  %v4304_v55 = vpop.eup %2926  ;;  %2932 = vtanh.f32 %v2110_v56  ;;  %v4309_v39 = vmul.f32 %v1905_v60, %v4198_v49 }
 0x562   :  { %v4302_v23 = vpop.f32.mrb[80].mxu0  ;;  %v1909_v18 = vmul.f32 %v1845_v44, %v4249_v22  ;;  %v1848_v1 = vmul.f32 0.044715, %v4297_v16  ;;  %v4313_v51 = vpop.eup %2928  ;;  %v2274_v0 = vmul.f32 %v2210_v40, %v4069_v9  ;;  %v2278_v37 = vmul.f32 %v2214_v36, %v4080_v10 }
 0x563   :  { %5165 = vst [vmem:[#allocation41_spill] sm:$0xff] %v4313_v51  ;;  %2410 = vmatprep.subr.bf16.mxu0 %v2343_v50  ;;  %v2054_v54 = vadd.f32 %v1990_v5, %v4260_v33  ;;  %v4320_v38 = vadd.f32 %v4202_v53, %v4238_v63  ;;  %v4322_v56 = vpop.f32.mrb[72].mxu1  ;;  %v4324_v60 = vpop.f32.mrb[81].mxu0  ;;  %2934 = vtanh.f32 %v2096_v19  ;;  %v2114_v44 = vmul.f32 0.7978846, %v2050_v58 }
 0x564   :  { %v1912_v11 = vmul.f32 %v1848_v1, %v4297_v16  ;;  %v4328_v50 = vadd.f32 %v1620_v24, %v4306_v21  ;;  %v4330_v5 = vpop.f32.mrb[73].mxu1  ;;  %v4332_v9 = vpop.f32.mrb[82].mxu0  ;;  %v2100_v40 = vmul.f32 0.7978846, %v2036_v6  ;;  %v4337_v53 = vmul.f32 %v1923_v42, %v4243_v35 }
 0x565   :  { %v4334_v10 = vpop.eup %2930  ;;  %v2342_v36 = vpack.c.bf16 %v2278_v37, %v2274_v0  ;;  %v4341_v19 = vadd.f32 %v4207_v41, %v4071_v61  ;;  %v4343_v58 = vpop.f32.mrb[74].mxu1  ;;  %v4348_v24 = vmul.f32 %v1909_v18, %v4249_v22  ;;  %v4354_v6 = vadd.f32 %v4251_v62, %v4126_v32 }
 0x566   :  { %5166 = vst [vmem:[#allocation42_spill] sm:$0xff] %v4328_v50  ;;  %5167 = vst [vmem:[#allocation43_spill] sm:$0xff] %v4334_v10  ;;  %v4345_v1 = vpop.f32.mrb[83].mxu0  ;;  %v1976_v2 = vmul.f32 %v1912_v11, %v4297_v16  ;;  %v1866_v33 = vmul.f32 0.044715, %v4328_v50  ;;  %v4356_v42 = vpop.f32.mrb[75].mxu1  ;;  %v4361_v61 = vadd.f32 %v4253_v12, %v4306_v21  ;;  %v4365_v18 = vadd.f32 %v4268_v3, %v4126_v32 }
 0x567   :  { %5168 = vst [vmem:[#allocation44_spill] sm:$0xff] %v4337_v53  ;;  %5169 = vst [vmem:[#allocation45_spill] sm:$0xff] %v4348_v24  ;;  %v2118_v0 = vmul.f32 0.7978846, %v2054_v54  ;;  %2411 = vmatpush1.bf16.msra.mxu0 %v2342_v36  ;;  %v1863_v41 = vmul.f32 0.044715, %v4320_v38  ;;  %2936 = vtanh.f32 %v2114_v44  ;;  %v2031_v12 = vadd.f32 %v4117_v29, %v4064_v4 }
 0x568   :  { %5170 = vst [vmem:[#allocation46_spill] sm:$0xff] %v4354_v6  ;;  %v2040_v37 = vadd.f32 %v1976_v2, %v4297_v16  ;;  %v1930_v62 = vmul.f32 %v1866_v33, %v4328_v50  ;;  %v1852_v11 = vmul.f32 0.044715, %v4354_v6  ;;  %2938 = vtanh.f32 %v2100_v40 }
 0x569   :  { %v1849_v54 = vmul.f32 0.044715, %v4341_v19  ;;  %v1867_v36 = vmul.f32 0.044715, %v4361_v61  ;;  %v1853_v33 = vmul.f32 0.044715, %v4365_v18  ;;  %2940 = vtanh.f32 %v2118_v0 }
 0x56a   :  { %v4376_v24 = vpop.f32.mrb[84].mxu0  ;;  %v1994_v32 = vmul.f32 %v1930_v62, %v4328_v50  ;;  %v1916_v2 = vmul.f32 %v1852_v11, %v4354_v6  ;;  %v2091_v3 = vmul.f32 0.7978846, %v4157_v31  ;;  %v4387_v16 = vmul.f32 %v1863_v41, %v4320_v38 }
 0x56b   :  { %v4382_v44 = vpop.f32.mrb[76].mxu1  ;;  %v4384_v40 = vpop.f32.mrb[85].mxu0  ;;  %v2095_v22 = vmul.f32 0.7978846, %v2031_v12  ;;  %v4391_v4 = vadd.f32 %v4270_v43, %v4370_v13  ;;  %v2104_v31 = vmul.f32 0.7978846, %v2040_v37  ;;  %v4403_v0 = vadd.f32 %v4278_v46, %v4169_v25 }
 0x56c   :  { %v4393_v29 = vpop.f32.mrb[77].mxu1  ;;  %v4395_v62 = vpop.f32.mrb[86].mxu0  ;;  %v2058_v53 = vadd.f32 %v1994_v32, %v4328_v50  ;;  %v1980_v35 = vmul.f32 %v1916_v2, %v4354_v6  ;;  %v1913_v43 = vmul.f32 %v1849_v54, %v4341_v19  ;;  %v1931_v10 = vmul.f32 %v1867_v36, %v4361_v61 }
 0x56d   :  { %5171 = vst [vmem:[#allocation47_spill] sm:$0xff] %v4391_v4  ;;  %v4397_v11 = vpop.eup %2932  ;;  %5173 = vst [vmem:[#allocation49_spill] sm:$0xff] %v4403_v0  ;;  %v4405_v41 = vpop.f32.mrb[78].mxu1  ;;  %2942 = vtanh.f32 %v2091_v3  ;;  %v1917_v46 = vmul.f32 %v1853_v33, %v4365_v18  ;;  %v1856_v50 = vmul.f32 0.044715, %v4403_v0  ;;  %v1774_v54 = vmul.f32 0.5, %v4060_v48 }
 0x56e   :  { %5172 = vst [vmem:[#allocation48_spill] sm:$0xff] %v4397_v11  ;;  %v4407_v12 = vpop.f32.mrb[87].mxu0  ;;  %v1870_v11 = vmul.f32 0.044715, %v4391_v4  ;;  %v4412_v37 = vpop.f32.mrb[79].mxu1  ;;  %v2044_v2 = vadd.f32 %v1980_v35, %v4354_v6  ;;  %2944 = vtanh.f32 %v2095_v22  ;;  %v2218_v36 = vadd.f32 1.0, %v4209_v57 }
 0x56f   :  { %5174 = vst [vmem:[#allocation50_spill] sm:$0xff] %v4407_v12  ;;  %5175 = vst [vmem:[#allocation51_spill] sm:$0xff] %v4412_v37  ;;  %v4414_v32 = vpop.eup %2934  ;;  %v2222_v3 = vadd.f32 1.0, %v4220_v20  ;;  %2946 = vtanh.f32 %v2104_v31  ;;  %v2122_v51 = vmul.f32 0.7978846, %v2058_v53  ;;  %v1920_v37 = vmul.f32 %v1856_v50, %v4403_v0  ;;  %v4428_v33 = vpop.permute.xlu0 %1454 }
 0x570   :  { %v1934_v12 = vmul.f32 %v1870_v11, %v4391_v4  ;;  %v4426_v35 = vadd.f32 %v4280_v8, %v4370_v13  ;;  %v4432_v11 = vmul.f32 %v2218_v36, %v4114_v26  ;;  %v4438_v57 = vadd.f32 %v4285_v52, %v4169_v25 }
 0x571   :  { %v4434_v48 = vmul.f32 %v2222_v3, %v1774_v54  ;;  %v4440_v20 = vpop.eup %2936  ;;  %v2108_v50 = vmul.f32 0.7978846, %v2044_v2  ;;  %v1984_v53 = vmul.f32 %v1920_v37, %v4403_v0  ;;  %v4446_v31 = vadd.f32 %v4302_v23, %v4428_v33 }
 0x572   :  { %v1998_v22 = vmul.f32 %v1934_v12, %v4391_v4  ;;  %5176 = vst [vmem:[#allocation52_spill] sm:$0xff] %v4440_v20  ;;  %v1871_v8 = vmul.f32 0.044715, %v4426_v35  ;;  %v4450_v26 = vpop.eup %2938  ;;  %v1857_v52 = vmul.f32 0.044715, %v4438_v57  ;;  %v4458_v37 = vadd.f32 %v4322_v56, %v4222_v7 }
 0x573   :  { %5177 = vst [vmem:[#allocation53_spill] sm:$0xff] %v4446_v31  ;;  %v4448_v12 = vpop.f32.mrb[80].mxu1  ;;  %5178 = vst [vmem:[#allocation54_spill] sm:$0xff] %v4450_v26  ;;  %2948 = vtanh.f32 %v2122_v51  ;;  %v2048_v23 = vadd.f32 %v1984_v53, %v4403_v0  ;;  %v1874_v36 = vmul.f32 0.044715, %v4446_v31  ;;  %v4466_v3 = vadd.f32 %v4324_v60, %v4428_v33  ;;  %v4470_v25 = vpop.eup %2940 }
 0x574   :  { %v2062_v54 = vadd.f32 %v1998_v22, %v4391_v4  ;;  %5179 = vst [vmem:[#allocation55_spill] sm:$0xff] %v4458_v37  ;;  %v4460_v2 = vpop.f32.mrb[81].mxu1  ;;  %5182 = vst [vmem:[#allocation58_spill] sm:$0xff] %v4470_v25  ;;  %v1935_v4 = vmul.f32 %v1871_v8, %v4426_v35  ;;  %v1860_v56 = vmul.f32 0.044715, %v4458_v37  ;;  %v4476_v51 = vadd.f32 %v4330_v5, %v4222_v7 }
 0x575   :  { %5180 = vst [vmem:[#allocation56_spill] sm:$0xff] %v4466_v3  ;;  %v4468_v22 = vpop.f32.mrb[82].mxu1  ;;  %v2112_v0 = vmul.f32 0.7978846, %v2048_v23  ;;  %v1921_v26 = vmul.f32 %v1857_v52, %v4438_v57  ;;  %v1938_v60 = vmul.f32 %v1874_v36, %v4446_v31  ;;  %v1875_v20 = vmul.f32 0.044715, %v4466_v3 }
 0x576   :  { %5181 = vst [vmem:[#allocation57_spill] sm:$0xff] %v4468_v22  ;;  %v2126_v6 = vmul.f32 0.7978846, %v2062_v54  ;;  %v4478_v53 = vpop.f32.mrb[83].mxu1  ;;  %v4485_v54 = vmul.f32 %v4387_v16, %v4320_v38  ;;  %v4488_v8 = vmul.f32 %v1913_v43, %v4341_v19  ;;  %2950 = vtanh.f32 %v2108_v50 }
 0x577   :  { %5183 = vst [vmem:[#allocation59_spill] sm:$0xff] %v4478_v53  ;;  %v2943_v22 = vpop.eup %2942  ;;  %v1924_v7 = vmul.f32 %v1860_v56, %v4458_v37  ;;  %v2002_v23 = vmul.f32 %v1938_v60, %v4446_v31  ;;  %v1939_v52 = vmul.f32 %v1875_v20, %v4466_v3  ;;  %v1861_v36 = vmul.f32 0.044715, %v4476_v51 }
 0x578   :  { %5184 = vst [vmem:[#allocation60_spill] sm:$0xff] %v4485_v54  ;;  %v2945_v5 = vpop.eup %2944  ;;  %v2219_v53 = vadd.f32 1.0, %v2943_v22  ;;  %v4495_v25 = vmul.f32 %v1931_v10, %v4361_v61  ;;  %v4498_v16 = vmul.f32 %v1917_v46, %v4365_v18  ;;  %2952 = vtanh.f32 %v2126_v6 }
 0x579   :  { %v2223_v54 = vadd.f32 1.0, %v2945_v5  ;;  %v4500_v43 = vpop.eup %2946  ;;  %2954 = vtanh.f32 %v2112_v0  ;;  %v4503_v50 = vmul.f32 %v1935_v4, %v4426_v35  ;;  %v4506_v22 = vmul.f32 %v1921_v26, %v4438_v57 }
 0x57a   :  { %v1988_v20 = vmul.f32 %v1924_v7, %v4458_v37  ;;  %v2283_v10 = vmul.f32 %v2219_v53, %v4087_v45  ;;  %v2066_v60 = vadd.f32 %v2002_v23, %v4446_v31  ;;  %v2035_v6 = vadd.f32 %v4162_v34, %v4095_v47  ;;  %v4531_v53 = vpop.permute.xlu1 %1459 }
 0x57b   :  { %v4509_v56 = vpop.f32.mrb[84].mxu1  ;;  %v2287_v46 = vmul.f32 %v2223_v54, %v4112_v30  ;;  %v4519_v4 = vmul.f32 %v1939_v52, %v4466_v3  ;;  %v4522_v26 = vmul.f32 %v1861_v36, %v4476_v51  ;;  %v4525_v7 = vmul.f32 0.5, %v4095_v47 }
 0x57c   :  { %v4516_v0 = vpop.f32.mrb[85].mxu1  ;;  %v2039_v45 = vadd.f32 %v4215_v17, %v4124_v14  ;;  %v4534_v34 = vmul.f32 0.5, %v4124_v14  ;;  %v2099_v5 = vmul.f32 0.7978846, %v2035_v6  ;;  %v2021_v23 = vadd.f32 %v4212_v15, %v4101_v59  ;;  %v5188_v17 = vld [vmem:[#allocation29_spill] sm:$0xff]  ;;  %v5191_v6 = vld [vmem:[#allocation18_spill] sm:$0xff] }
 0x57d   :  { %5185 = vst [vmem:[#allocation61_spill] sm:$0xff] %v4519_v4  ;;  %v4529_v30 = vpop.f32.mrb[86].mxu1  ;;  %v2347_v54 = vpack.c.bf16 %v2287_v46, %v2283_v10  ;;  %v4540_v36 = vpop.eup %2948  ;;  %v2052_v47 = vadd.f32 %v1988_v20, %v4458_v37  ;;  %v2025_v4 = vadd.f32 %v5188_v17, %v4138_v27  ;;  %v4547_v10 = vadd.f32 %v4332_v9, %v4531_v53  ;;  %v5193_v37 = vld [vmem:[#allocation20_spill] sm:$0xff] }
 0x57e   :  { %v4538_v52 = vpop.f32.mrb[87].mxu1  ;;  %5187 = vst [vmem:[#allocation63_spill] sm:$0xff] %v4540_v36  ;;  %v2103_v31 = vmul.f32 0.7978846, %v2039_v45  ;;  %v2130_v14 = vmul.f32 0.7978846, %v2066_v60  ;;  %v4551_v15 = vadd.f32 %v4343_v58, %v4238_v63  ;;  %v5192_v20 = vpack.c.bf16 %v4434_v48, %v4432_v11 }
 0x57f   :  { %5186 = vst [vmem:[#allocation62_spill] sm:$0xff] %v4538_v52  ;;  %5189 = vst [vmem:[#allocation29_spill] sm:$0xff] %v4547_v10  ;;  %2412 = vmatprep.subr.bf16.mxu0 %v2347_v54  ;;  %v2085_v46 = vmul.f32 0.7978846, %v2021_v23  ;;  %v1778_v52 = vmul.f32 0.5, %v5191_v6  ;;  %2956 = vtanh.f32 %v2099_v5  ;;  %v1782_v9 = vmul.f32 0.5, %v5193_v37 }
 0x580   :  { %5190 = vst [vmem:[#allocation64_spill] sm:$0xff] %v4551_v15  ;;  %2413 = vmatpush1.bf16.msra.mxu0 %v5192_v20  ;;  %v2089_v45 = vmul.f32 0.7978846, %v2025_v4  ;;  %v1878_v17 = vmul.f32 0.044715, %v4547_v10  ;;  %v4559_v3 = vpop.eup %2950  ;;  %2958 = vtanh.f32 %v2103_v31  ;;  %v5195_v54 = vld [vmem:[#allocation33_spill] sm:$0xff] }
 0x581   :  { %5194 = vst [vmem:[#allocation18_spill] sm:$0xff] %v4559_v3  ;;  %v1864_v60 = vmul.f32 0.044715, %v4551_v15  ;;  %v2226_v58 = vadd.f32 1.0, %v5195_v54  ;;  %v2230_v23 = vadd.f32 1.0, %v4290_v28  ;;  %2960 = vtanh.f32 %v2085_v46  ;;  %v5196_v11 = vld [vmem:[#allocation19_spill] sm:$0xff]  ;;  %v4576_v54 = vpop.permute.xlu0 %1464 }
 0x582   :  { %v1942_v6 = vmul.f32 %v1878_v17, %v4547_v10  ;;  %v1764_v48 = vmul.f32 0.5, %v5196_v11  ;;  %v5197_v5 = vld [vmem:[#allocation21_spill] sm:$0xff]  ;;  %v4567_v20 = vpop.eup %2952  ;;  %2962 = vtanh.f32 %v2089_v45  ;;  %v5198_v46 = vld [vmem:[#allocation38_spill] sm:$0xff]  ;;  %v2216_v11 = vadd.f32 1.0, %v4304_v55 }
 0x583   :  { %v1768_v4 = vmul.f32 0.5, %v5197_v5  ;;  %v1928_v37 = vmul.f32 %v1864_v60, %v4551_v15  ;;  %v4570_v3 = vmul.f32 %v2226_v58, %v1778_v52  ;;  %v4572_v31 = vmul.f32 %v2230_v23, %v1782_v9  ;;  %v4574_v36 = vpop.eup %2954 }
 0x584   :  { %v2006_v28 = vmul.f32 %v1942_v6, %v4547_v10  ;;  %v2212_v17 = vadd.f32 1.0, %v5198_v46  ;;  %v4583_v5 = vadd.f32 %v4345_v1, %v4531_v53  ;;  %v4590_v9 = vadd.f32 %v4356_v42, %v4238_v63 }
 0x585   :  { %v1992_v45 = vmul.f32 %v1928_v37, %v4551_v15  ;;  %v2350_v52 = vpack.c.bf16 %v4572_v31, %v4570_v3  ;;  %v4594_v60 = vadd.f32 %v4376_v24, %v4576_v54  ;;  %v2116_v58 = vmul.f32 0.7978846, %v2052_v47 }
 0x586   :  { %v2070_v55 = vadd.f32 %v2006_v28, %v4547_v10  ;;  %v4597_v23 = vmul.f32 %v2212_v17, %v1764_v48  ;;  %v4599_v1 = vmul.f32 %v2216_v11, %v1768_v4  ;;  %v1879_v37 = vmul.f32 0.044715, %v4583_v5 }
 0x587   :  { %5199 = vst [vmem:[#allocation20_spill] sm:$0xff] %v4594_v60  ;;  %v2056_v6 = vadd.f32 %v1992_v45, %v4551_v15  ;;  %v1882_v3 = vmul.f32 0.044715, %v4594_v60  ;;  %v4606_v63 = vadd.f32 %v4382_v44, %v4306_v21  ;;  %v1865_v47 = vmul.f32 0.044715, %v4590_v9 }
 0x588   :  { %v2134_v42 = vmul.f32 0.7978846, %v2070_v55  ;;  %v2344_v24 = vpack.c.bf16 %v4599_v1, %v4597_v23  ;;  %v4613_v48 = vadd.f32 %v4384_v40, %v4576_v54  ;;  %2964 = vtanh.f32 %v2130_v14 }
 0x589   :  { %5200 = vst [vmem:[#allocation33_spill] sm:$0xff] %v4606_v63  ;;  %v1765_v4 = vmul.f32 0.5, %v4101_v59  ;;  %v1946_v31 = vmul.f32 %v1882_v3, %v4594_v60  ;;  %v1868_v28 = vmul.f32 0.044715, %v4606_v63  ;;  %v2957_v46 = vpop.eup %2956  ;;  %2966 = vtanh.f32 %v2116_v58 }
 0x58a   :  { %5201 = vst [vmem:[#allocation19_spill] sm:$0xff] %v4613_v48  ;;  %v1769_v44 = vmul.f32 0.5, %v4138_v27  ;;  %v1883_v17 = vmul.f32 0.044715, %v4613_v48  ;;  %v4622_v11 = vadd.f32 %v4393_v29, %v4306_v21  ;;  %v2959_v45 = vpop.eup %2958  ;;  %v2227_v40 = vadd.f32 1.0, %v2957_v46 }
 0x58b   :  { %v2120_v55 = vmul.f32 0.7978846, %v2056_v6  ;;  %v1943_v14 = vmul.f32 %v1879_v37, %v4583_v5  ;;  %v2010_v59 = vmul.f32 %v1946_v31, %v4594_v60  ;;  %v2961_v23 = vpop.eup %2960  ;;  %v2231_v1 = vadd.f32 1.0, %v2959_v45 }
 0x58c   :  { %5202 = vst [vmem:[#allocation21_spill] sm:$0xff] %v4622_v11  ;;  %2968 = vtanh.f32 %v2134_v42  ;;  %v1929_v58 = vmul.f32 %v1865_v47, %v4590_v9  ;;  %v1932_v27 = vmul.f32 %v1868_v28, %v4606_v63  ;;  %v2963_v3 = vpop.eup %2962  ;;  %v2291_v15 = vmul.f32 %v2227_v40, %v4525_v7  ;;  %v5203_v40 = vld [vmem:[#allocation24_spill] sm:$0xff] }
 0x58d   :  { %v2213_v10 = vadd.f32 1.0, %v2961_v23  ;;  %v1947_v21 = vmul.f32 %v1883_v17, %v4613_v48  ;;  %v1869_v29 = vmul.f32 0.044715, %v4622_v11  ;;  %v2295_v6 = vmul.f32 %v2231_v1, %v4534_v34  ;;  %v5204_v34 = vld [vmem:[#allocation30_spill] sm:$0xff] }
 0x58e   :  { %v2217_v37 = vadd.f32 1.0, %v2963_v3  ;;  %v2074_v31 = vadd.f32 %v2010_v59, %v4594_v60  ;;  %v1996_v46 = vmul.f32 %v1932_v27, %v4606_v63  ;;  %v4636_v42 = vmul.f32 %v4522_v26, %v4476_v51  ;;  %v5216_v60 = vld [vmem:[#allocation23_spill] sm:$0xff] }
 0x58f   :  { %v2277_v47 = vmul.f32 %v2213_v10, %v1765_v4  ;;  %2970 = vtanh.f32 %v2120_v55  ;;  %v4639_v7 = vmul.f32 %v1943_v14, %v4583_v5  ;;  %v2351_v28 = vpack.c.bf16 %v2295_v6, %v2291_v15  ;;  %v5206_v10 = vld [vmem:[#allocation28_spill] sm:$0xff]  ;;  %v5207_v4 = vld [vmem:[#allocation39_spill] sm:$0xff]  ;;  %v4655_v14 = vpop.permute.xlu1 %1469 }
 0x590   :  { %v2281_v17 = vmul.f32 %v2217_v37, %v1769_v44  ;;  %v2060_v45 = vadd.f32 %v1996_v46, %v4606_v63  ;;  %v2043_v23 = vadd.f32 %v5204_v34, %v5203_v40  ;;  %v4645_v59 = vmul.f32 %v1929_v58, %v4590_v9  ;;  %v5209_v37 = vld [vmem:[#allocation36_spill] sm:$0xff] }
 0x591   :  { %v4648_v1 = vmul.f32 %v1947_v21, %v4613_v48  ;;  %v4651_v26 = vmul.f32 0.5, %v5203_v40  ;;  %v2047_v55 = vadd.f32 %v5207_v4, %v5206_v10  ;;  %2414 = vmatprep.subr.bf16.mxu0 %v2351_v28  ;;  %v2138_v44 = vmul.f32 0.7978846, %v2074_v31  ;;  %v5208_v21 = vld [vmem:[#allocation25_spill] sm:$0xff]  ;;  %v5215_v63 = vld [vmem:[#allocation48_spill] sm:$0xff]  ;;  %v5218_v48 = vld [vmem:[#allocation43_spill] sm:$0xff] }
 0x592   :  { %v2345_v15 = vpack.c.bf16 %v2281_v17, %v2277_v47  ;;  %v1933_v27 = vmul.f32 %v1869_v29, %v4622_v11  ;;  %v2107_v3 = vmul.f32 0.7978846, %v2043_v23  ;;  %v4658_v6 = vpop.eup %2964  ;;  %2415 = vmatpush1.bf16.msra.mxu0 %v2350_v52  ;;  %v2029_v46 = vadd.f32 %v5209_v37, %v5208_v21  ;;  %v5212_v52 = vld [vmem:[#allocation22_spill] sm:$0xff] }
 0x593   :  { %5205 = vst [vmem:[#allocation38_spill] sm:$0xff] %v4648_v1  ;;  %v2111_v58 = vmul.f32 0.7978846, %v2047_v55  ;;  %v2033_v40 = vadd.f32 %v4309_v39, %v4198_v49  ;;  %v4666_v34 = vadd.f32 %v4395_v62, %v4655_v14  ;;  %v4668_v28 = vpop.eup %2966  ;;  %v2124_v31 = vmul.f32 0.7978846, %v2060_v45  ;;  %v5213_v17 = vld [vmem:[#allocation26_spill] sm:$0xff] }
 0x594   :  { %2463 = vmatprep.subr.bf16.mxu1 %v2345_v15  ;;  %v4672_v29 = vadd.f32 %v4405_v41, %v4370_v13  ;;  %v1786_v47 = vmul.f32 0.5, %v5212_v52  ;;  %v1790_v23 = vmul.f32 0.5, %v5213_v17  ;;  %2972 = vtanh.f32 %v2107_v3  ;;  %v5214_v45 = vld [vmem:[#allocation41_spill] sm:$0xff] }
 0x595   :  { %5210 = vst [vmem:[#allocation24_spill] sm:$0xff] %v4666_v34  ;;  %2464 = vmatpush1.bf16.msra.mxu1 %v2344_v24  ;;  %v2093_v4 = vmul.f32 0.7978846, %v2029_v46  ;;  %v2097_v39 = vmul.f32 0.7978846, %v2033_v40  ;;  %2974 = vtanh.f32 %v2111_v58  ;;  %v2234_v37 = vadd.f32 1.0, %v5214_v45 }
 0x596   :  { %5211 = vst [vmem:[#allocation30_spill] sm:$0xff] %v4672_v29  ;;  %v1886_v55 = vmul.f32 0.044715, %v4666_v34  ;;  %v4677_v62 = vpop.eup %2968  ;;  %v1872_v15 = vmul.f32 0.044715, %v4672_v29  ;;  %v2238_v41 = vadd.f32 1.0, %v5215_v63 }
 0x597   :  { %2976 = vtanh.f32 %v2093_v4  ;;  %v1772_v17 = vmul.f32 0.5, %v5216_v60  ;;  %v5217_v24 = vld [vmem:[#allocation27_spill] sm:$0xff]  ;;  %v4686_v40 = vmul.f32 %v2234_v37, %v1786_v47  ;;  %v2220_v63 = vadd.f32 1.0, %v5218_v48 }
 0x598   :  { %v1950_v52 = vmul.f32 %v1886_v55, %v4666_v34  ;;  %v1776_v3 = vmul.f32 0.5, %v5217_v24  ;;  %2978 = vtanh.f32 %v2097_v39  ;;  %v1936_v46 = vmul.f32 %v1872_v15, %v4672_v29  ;;  %v5219_v55 = vld [vmem:[#allocation50_spill] sm:$0xff] }
 0x599   :  { %v4688_v1 = vmul.f32 %v2238_v41, %v1790_v23  ;;  %v4690_v58 = vpop.eup %2970  ;;  %v2224_v4 = vadd.f32 1.0, %v4414_v32  ;;  %v4697_v60 = vadd.f32 %v5219_v55, %v4655_v14  ;;  %v5220_v23 = vld [vmem:[#allocation51_spill] sm:$0xff]  ;;  %v4708_v37 = vadd.f32 %v4448_v12, %v4428_v33 }
 0x59a   :  { %v2014_v45 = vmul.f32 %v1950_v52, %v4666_v34  ;;  %v2000_v39 = vmul.f32 %v1936_v46, %v4672_v29  ;;  %v4704_v15 = vadd.f32 %v5220_v23, %v4370_v13  ;;  %v4711_v32 = vmul.f32 %v2220_v63, %v1772_v17 }
 0x59b   :  { %v2354_v47 = vpack.c.bf16 %v4688_v1, %v4686_v40  ;;  %v4713_v41 = vmul.f32 %v2224_v4, %v1776_v3  ;;  %v1887_v52 = vmul.f32 0.044715, %v4697_v60  ;;  %v1876_v46 = vmul.f32 0.044715, %v4708_v37 }
 0x59c   :  { %v2078_v48 = vadd.f32 %v2014_v45, %v4666_v34  ;;  %v2064_v24 = vadd.f32 %v2000_v39, %v4672_v29  ;;  %v1873_v1 = vmul.f32 0.044715, %v4704_v15  ;;  %v4721_v13 = vadd.f32 %v4460_v2, %v4428_v33 }
 0x59d   :  { %2980 = vtanh.f32 %v2138_v44  ;;  %v1791_v12 = vmul.f32 0.5, %v5206_v10  ;;  %v2348_v17 = vpack.c.bf16 %v4713_v41, %v4711_v32  ;;  %v4727_v3 = vmul.f32 %v1933_v27, %v4622_v11  ;;  %v5222_v44 = vld [vmem:[#allocation34_spill] sm:$0xff]  ;;  %v5223_v10 = vld [vmem:[#allocation44_spill] sm:$0xff] }
 0x59e   :  { %v2142_v40 = vmul.f32 0.7978846, %v2078_v48  ;;  %v2128_v45 = vmul.f32 0.7978846, %v2064_v24  ;;  %v1951_v63 = vmul.f32 %v1887_v52, %v4697_v60  ;;  %v1940_v4 = vmul.f32 %v1876_v46, %v4708_v37  ;;  %v2973_v55 = vpop.eup %2972 }
 0x59f   :  { %5221 = vst [vmem:[#allocation28_spill] sm:$0xff] %v4727_v3  ;;  %2982 = vtanh.f32 %v2124_v31  ;;  %v1773_v33 = vmul.f32 0.5, %v5208_v21  ;;  %v1777_v2 = vmul.f32 0.5, %v4198_v49  ;;  %v2051_v39 = vadd.f32 %v5223_v10, %v5222_v44  ;;  %v2975_v23 = vpop.eup %2974  ;;  %v5224_v31 = vld [vmem:[#allocation60_spill] sm:$0xff] }
 0x5a0   :  { %v2235_v48 = vadd.f32 1.0, %v2973_v55  ;;  %v1937_v32 = vmul.f32 %v1873_v1, %v4704_v15  ;;  %v1877_v27 = vmul.f32 0.044715, %v4721_v13  ;;  %v4738_v41 = vmul.f32 0.5, %v5222_v44 }
 0x5a1   :  { %v2977_v52 = vpop.eup %2976  ;;  %v2239_v24 = vadd.f32 1.0, %v2975_v23  ;;  %2984 = vtanh.f32 %v2142_v40  ;;  %v2055_v21 = vadd.f32 %v5224_v31, %v4320_v38  ;;  %v2115_v46 = vmul.f32 0.7978846, %v2051_v39 }
 0x5a2   :  { %v2979_v49 = vpop.eup %2978  ;;  %v2221_v29 = vadd.f32 1.0, %v2977_v52  ;;  %2986 = vtanh.f32 %v2128_v45  ;;  %v4743_v10 = vmul.f32 %v1951_v63, %v4697_v60  ;;  %v2004_v1 = vmul.f32 %v1940_v4, %v4708_v37  ;;  %v5225_v63 = vld [vmem:[#allocation35_spill] sm:$0xff]  ;;  %v5226_v52 = vld [vmem:[#allocation45_spill] sm:$0xff] }
 0x5a3   :  { %v2299_v55 = vmul.f32 %v2235_v48, %v4651_v26  ;;  %v2303_v34 = vmul.f32 %v2239_v24, %v1791_v12  ;;  %v2225_v44 = vadd.f32 1.0, %v2979_v49  ;;  %v2119_v3 = vmul.f32 0.7978846, %v2055_v21  ;;  %v5230_v24 = vld [vmem:[#allocation52_spill] sm:$0xff] }
 0x5a4   :  { %v2285_v11 = vmul.f32 %v2221_v29, %v1773_v33  ;;  %v4748_v40 = vmul.f32 %v1937_v32, %v4704_v15  ;;  %v4751_v23 = vmul.f32 0.5, %v4320_v38  ;;  %2988 = vtanh.f32 %v2115_v46  ;;  %v5227_v29 = vld [vmem:[#allocation57_spill] sm:$0xff]  ;;  %v5228_v33 = vld [vmem:[#allocation31_spill] sm:$0xff] }
 0x5a5   :  { %v2355_v39 = vpack.c.bf16 %v2303_v34, %v2299_v55  ;;  %v2289_v45 = vmul.f32 %v2225_v44, %v1777_v2  ;;  %2990 = vtanh.f32 %v2119_v3  ;;  %v2037_v31 = vadd.f32 %v5226_v52, %v5225_v63  ;;  %v5229_v3 = vld [vmem:[#allocation37_spill] sm:$0xff]  ;;  %v5232_v55 = vld [vmem:[#allocation32_spill] sm:$0xff] }
 0x5a6   :  { %v2068_v4 = vadd.f32 %v2004_v1, %v4708_v37  ;;  %v2041_v26 = vadd.f32 %v4488_v8, %v4341_v19  ;;  %v4760_v12 = vadd.f32 %v5227_v29, %v4531_v53  ;;  %v1794_v48 = vmul.f32 0.5, %v5228_v33  ;;  %v5231_v8 = vld [vmem:[#allocation58_spill] sm:$0xff] }
 0x5a7   :  { %v4763_v38 = vpop.eup %2980  ;;  %2416 = vmatprep.subr.bf16.mxu0 %v2355_v39  ;;  %v2349_v34 = vpack.c.bf16 %v2289_v45, %v2285_v11  ;;  %v2101_v2 = vmul.f32 0.7978846, %v2037_v31  ;;  %v1798_v32 = vmul.f32 0.5, %v5229_v3  ;;  %v2242_v21 = vadd.f32 1.0, %v5230_v24  ;;  %v5233_v11 = vld [vmem:[#allocation40_spill] sm:$0xff]  ;;  %v5234_v45 = vld [vmem:[#allocation54_spill] sm:$0xff] }
 0x5a8   :  { %2417 = vmatpush1.bf16.msra.mxu0 %v2354_v47  ;;  %v2105_v46 = vmul.f32 0.7978846, %v2041_v26  ;;  %v1880_v49 = vmul.f32 0.044715, %v4760_v12  ;;  %v2246_v1 = vadd.f32 1.0, %v5231_v8  ;;  %v1780_v44 = vmul.f32 0.5, %v5232_v55 }
 0x5a9   :  { %v4770_v52 = vpop.eup %2982  ;;  %2465 = vmatprep.subr.bf16.mxu1 %v2349_v34  ;;  %2992 = vtanh.f32 %v2101_v2  ;;  %v4772_v29 = vmul.f32 %v2242_v21, %v1794_v48  ;;  %v1784_v39 = vmul.f32 0.5, %v5233_v11  ;;  %v2228_v31 = vadd.f32 1.0, %v5234_v45  ;;  %v5235_v34 = vld [vmem:[#allocation59_spill] sm:$0xff] }
 0x5aa   :  { %2466 = vmatpush1.bf16.msra.mxu1 %v2348_v17  ;;  %2994 = vtanh.f32 %v2105_v46  ;;  %v1944_v47 = vmul.f32 %v1880_v49, %v4760_v12  ;;  %v2310_v26 = vmul.f32 %v2246_v1, %v1798_v32  ;;  %v2232_v33 = vadd.f32 1.0, %v4500_v43 }
 0x5ab   :  { %v4778_v3 = vpop.eup %2984  ;;  %v1941_v24 = vmul.f32 %v1877_v27, %v4721_v13  ;;  %v4783_v2 = vadd.f32 %v5235_v34, %v4531_v53  ;;  %v4787_v48 = vadd.f32 %v4509_v56, %v4576_v54  ;;  %v4791_v17 = vadd.f32 %v4516_v0, %v4576_v54 }
 0x5ac   :  { %v4793_v21 = vpop.eup %2986  ;;  %v2132_v32 = vmul.f32 0.7978846, %v2068_v4  ;;  %v2358_v43 = vpack.c.bf16 %v2310_v26, %v4772_v29  ;;  %v4796_v46 = vmul.f32 %v2228_v31, %v1780_v44  ;;  %v4798_v27 = vmul.f32 %v2232_v33, %v1784_v39 }
 0x5ad   :  { %v2008_v53 = vmul.f32 %v1944_v47, %v4760_v12  ;;  %v1881_v49 = vmul.f32 0.044715, %v4783_v2  ;;  %v1884_v56 = vmul.f32 0.044715, %v4787_v48  ;;  %v2059_v8 = vadd.f32 %v4495_v25, %v4361_v61 }
 0x5ae   :  { %v2989_v0 = vpop.eup %2988  ;;  %v1781_v54 = vmul.f32 0.5, %v5225_v63  ;;  %v2352_v4 = vpack.c.bf16 %v4798_v27, %v4796_v46  ;;  %v1885_v1 = vmul.f32 0.044715, %v4791_v17  ;;  %v2063_v55 = vadd.f32 %v4503_v50, %v4426_v35 }
 0x5af   :  { %v2991_v44 = vpop.eup %2990  ;;  %v4812_v29 = vmul.f32 %v1941_v24, %v4721_v13  ;;  %v2243_v11 = vadd.f32 1.0, %v2989_v0  ;;  %v1785_v39 = vmul.f32 0.5, %v4341_v19  ;;  %v1948_v25 = vmul.f32 %v1884_v56, %v4787_v48 }
 0x5b0   :  { %2996 = vtanh.f32 %v2132_v32  ;;  %v2247_v45 = vadd.f32 1.0, %v2991_v44  ;;  %v4817_v63 = vmul.f32 0.5, %v4361_v61  ;;  %v2123_v31 = vmul.f32 0.7978846, %v2059_v8 }
 0x5b1   :  { %v2072_v47 = vadd.f32 %v2008_v53, %v4760_v12  ;;  %v1945_v26 = vmul.f32 %v1881_v49, %v4783_v2  ;;  %v2012_v50 = vmul.f32 %v1948_v25, %v4787_v48  ;;  %v4823_v33 = vmul.f32 0.5, %v4426_v35 }
 0x5b2   :  { %v2307_v24 = vmul.f32 %v2243_v11, %v4738_v41  ;;  %v2311_v19 = vmul.f32 %v2247_v45, %v4751_v23  ;;  %v1949_v34 = vmul.f32 %v1885_v1, %v4791_v17  ;;  %v2127_v32 = vmul.f32 0.7978846, %v2063_v55  ;;  %v5237_v45 = vld [vmem:[#allocation47_spill] sm:$0xff] }
 0x5b3   :  { %v2993_v46 = vpop.eup %2992  ;;  %v2076_v61 = vadd.f32 %v2012_v50, %v4787_v48  ;;  %2998 = vtanh.f32 %v2123_v31  ;;  %v2045_v27 = vadd.f32 %v4498_v16, %v4365_v18  ;;  %v2049_v53 = vadd.f32 %v4506_v22, %v4438_v57  ;;  %v5236_v22 = vld [vmem:[#allocation42_spill] sm:$0xff]  ;;  %v5238_v50 = vld [vmem:[#allocation63_spill] sm:$0xff] }
 0x5b4   :  { %v2995_v49 = vpop.eup %2994  ;;  %v2359_v35 = vpack.c.bf16 %v2311_v19, %v2307_v24  ;;  %v2229_v56 = vadd.f32 1.0, %v2993_v46  ;;  %3000 = vtanh.f32 %v2127_v32  ;;  %v4835_v41 = vadd.f32 %v4529_v30, %v4655_v14  ;;  %v5239_v19 = vld [vmem:[#allocation46_spill] sm:$0xff] }
 0x5b5   :  { %v2233_v23 = vadd.f32 1.0, %v2995_v49  ;;  %v2136_v8 = vmul.f32 0.7978846, %v2072_v47  ;;  %v4838_v0 = vmul.f32 0.5, %v4365_v18  ;;  %v2109_v1 = vmul.f32 0.7978846, %v2045_v27 }
 0x5b6   :  { %2418 = vmatprep.subr.bf16.mxu0 %v2359_v35  ;;  %v2293_v55 = vmul.f32 %v2229_v56, %v1781_v54  ;;  %v2113_v16 = vmul.f32 0.7978846, %v2049_v53  ;;  %v1888_v44 = vmul.f32 0.044715, %v4835_v41  ;;  %v1802_v11 = vmul.f32 0.5, %v5236_v22  ;;  %v5241_v35 = vld [vmem:[#allocation18_spill] sm:$0xff] }
 0x5b7   :  { %v2297_v25 = vmul.f32 %v2233_v23, %v1785_v39  ;;  %2419 = vmatpush1.bf16.msra.mxu0 %v2358_v43  ;;  %v1806_v31 = vmul.f32 0.5, %v5237_v45  ;;  %v2250_v30 = vadd.f32 1.0, %v5238_v50  ;;  %v2254_v24 = vadd.f32 1.0, %v4567_v20  ;;  %v5240_v39 = vld [vmem:[#allocation49_spill] sm:$0xff] }
 0x5b8   :  { %v2140_v47 = vmul.f32 0.7978846, %v2076_v61  ;;  %3002 = vtanh.f32 %v2109_v1  ;;  %v1952_v18 = vmul.f32 %v1888_v44, %v4835_v41  ;;  %v1788_v32 = vmul.f32 0.5, %v5239_v19 }
 0x5b9   :  { %v2353_v54 = vpack.c.bf16 %v2297_v25, %v2293_v55  ;;  %3004 = vtanh.f32 %v2113_v16  ;;  %v2314_v46 = vmul.f32 %v2250_v30, %v1802_v11  ;;  %v2318_v27 = vmul.f32 %v2254_v24, %v1806_v31  ;;  %v5242_v55 = vld [vmem:[#allocation56_spill] sm:$0xff]  ;;  %v5243_v16 = vld [vmem:[#allocation61_spill] sm:$0xff]  ;;  %v5244_v25 = vld [vmem:[#allocation62_spill] sm:$0xff] }
 0x5ba   :  { %v4847_v53 = vpop.eup %2996  ;;  %v2016_v43 = vmul.f32 %v1952_v18, %v4835_v41  ;;  %v1792_v49 = vmul.f32 0.5, %v5240_v39  ;;  %v2236_v56 = vadd.f32 1.0, %v5241_v35  ;;  %v2240_v20 = vadd.f32 1.0, %v4574_v36  ;;  %v5246_v35 = vld [vmem:[#allocation29_spill] sm:$0xff] }
 0x5bb   :  { %2467 = vmatprep.subr.bf16.mxu1 %v2353_v54  ;;  %v4854_v61 = vmul.f32 %v1945_v26, %v4783_v2  ;;  %v4857_v23 = vmul.f32 %v1949_v34, %v4791_v17  ;;  %v2362_v1 = vpack.c.bf16 %v2318_v27, %v2314_v46  ;;  %v2067_v44 = vadd.f32 %v5243_v16, %v5242_v55  ;;  %v5245_v27 = vld [vmem:[#allocation53_spill] sm:$0xff] }
 0x5bc   :  { %3006 = vtanh.f32 %v2136_v8  ;;  %2468 = vmatpush1.bf16.msra.mxu1 %v2352_v4  ;;  %v4861_v22 = vmul.f32 %v2236_v56, %v1788_v32  ;;  %v4863_v11 = vmul.f32 %v2240_v20, %v1792_v49  ;;  %v4867_v36 = vadd.f32 %v5244_v25, %v4655_v14  ;;  %v5248_v25 = vld [vmem:[#allocation64_spill] sm:$0xff] }
 0x5bd   :  { %v2999_v45 = vpop.eup %2998  ;;  %3008 = vtanh.f32 %v2140_v47  ;;  %v1793_v26 = vmul.f32 0.5, %v4438_v57  ;;  %v2071_v34 = vadd.f32 %v4639_v7, %v4583_v5  ;;  %v2131_v31 = vmul.f32 0.7978846, %v2067_v44 }
 0x5be   :  { %v3001_v50 = vpop.eup %3000  ;;  %v2251_v30 = vadd.f32 1.0, %v2999_v45  ;;  %v2080_v4 = vadd.f32 %v2016_v43, %v4835_v41  ;;  %v2356_v8 = vpack.c.bf16 %v4863_v11, %v4861_v22  ;;  %v4876_v24 = vmul.f32 0.5, %v5242_v55  ;;  %v5247_v22 = vld [vmem:[#allocation55_spill] sm:$0xff] }
 0x5bf   :  { %v2255_v14 = vadd.f32 1.0, %v3001_v50  ;;  %v2135_v18 = vmul.f32 0.7978846, %v2071_v34  ;;  %3010 = vtanh.f32 %v2131_v31  ;;  %v2053_v57 = vadd.f32 %v4636_v42, %v4476_v51 }
 0x5c0   :  { %v2315_v47 = vmul.f32 %v2251_v30, %v4817_v63  ;;  %v1889_v7 = vmul.f32 0.044715, %v4867_v36  ;;  %v4883_v19 = vmul.f32 0.5, %v4583_v5  ;;  %v2057_v32 = vadd.f32 %v4645_v59, %v4590_v9 }
 0x5c1   :  { %v2319_v54 = vmul.f32 %v2255_v14, %v4823_v33  ;;  %3012 = vtanh.f32 %v2135_v18  ;;  %v2117_v46 = vmul.f32 0.7978846, %v2053_v57  ;;  %v1810_v43 = vmul.f32 0.5, %v5245_v27 }
 0x5c2   :  { %v3003_v39 = vpop.eup %3002  ;;  %v2121_v49 = vmul.f32 0.7978846, %v2057_v32  ;;  %v1814_v42 = vmul.f32 0.5, %v5246_v35  ;;  %v2258_v63 = vadd.f32 1.0, %v4658_v6  ;;  %v2262_v56 = vadd.f32 1.0, %v4677_v62 }
 0x5c3   :  { %v3005_v20 = vpop.eup %3004  ;;  %v2363_v5 = vpack.c.bf16 %v2319_v54, %v2315_v47  ;;  %v2237_v55 = vadd.f32 1.0, %v3003_v39  ;;  %v2144_v16 = vmul.f32 0.7978846, %v2080_v4  ;;  %3014 = vtanh.f32 %v2117_v46  ;;  %v5249_v47 = vld [vmem:[#allocation19_spill] sm:$0xff] }
 0x5c4   :  { %v2241_v59 = vadd.f32 1.0, %v3005_v20  ;;  %3016 = vtanh.f32 %v2121_v49  ;;  %v4892_v33 = vmul.f32 %v2258_v63, %v1810_v43  ;;  %v4894_v44 = vmul.f32 %v2262_v56, %v1814_v42  ;;  %v5254_v56 = vld [vmem:[#allocation24_spill] sm:$0xff] }
 0x5c5   :  { %2420 = vmatprep.subr.bf16.mxu0 %v2363_v5  ;;  %v1796_v11 = vmul.f32 0.5, %v5247_v22  ;;  %v1800_v45 = vmul.f32 0.5, %v5248_v25  ;;  %v2244_v6 = vadd.f32 1.0, %v4668_v28  ;;  %v2248_v62 = vadd.f32 1.0, %v4690_v58  ;;  %v5250_v28 = vld [vmem:[#allocation38_spill] sm:$0xff]  ;;  %v5255_v25 = vld [vmem:[#allocation33_spill] sm:$0xff] }
 0x5c6   :  { %v3007_v34 = vpop.eup %3006  ;;  %v2301_v31 = vmul.f32 %v2237_v55, %v4838_v0  ;;  %v2305_v50 = vmul.f32 %v2241_v59, %v1793_v26  ;;  %2421 = vmatpush1.bf16.msra.mxu0 %v2362_v1  ;;  %v1797_v30 = vmul.f32 0.5, %v4476_v51  ;;  %v2366_v4 = vpack.c.bf16 %v4894_v44, %v4892_v33  ;;  %v5251_v51 = vld [vmem:[#allocation21_spill] sm:$0xff]  ;;  %v5252_v26 = vld [vmem:[#allocation28_spill] sm:$0xff] }
 0x5c7   :  { %v4904_v14 = vpop.eup %3008  ;;  %v4906_v18 = vmul.f32 %v2244_v6, %v1796_v11  ;;  %v4908_v57 = vmul.f32 %v2248_v62, %v1800_v45  ;;  %v2075_v32 = vadd.f32 %v5250_v28, %v5249_v47  ;;  %v2079_v58 = vadd.f32 %v4743_v10, %v4697_v60  ;;  %v5253_v10 = vld [vmem:[#allocation20_spill] sm:$0xff]  ;;  %v5256_v62 = vld [vmem:[#allocation30_spill] sm:$0xff] }
 0x5c8   :  { %v2357_v0 = vpack.c.bf16 %v2305_v50, %v2301_v31  ;;  %3018 = vtanh.f32 %v2144_v16  ;;  %v1801_v1 = vmul.f32 0.5, %v4590_v9  ;;  %v2061_v54 = vadd.f32 %v5252_v26, %v5251_v51 }
 0x5c9   :  { %v3011_v46 = vpop.eup %3010  ;;  %v2360_v27 = vpack.c.bf16 %v4908_v57, %v4906_v18  ;;  %v2139_v43 = vmul.f32 0.7978846, %v2075_v32  ;;  %v2143_v39 = vmul.f32 0.7978846, %v2079_v58  ;;  %v2065_v49 = vadd.f32 %v4748_v40, %v4704_v15 }
 0x5ca   :  { %2469 = vmatprep.subr.bf16.mxu1 %v2357_v0  ;;  %v2259_v35 = vadd.f32 1.0, %v3011_v46  ;;  %v2125_v42 = vmul.f32 0.7978846, %v2061_v54  ;;  %v1818_v63 = vmul.f32 0.5, %v5253_v10  ;;  %v1822_v20 = vmul.f32 0.5, %v5254_v56 }
 0x5cb   :  { %v3013_v9 = vpop.eup %3012  ;;  %2470 = vmatpush1.bf16.msra.mxu1 %v2356_v8  ;;  %3020 = vtanh.f32 %v2139_v43  ;;  %v2129_v5 = vmul.f32 0.7978846, %v2065_v49  ;;  %v2266_v55 = vadd.f32 1.0, %v4763_v38  ;;  %v2270_v16 = vadd.f32 1.0, %v4778_v3 }
 0x5cc   :  { %v1953_v59 = vmul.f32 %v1889_v7, %v4867_v36  ;;  %v2263_v33 = vadd.f32 1.0, %v3013_v9  ;;  %v2323_v40 = vmul.f32 %v2259_v35, %v4876_v24  ;;  %3022 = vtanh.f32 %v2143_v39 }
 0x5cd   :  { %v3015_v44 = vpop.eup %3014  ;;  %3024 = vtanh.f32 %v2125_v42  ;;  %v4927_v22 = vmul.f32 %v2266_v55, %v1818_v63  ;;  %v4929_v11 = vmul.f32 %v2270_v16, %v1822_v20  ;;  %v1804_v8 = vmul.f32 0.5, %v5255_v25 }
 0x5ce   :  { %v3017_v45 = vpop.eup %3016  ;;  %v2327_v6 = vmul.f32 %v2263_v33, %v4883_v19  ;;  %v2245_v38 = vadd.f32 1.0, %v3015_v44  ;;  %3026 = vtanh.f32 %v2129_v5  ;;  %v2252_v3 = vadd.f32 1.0, %v4770_v52 }
 0x5cf   :  { %v2249_v7 = vadd.f32 1.0, %v3017_v45  ;;  %v2370_v24 = vpack.c.bf16 %v4929_v11, %v4927_v22  ;;  %v1808_v31 = vmul.f32 0.5, %v5256_v62  ;;  %v2256_v50 = vadd.f32 1.0, %v4793_v21 }
 0x5d0   :  { %v2017_v18 = vmul.f32 %v1953_v59, %v4867_v36  ;;  %v2367_v57 = vpack.c.bf16 %v2327_v6, %v2323_v40  ;;  %v2309_v28 = vmul.f32 %v2245_v38, %v1797_v30  ;;  %v2316_v32 = vmul.f32 %v2252_v3, %v1804_v8 }
 0x5d1   :  { %v2313_v58 = vmul.f32 %v2249_v7, %v1801_v1  ;;  %v2320_v0 = vmul.f32 %v2256_v50, %v1808_v31  ;;  %v2069_v19 = vadd.f32 %v4812_v29, %v4721_v13  ;;  %v2073_v52 = vadd.f32 %v4854_v61, %v4783_v2 }
 0x5d2   :  { %v3019_v26 = vpop.eup %3018  ;;  %2422 = vmatprep.subr.bf16.mxu0 %v2367_v57  ;;  %v1812_v54 = vmul.f32 0.5, %v4708_v37  ;;  %v1816_v46 = vmul.f32 0.5, %v4760_v12  ;;  %v2260_v21 = vadd.f32 1.0, %v4847_v53  ;;  %v2264_v43 = vadd.f32 1.0, %v3007_v34 }
 0x5d3   :  { %v2361_v39 = vpack.c.bf16 %v2313_v58, %v2309_v28  ;;  %2423 = vmatpush1.bf16.msra.mxu0 %v2366_v4  ;;  %v2364_v30 = vpack.c.bf16 %v2320_v0, %v2316_v32  ;;  %v2133_v1 = vmul.f32 0.7978846, %v2069_v19  ;;  %v2137_v49 = vmul.f32 0.7978846, %v2073_v52 }
 0x5d4   :  { %v1819_v35 = vmul.f32 0.5, %v5249_v47  ;;  %v1823_v29 = vmul.f32 0.5, %v4697_v60  ;;  %v2324_v42 = vmul.f32 %v2260_v21, %v1812_v54  ;;  %v2328_v61 = vmul.f32 %v2264_v43, %v1816_v46  ;;  %v2660_v54 = vpop.permute.xlu1 %2659 }
 0x5d5   :  { %v3021_v10 = vpop.eup %3020  ;;  %2471 = vmatprep.subr.bf16.mxu1 %v2361_v39  ;;  %v1805_v37 = vmul.f32 0.5, %v5251_v51  ;;  %3028 = vtanh.f32 %v2133_v1  ;;  %v2077_v12 = vadd.f32 %v4857_v23, %v4791_v17  ;;  %v2081_v53 = vadd.f32 %v2017_v18, %v4867_v36 }
 0x5d6   :  { %v3023_v34 = vpop.eup %3022  ;;  %2472 = vmatpush1.bf16.msra.mxu1 %v2360_v27  ;;  %v2267_v4 = vadd.f32 1.0, %v3021_v10  ;;  %v1809_v63 = vmul.f32 0.5, %v4704_v15  ;;  %3030 = vtanh.f32 %v2137_v49  ;;  %v2368_v47 = vpack.c.bf16 %v2328_v61, %v2324_v42  ;;  %v5259_v49 = vld [vmem:[#allocation6_spill] sm:$0xff] }
 0x5d7   :  { %v3025_v60 = vpop.eup %3024  ;;  %v2271_v56 = vadd.f32 1.0, %v3023_v34  ;;  %v2141_v20 = vmul.f32 0.7978846, %v2077_v12  ;;  %v2145_v9 = vmul.f32 0.7978846, %v2081_v53  ;;  %v2268_v5 = vadd.f32 1.0, %v4904_v14 }
 0x5d8   :  { %v3027_v51 = vpop.eup %3026  ;;  %v2253_v55 = vadd.f32 1.0, %v3025_v60  ;;  %v1820_v16 = vmul.f32 0.5, %v4787_v48  ;;  %v1824_v23 = vmul.f32 0.5, %v4835_v41  ;;  %v2272_v59 = vadd.f32 1.0, %v3019_v26  ;;  %v2866_v48 = vld [vmem:[%s5082_s11] sm:$0xff]   ;;  %v2655_v26 = vpop.permute.xlu0 %2654 }
 0x5d9   :  { %v2331_v33 = vmul.f32 %v2267_v4, %v1819_v35  ;;  %v2335_v27 = vmul.f32 %v2271_v56, %v1823_v29  ;;  %v2257_v40 = vadd.f32 1.0, %v3027_v51  ;;  %3032 = vtanh.f32 %v2141_v20  ;;  %v5260_v29 = vld [vmem:[#allocation3_spill] sm:$0xff] }
 0x5da   :  { %3034 = vtanh.f32 %v2145_v9  ;;  %v2332_v15 = vmul.f32 %v2268_v5, %v1820_v16  ;;  %v2336_v44 = vmul.f32 %v2272_v59, %v1824_v23  ;;  %v2317_v11 = vmul.f32 %v2253_v55, %v1805_v37  ;;  %v5261_v37 = vld [vmem:[#allocation7_spill] sm:$0xff] }
 0x5db   :  { %v2371_v22 = vpack.c.bf16 %v2335_v27, %v2331_v33  ;;  %v2321_v25 = vmul.f32 %v2257_v40, %v1809_v63  ;;  %v1813_v38 = vmul.f32 0.5, %v4721_v13  ;;  %v1817_v3 = vmul.f32 0.5, %v4783_v2  ;;  %v5262_v33 = vld [vmem:[#allocation4_spill] sm:$0xff] }
 0x5dc   :  { %v2372_v8 = vpack.c.bf16 %v2336_v44, %v2332_v15  ;;  %v5257_v62 = vmov 0   ;;  %v1821_v58 = vmul.f32 0.5, %v4791_v17  ;;  %v1825_v0 = vmul.f32 0.5, %v4867_v36  ;;  %v4968_v46 = vpop.permute.xlu0 %2664  ;;  %v4970_v17 = vpop.permute.xlu1 %2669  ;;  %v5263_v15 = vld [vmem:[#allocation8_spill] sm:$0xff] }
 0x5dd   :  { %2424 = vmatprep.subr.bf16.mxu0 %v2371_v22  ;;  %v2365_v14 = vpack.c.bf16 %v2321_v25, %v2317_v11  ;;  %v2673_v35 = vmul.f32 %v2655_v26, %v5259_v49  ;;  %v2676_v42 = vmul.f32 %v2660_v54, %v5260_v29  ;;  %v2677_v12 = vmul.f32 %v2660_v54, %v5261_v37  ;;  %v5264_v22 = vld [vmem:[#allocation5_spill] sm:$0xff] }
 0x5de   :  { %2425 = vmatpush1.bf16.msra.mxu0 %v2370_v24  ;;  %v2867_v24 = vld [vmem:[%s5082_s11 + $0x8] sm:$0xff]   ;;  %v2680_v27 = vmul.f32 %v4968_v46, %v5262_v33  ;;  %v2681_v44 = vmul.f32 %v4968_v46, %v5263_v15  ;;  %v2684_v11 = vmul.f32 %v4970_v17, %v5264_v22 }
 0x5df   :  { %v3029_v41 = vpop.eup %3028  ;;  %2473 = vmatprep.subr.bf16.mxu1 %v2365_v14  ;;  %v5265_v14 = vld [vmem:[#allocation9_spill] sm:$0xff] }
 0x5e0   :  { %v3031_v45 = vpop.eup %3030  ;;  %2474 = vmatpush1.bf16.msra.mxu1 %v2364_v30  ;;  %v2261_v6 = vadd.f32 1.0, %v3029_v41  ;;  %v4972_v36 = vpop.permute.xlu0 %2380  ;;  %v5258_v30 = vld [vmem:[#allocation2_spill] sm:$0xff] }
 0x5e1   :  { %2443 = vmatmul.mubr.bf16.vlgmr.msra.gmra.mrb[88].mxu0 %v2866_v48  ;;  %v2265_v7 = vadd.f32 1.0, %v3031_v45  ;;  %v4974_v21 = vpop.permute.xlu1 %2385  ;;  %v2672_v1 = vmul.f32 %v2655_v26, %v5258_v30 }
 0x5e2   :  { %2452 = vmatprep.mubr.bf16.mxu0 %v5257_v62  ;;  %v2325_v50 = vmul.f32 %v2261_v6, %v1813_v38 }
 0x5e3   :  { %v3033_v31 = vpop.eup %3032  ;;  %v2329_v18 = vmul.f32 %v2265_v7, %v1817_v3 }
 0x5e4   :  { %v3035_v57 = vpop.eup %3034  ;;  %v2269_v28 = vadd.f32 1.0, %v3033_v31  ;;  %v4976_v43 = vpop.permute.xlu0 %2390 }
 0x5e5   :  { %v2369_v32 = vpack.c.bf16 %v2329_v18, %v2325_v50  ;;  %v2273_v13 = vadd.f32 1.0, %v3035_v57  ;;  %v4978_v39 = vpop.permute.xlu1 %2395 }
 0x5e6   :  { %v2333_v2 = vmul.f32 %v2269_v28, %v1821_v58  ;;  %v5266_v28 = vld [vmem:[#allocation10_spill] sm:$0xff] }
 0x5e7   :  { %2475 = vmatprep.subr.bf16.mxu1 %v2369_v32  ;;  %v2337_v19 = vmul.f32 %v2273_v13, %v1825_v0  ;;  %v2674_v32 = vmul.f32 %v2655_v26, %v5266_v28  ;;  %v5267_v13 = vld [vmem:[#allocation14_spill] sm:$0xff] }
 0x5e8   :  { %2476 = vmatpush1.bf16.msra.mxu1 %v2368_v47  ;;  %v2691_v61 = vpop.permute.xlu0 %2690 }
 0x5e9   :  { %2453 = vmatmul.mubr.bf16.gmra.mrb[92].mxu0 %v2867_v24  ;;  %v2373_v52 = vpack.c.bf16 %v2337_v19, %v2333_v2  ;;  %v2708_v34 = vadd.f32 %v2691_v61, %v2672_v1  ;;  %v2696_v63 = vpop.permute.xlu1 %2695  ;;  %v2709_v60 = vadd.f32 %v2691_v61, %v2673_v35  ;;  %v2675_v2 = vmul.f32 %v2655_v26, %v5267_v13  ;;  %v5269_v35 = vld [vmem:[#allocation15_spill] sm:$0xff] }
 0x5ea   :  { %v2712_v5 = vadd.f32 %v2696_v63, %v2676_v42  ;;  %v2713_v23 = vadd.f32 %v2696_v63, %v2677_v12  ;;  %v2679_v29 = vmul.f32 %v2660_v54, %v5269_v35  ;;  %v2710_v42 = vadd.f32 %v2691_v61, %v2674_v32 }
 0x5eb   :  { %2477 = vmatprep.subr.bf16.mxu1 %v2373_v52  ;;  %v5268_v52 = vld [vmem:[#allocation11_spill] sm:$0xff]  ;;  %v2711_v12 = vadd.f32 %v2691_v61, %v2675_v2  ;;  %v5271_v61 = vld [vmem:[#allocation16_spill] sm:$0xff] }
 0x5ec   :  { %2478 = vmatpush1.bf16.msra.mxu1 %v2372_v8  ;;  %v2701_v25 = vpop.permute.xlu0 %2700  ;;  %v2678_v30 = vmul.f32 %v2660_v54, %v5268_v52 }
 0x5ed   :  { %v2716_v45 = vadd.f32 %v2701_v25, %v2680_v27  ;;  %v2706_v38 = vpop.permute.xlu1 %2705  ;;  %v2717_v7 = vadd.f32 %v2701_v25, %v2681_v44 }
 0x5ee   :  { %v2720_v18 = vadd.f32 %v2706_v38, %v2684_v11  ;;  %v2714_v54 = vadd.f32 %v2696_v63, %v2678_v30 }
 0x5ef   :  { %2496 = vmatmul.mubr.bf16.vlgmr.msra.gmra.mrb[88].mxu1 %v2866_v48  ;;  %v2685_v48 = vmul.f32 %v4970_v17, %v5265_v14 }
 0x5f0   :  { %2505 = vmatprep.mubr.bf16.mxu1 %v5257_v62 }
 0x5f1   :  { %v2721_v0 = vadd.f32 %v2706_v38, %v2685_v48 }
 0x5f7   :  { %2506 = vmatmul.mubr.bf16.gmra.mrb[92].mxu1 %v2867_v24 }
 0x6b4   :  { %v2444_v10 = vpop.f32.mrb[88].mxu0 }
 0x6b5   :  { %v2445_v53 = vadd.f32 %v2444_v10, %v4972_v36  ;;  %v2446_v4 = vpop.f32.mrb[89].mxu0 }
 0x6b6   :  { %v2447_v47 = vadd.f32 %v2446_v4, %v4972_v36  ;;  %v2448_v56 = vpop.f32.mrb[90].mxu0 }
 0x6b7   :  { %v2724_v20 = vadd.f32 %v2708_v34, %v2445_v53  ;;  %v2449_v9 = vadd.f32 %v2448_v56, %v4974_v21  ;;  %v2450_v51 = vpop.f32.mrb[91].mxu0 }
 0x6b8   :  { %v2725_v55 = vadd.f32 %v2709_v60, %v2447_v47  ;;  %v2451_v16 = vadd.f32 %v2450_v51, %v4974_v21 }
 0x6b9   :  { %2740 = vst [vmem:[%s5083_s15] sm:$0xff] %v2724_v20  ;;  %v2728_v59 = vadd.f32 %v2712_v5, %v2449_v9  ;;  %v2715_v20 = vadd.f32 %v2696_v63, %v2679_v29  ;;  %v5270_v5 = vld [vmem:[#allocation12_spill] sm:$0xff] }
 0x6ba   :  { %2741 = vst [vmem:[%s5083_s15 + $0x8] sm:$0xff] %v2725_v55  ;;  %v2729_v40 = vadd.f32 %v2713_v23, %v2451_v16  ;;  %v2682_v51 = vmul.f32 %v4968_v46, %v5270_v5  ;;  %v2683_v55 = vmul.f32 %v4968_v46, %v5271_v61  ;;  %v5273_v23 = vld [vmem:[#allocation17_spill] sm:$0xff] }
 0x6bb   :  { %2742 = vst [vmem:[%s5083_s15 + $0x10] sm:$0xff] %v2728_v59  ;;  %v2687_v59 = vmul.f32 %v4970_v17, %v5273_v23 }
 0x6bc   :  { %2743 = vst [vmem:[%s5083_s15 + $0x18] sm:$0xff] %v2729_v40  ;;  %v2454_v8 = vpop.f32.mrb[92].mxu0  ;;  %v2718_v27 = vadd.f32 %v2701_v25, %v2682_v51  ;;  %v2719_v15 = vadd.f32 %v2701_v25, %v2683_v55 }
 0x6bd   :  { %v2455_v41 = vadd.f32 %v2454_v8, %v4976_v43  ;;  %v2456_v6 = vpop.f32.mrb[93].mxu0 }
 0x6be   :  { %v2457_v3 = vadd.f32 %v2456_v6, %v4976_v43  ;;  %v2458_v62 = vpop.f32.mrb[94].mxu0 }
 0x6bf   :  { %v2732_v31 = vadd.f32 %v2716_v45, %v2455_v41  ;;  %v2459_v50 = vadd.f32 %v2458_v62, %v4978_v39  ;;  %v2460_v57 = vpop.f32.mrb[95].mxu0  ;;  %v2723_v45 = vadd.f32 %v2706_v38, %v2687_v59 }
 0x6c0   :  { %v2733_v24 = vadd.f32 %v2717_v7, %v2457_v3  ;;  %v2461_v58 = vadd.f32 %v2460_v57, %v4978_v39 }
 0x6c1   :  { %2744 = vst [vmem:[%s5083_s15 + $0x20] sm:$0xff] %v2732_v31  ;;  %v2736_v19 = vadd.f32 %v2720_v18, %v2459_v50 }
 0x6c2   :  { %2745 = vst [vmem:[%s5083_s15 + $0x28] sm:$0xff] %v2733_v24  ;;  %v2737_v1 = vadd.f32 %v2721_v0, %v2461_v58  ;;  %v2497_v49 = vpop.f32.mrb[88].mxu1 }
 0x6c3   :  { %2746 = vst [vmem:[%s5083_s15 + $0x30] sm:$0xff] %v2736_v19  ;;  %v2498_v26 = vadd.f32 %v2497_v49, %v4972_v36  ;;  %v2499_v10 = vpop.f32.mrb[89].mxu1 }
 0x6c4   :  { %2747 = vst [vmem:[%s5083_s15 + $0x38] sm:$0xff] %v2737_v1  ;;  %v2500_v37 = vadd.f32 %v2499_v10, %v4972_v36  ;;  %v2501_v53 = vpop.f32.mrb[90].mxu1 }
 0x6c5   :  { %v2726_v34 = vadd.f32 %v2710_v42, %v2498_v26  ;;  %v2502_v4 = vadd.f32 %v2501_v53, %v4974_v21  ;;  %v2503_v47 = vpop.f32.mrb[91].mxu1 }
 0x6c6   :  { %v2727_v60 = vadd.f32 %v2711_v12, %v2500_v37  ;;  %v2504_v56 = vadd.f32 %v2503_v47, %v4974_v21  ;;  %v5272_v21 = vld [vmem:[#allocation13_spill] sm:$0xff] }
 0x6c7   :  { %2837 = vst [vmem:[%s5083_s15 + $0x40] sm:$0xff] %v2726_v34  ;;  %v2730_v9 = vadd.f32 %v2714_v54, %v2502_v4  ;;  %v2686_v63 = vmul.f32 %v4970_v17, %v5272_v21 }
 0x6c8   :  { %2838 = vst [vmem:[%s5083_s15 + $0x48] sm:$0xff] %v2727_v60  ;;  %v2731_v36 = vadd.f32 %v2715_v20, %v2504_v56 }
 0x6c9   :  { %2839 = vst [vmem:[%s5083_s15 + $0x50] sm:$0xff] %v2730_v9  ;;  %v2722_v8 = vadd.f32 %v2706_v38, %v2686_v63 }
 0x6ca   :  { %2840 = vst [vmem:[%s5083_s15 + $0x58] sm:$0xff] %v2731_v36  ;;  %v2507_v16 = vpop.f32.mrb[92].mxu1 }
 0x6cb   :  { %v2508_v33 = vadd.f32 %v2507_v16, %v4976_v43  ;;  %v2509_v40 = vpop.f32.mrb[93].mxu1 }
 0x6cc   :  { %v2510_v46 = vadd.f32 %v2509_v40, %v4976_v43  ;;  %v2511_v44 = vpop.f32.mrb[94].mxu1 }
 0x6cd   :  { %v2734_v22 = vadd.f32 %v2718_v27, %v2508_v33  ;;  %v2512_v11 = vadd.f32 %v2511_v44, %v4978_v39  ;;  %v2513_v14 = vpop.f32.mrb[95].mxu1 }
 0x6ce   :  { %v2735_v48 = vadd.f32 %v2719_v15, %v2510_v46  ;;  %v2514_v41 = vadd.f32 %v2513_v14, %v4978_v39 }
 0x6cf   :  { %2841 = vst [vmem:[%s5083_s15 + $0x60] sm:$0xff] %v2734_v22  ;;  %v2738_v17 = vadd.f32 %v2722_v8, %v2512_v11 }
 0x6d0   :  { %2842 = vst [vmem:[%s5083_s15 + $0x68] sm:$0xff] %v2735_v48  ;;  %v2739_v43 = vadd.f32 %v2723_v45, %v2514_v41 }
 0x6d1   :  { %2843 = vst [vmem:[%s5083_s15 + $0x70] sm:$0xff] %v2738_v17 }
 0x6d2   :  { %2844 = vst [vmem:[%s5083_s15 + $0x78] sm:$0xff] %v2739_v43 }

</bundles_post_ra>
